<compile_context>
chip_gen: v6e
topology: v6e:2x2x1
jax: 0.10.0
libtpu: 0.0.40
codegen_flags: <defaults>
</compile_context>

<pallas_src>
import functools

import jax
import jax.numpy as jnp
from jax.experimental import pallas as pl
from jax.experimental.pallas import tpu as pltpu

_MIB = 1024 * 1024


# ------------------------------------------------------------ hardware query

def _tpu_caps():
    """Best-effort hardware query with conservative fallbacks."""
    vmem_cap = 64 * _MIB                      # conservative default (v7x per-core VMEM)
    try:
        info = pltpu.get_tpu_info()
        vmem_cap = int(getattr(info, "vmem_capacity_bytes", vmem_cap)) or vmem_cap
    except Exception:
        pass
    kind = ""
    try:
        kind = jax.devices()[0].device_kind.lower()
    except Exception:
        pass
    bf16_elementwise = ("v6" in kind) or ("v7" in kind)   # parts with bf16 VPU/EUP
    two_cores = ("v7" in kind) or ("v4" in kind)          # 2 TensorCores per chip
    return vmem_cap, bf16_elementwise, two_cores


# ---------------------------------------------------------------- elementwise

def _mish(x):
    # Mish(x) = x * tanh(softplus(x)).  EUP-light form: with e = exp(x),
    # tanh(softplus(x)) = e*(e+2) / (e*(e+2)+2)  ->  one exp + one approx
    # reciprocal (own EUP slot) instead of exp + log1p + tanh.  Clamp + identity
    # region for large x mirrors torch's Softplus threshold behaviour.
    e = jnp.exp(jnp.minimum(x, 20.0))
    n = e * (e + 2.0)
    # approx vrcp done in f32 for robustness across compute dtypes (~2^-12 rel err).
    r = pl.reciprocal((n + 2.0).astype(jnp.float32), approx=True).astype(x.dtype)
    return jnp.where(x > 20.0, x, x * (n * r))


def _mish_ref(x):
    # Stable formulation, used only by the host-side reference.
    sp = jnp.maximum(x, 0.0) + jnp.log1p(jnp.exp(-jnp.abs(x)))
    return x * jnp.tanh(sp)


def _layernorm(x, gamma, beta, eps=1e-6):      # module builds nn.LayerNorm(eps=1e-06)
    mean = jnp.mean(x, axis=-1, keepdims=True)
    var = jnp.mean((x - mean) ** 2, axis=-1, keepdims=True)
    return (x - mean) * jax.lax.rsqrt(var + eps) * gamma + beta


# -------------------------------------------------------------------- kernel

def _resblock_kernel(x_ref, w1_ref, b1_ref, w2_ref, b2_ref,
                     g1_ref, be1_ref, g2_ref, be2_ref, o_ref, acc_ref,
                     *, use_layernorm: bool, compute_dtype):
    """Grid = (row_tiles, hidden_chunks).  The hidden-chunk axis (innermost,
    'arbitrary') tiles W1's output features / W2's input features and
    accumulates layer-2 partial products into an f32 VMEM scratch."""
    k = pl.program_id(1)

    @pl.when(k == 0)
    def _():
        acc_ref[...] = jnp.zeros_like(acc_ref)

    x_in = x_ref[...]                                   # [TN, H] f32 (residual)
    h = x_in
    if use_layernorm:
        h = _layernorm(h, g1_ref[...], be1_ref[...])    # f32 stats
    h = _mish(h.astype(compute_dtype))                  # bf16 on v6e/v7x, f32 on v5e

    # layer-1 partial: full reduction over H_in, hk output features.  MXU bf16, f32 acc.
    h1 = jnp.dot(h.astype(jnp.bfloat16), w1_ref[...],
                 preferred_element_type=jnp.float32) + b1_ref[...]
    if use_layernorm:
        # Wrapper guarantees a single hidden chunk here (norm2 needs full rows).
        h1 = _layernorm(h1, g2_ref[...], be2_ref[...])
    h1 = _mish(h1.astype(compute_dtype))

    # layer-2 partial product over this hidden chunk, accumulated in f32.
    acc_ref[...] += jnp.dot(h1.astype(jnp.bfloat16), w2_ref[...],
                            preferred_element_type=jnp.float32)

    @pl.when(k == pl.num_programs(1) - 1)
    def _():
        o_ref[...] = (acc_ref[...] + b2_ref[...] + x_in).astype(o_ref.dtype)


# --------------------------------------------------------------- tile choice

def _pick_hidden_chunk(hidden, weight_budget, force_max_hk=None):
    """Largest lane-aligned divisor of `hidden` whose weight blocks fit the budget."""
    cands = [hidden] + [d for d in range(((hidden - 1) // 128) * 128, 127, -128)
                        if hidden % d == 0]
    if force_max_hk is not None:
        cands = [d for d in cands if d <= force_max_hk] or [cands[-1]]
    for hk in cands:
        bufs = 1 if hk == hidden else 2        # streamed chunks stay double-buffered
        if 2 * hidden * hk * 2 * bufs <= weight_budget:
            return hk
    return cands[-1]


def _pick_row_tile(n_rows, cap, two_cores):
    """Largest divisor of n_rows <= cap; prefer multiples of 256, then 128, then 8."""
    cap = max(8, min(int(cap), n_rows))
    # Only force >=2 grid steps when there is a second TensorCore to feed.
    if two_cores and cap >= n_rows and n_rows % 2 == 0 and n_rows // 2 >= 8:
        cap = n_rows // 2
    cap = max(8, cap - cap % 8)
    for step in (256, 128, 8):
        start = cap - cap % step
        for t in range(start, step - 1, -step):
            if n_rows % t == 0:
                return t
    # TODO(synk): pad N to a multiple of 8 for awkward row counts instead of one block.
    return n_rows


# ------------------------------------------------------------------- wrapper

def two_layer_preact_resnet_linear(x, params, *, use_layernorm=False,
                                   max_tile_n=512, force_max_hk=None,
                                   elementwise_dtype=None):
    """x: [N, H] float32. params: dict with w1t/b1/w2t/b2 (+ g1/be1/g2/be2)."""
    N, H = x.shape
    vmem_cap, bf16_ew, two_cores = _tpu_caps()
    vmem_budget = int(vmem_cap * 0.625)                   # ~40 MiB on v7x, ~80 MiB on v5e/v6e
    vmem_limit = max(int(vmem_cap * 0.72), vmem_budget + 4 * _MIB)
    if elementwise_dtype is None:
        elementwise_dtype = jnp.bfloat16 if bf16_ew else jnp.float32

    # Hidden-feature (intermediate) chunk.
    if use_layernorm:
        hk = H     # norm2 needs full-row statistics.
        # TODO(synk): two-pass LayerNorm would allow hidden chunking with use_layernorm.
    else:
        hk = _pick_hidden_chunk(H, vmem_budget // 2, force_max_hk)
    nk = H // hk
    single_buffer_weights = (nk == 1)                     # constant blocks: no pipelining needed

    # Row tile, VMEM-budgeted including in/out tiles (2x double-buffered f32),
    # the f32 accumulator scratch and ~4 live [TN,H] body temporaries.
    weight_bytes = 2 * H * hk * 2 * (1 if single_buffer_weights else 2)
    per_row_bytes = 40 * H
    cap = max(8, (vmem_budget - weight_bytes) // per_row_bytes)
    tile_n = _pick_row_tile(N, min(cap, max_tile_n), two_cores)
    grid = (N // tile_n, nk)

    cost = pl.CostEstimate(
        flops=4 * N * H * H,                              # two [N,H]x[H,H] matmuls
        transcendentals=2 * N * H * (nk + 1),             # exp + recip per element, 2 mishes
        bytes_accessed=2 * N * H * 4 + 2 * H * H * 2 + 6 * H * 4,
    )

    def _build_and_run(sb, cdt):
        w_kwargs = {}
        if sb and hasattr(pl, "Buffered"):
            w_kwargs = dict(pipeline_mode=pl.Buffered(1))  # single-buffer constant weights
        row_spec = pl.BlockSpec((tile_n, H), lambda i, k: (i, 0))
        w1_spec = pl.BlockSpec((H, hk), lambda i, k: (0, k), **w_kwargs)
        b1_spec = pl.BlockSpec((1, hk), lambda i, k: (0, k))
        w2_spec = pl.BlockSpec((hk, H), lambda i, k: (k, 0), **w_kwargs)
        vec_spec = pl.BlockSpec((1, H), lambda i, k: (0, 0))

        kernel = functools.partial(_resblock_kernel,
                                   use_layernorm=use_layernorm, compute_dtype=cdt)
        return pl.pallas_call(
            kernel,
            out_shape=jax.ShapeDtypeStruct((N, H), x.dtype),
            grid=grid,
            in_specs=[row_spec,                    # x
                      w1_spec, b1_spec,            # W1^T (bf16), b1
                      w2_spec, vec_spec,           # W2^T (bf16), b2
                      vec_spec, vec_spec,          # ln1 gamma/beta
                      vec_spec, vec_spec],         # ln2 gamma/beta
            out_specs=pl.BlockSpec((tile_n, H), lambda i, k: (i, 0)),
            scratch_shapes=[pltpu.VMEM((tile_n, H), jnp.float32)],   # layer-2 accumulator
            compiler_params=pltpu.CompilerParams(
                dimension_semantics=("parallel", "arbitrary"),
                vmem_limit_bytes=vmem_limit),
            cost_estimate=cost,
        )(x, params["w1t"], params["b1"], params["w2t"], params["b2"],
          params["g1"], params["be1"], params["g2"], params["be2"])

    # Try the fully optimized configuration first; fall back to conservative
    # settings (double-buffered weights, f32 elementwise) if lowering rejects it.
    configs = [(single_buffer_weights, elementwise_dtype)]
    if elementwise_dtype != jnp.float32:
        configs.append((single_buffer_weights, jnp.float32))
    if single_buffer_weights:
        configs.append((False, jnp.float32))
    err = None
    for sb, cdt in configs:
        try:
            return _build_and_run(sb, cdt)
        except Exception as e:       # pragma: no cover - robustness fallback
            err = e
    raise err

    # TODO(synk): optionally stream x / out as bf16 (keeping f32 residual add in-kernel)
    # when the surrounding model tolerates it; ~2x wall-clock in the HBM-bound regime.


# --------------------------------------------------------------- params / ref

def init_params(key, hidden_dim):
    """Mimics nn.Linear default init (uniform +/- 1/sqrt(H)). Weights stored bf16
    (MXU operands, pre-transposed); biases and LN params f32."""
    k1, k2, k3, k4 = jax.random.split(key, 4)
    bound = 1.0 / jnp.sqrt(hidden_dim)
    w1 = jax.random.uniform(k1, (hidden_dim, hidden_dim), jnp.float32, -bound, bound)
    b1 = jax.random.uniform(k2, (hidden_dim,), jnp.float32, -bound, bound)
    w2 = jax.random.uniform(k3, (hidden_dim, hidden_dim), jnp.float32, -bound, bound)
    b2 = jax.random.uniform(k4, (hidden_dim,), jnp.float32, -bound, bound)
    return {
        "w1t": w1.T.astype(jnp.bfloat16),       # kernel does act(x) @ W1^T
        "b1": b1.reshape(1, hidden_dim),
        "w2t": w2.T.astype(jnp.bfloat16),
        "b2": b2.reshape(1, hidden_dim),
        "g1": jnp.ones((1, hidden_dim), jnp.float32),
        "be1": jnp.zeros((1, hidden_dim), jnp.float32),
        "g2": jnp.ones((1, hidden_dim), jnp.float32),
        "be2": jnp.zeros((1, hidden_dim), jnp.float32),
    }


def _reference(x, p, use_layernorm=False, mxu_bf16=True,
               elementwise_dtype=jnp.float32):
    """Pure-JAX reference. mxu_bf16 / elementwise_dtype mirror the kernel numerics;
    (False, float32) is the full-f32 semantic reference (modulo bf16 weight storage)."""
    def dot(a, w):
        if mxu_bf16:
            return jnp.dot(a.astype(jnp.bfloat16), w.astype(jnp.bfloat16),
                           preferred_element_type=jnp.float32)
        return jnp.dot(a.astype(jnp.float32), w.astype(jnp.float32))

    def act(h):
        return _mish_ref(h.astype(elementwise_dtype)).astype(jnp.float32)

    h = x
    if use_layernorm:
        h = _layernorm(h, p["g1"], p["be1"])
    h = dot(act(h), p["w1t"]) + p["b1"]
    if use_layernorm:
        h = _layernorm(h, p["g2"], p["be2"])
    h = dot(act(h), p["w2t"]) + p["b2"]
    return h + x


# ----------------------------------------------------------------------- main

if __name__ == "__main__":
    key = jax.random.PRNGKey(0)
    kx, kp, kx2, kp2 = jax.random.split(key, 4)

    _, bf16_ew, _ = _tpu_caps()
    ew_dt = jnp.bfloat16 if bf16_ew else jnp.float32
    # Matching-numerics tolerance (bf16 elementwise is noisier); loose = vs full-f32 ref.
    tight = 5e-2 if bf16_ew else 2e-2
    loose = 1.5e-1 if bf16_ew else 1e-1

    batch, hidden = 256, 128
    x = jax.random.normal(kx, (batch, hidden), dtype=jnp.float32)
    params = init_params(kp, hidden)

    # default module config: activation='Mish', use_layernorm=False
    out = jax.block_until_ready(
        two_layer_preact_resnet_linear(x, params, use_layernorm=False))
    assert out.shape == x.shape and out.dtype == x.dtype

    ref_match = _reference(x, params, use_layernorm=False, mxu_bf16=True,
                           elementwise_dtype=ew_dt)
    assert jnp.allclose(out, ref_match, atol=tight, rtol=tight)

    ref_f32 = _reference(x, params, use_layernorm=False, mxu_bf16=False,
                         elementwise_dtype=jnp.float32)
    assert jnp.allclose(out, ref_f32, atol=loose, rtol=loose)

    # use_layernorm=True path of the same kernel
    out_ln = jax.block_until_ready(
        two_layer_preact_resnet_linear(x, params, use_layernorm=True))
    ref_ln = _reference(x, params, use_layernorm=True, mxu_bf16=True,
                        elementwise_dtype=ew_dt)
    assert jnp.allclose(out_ln, ref_ln, atol=tight, rtol=tight)

    # Exercise the chunked hidden-dim (large-H) path at a small size by forcing
    # 128-wide chunks with hidden=256 -> 2 reduction grid steps + accumulator.
    batch2, hidden2 = 64, 256
    x2 = jax.random.normal(kx2, (batch2, hidden2), dtype=jnp.float32)
    params2 = init_params(kp2, hidden2)
    out2 = jax.block_until_ready(
        two_layer_preact_resnet_linear(x2, params2, use_layernorm=False,
                                       force_max_hk=128))
    ref2 = _reference(x2, params2, use_layernorm=False, mxu_bf16=True,
                      elementwise_dtype=ew_dt)
    assert jnp.allclose(out2, ref2, atol=tight, rtol=tight)

    print("KERNEL_OK")
</pallas_src>

<mosaic_0001>
module attributes {stable_mosaic.version = 11 : i64} {
  func.func @_resblock_kernel(%arg0: i32, %arg1: i32, %arg2: memref<256x128xf32, #tpu.memory_space<vmem>>, %arg3: memref<128x128xbf16, #tpu.memory_space<vmem>>, %arg4: memref<1x128xf32, #tpu.memory_space<vmem>>, %arg5: memref<128x128xbf16, #tpu.memory_space<vmem>>, %arg6: memref<1x128xf32, #tpu.memory_space<vmem>>, %arg7: memref<1x128xf32, #tpu.memory_space<vmem>>, %arg8: memref<1x128xf32, #tpu.memory_space<vmem>>, %arg9: memref<1x128xf32, #tpu.memory_space<vmem>>, %arg10: memref<1x128xf32, #tpu.memory_space<vmem>>, %arg11: memref<256x128xf32, #tpu.memory_space<vmem>>, %arg12: memref<256x128xf32, #tpu.memory_space<vmem>>) attributes {dimension_semantics = [#tpu.dimension_semantics<parallel>, #tpu.dimension_semantics<arbitrary>], iteration_bounds = array<i64: 1, 1>, scalar_prefetch = 0 : i64, scratch_operands = 1 : i64, tpu.core_type = #tpu.core_type<tc>, window_params = [{transform_indices = @transform_0, window_bounds = array<i64: 256, 128>}, {pipeline_mode = #tpu.pipeline_mode<synchronous>, transform_indices = @transform_1, window_bounds = array<i64: 128, 128>}, {transform_indices = @transform_2, window_bounds = array<i64: 1, 128>}, {pipeline_mode = #tpu.pipeline_mode<synchronous>, transform_indices = @transform_3, window_bounds = array<i64: 128, 128>}, {pipeline_mode = #tpu.pipeline_mode<synchronous>, transform_indices = @transform_4, window_bounds = array<i64: 1, 128>}, {pipeline_mode = #tpu.pipeline_mode<synchronous>, transform_indices = @transform_5, window_bounds = array<i64: 1, 128>}, {pipeline_mode = #tpu.pipeline_mode<synchronous>, transform_indices = @transform_6, window_bounds = array<i64: 1, 128>}, {pipeline_mode = #tpu.pipeline_mode<synchronous>, transform_indices = @transform_7, window_bounds = array<i64: 1, 128>}, {pipeline_mode = #tpu.pipeline_mode<synchronous>, transform_indices = @transform_8, window_bounds = array<i64: 1, 128>}, {transform_indices = @transform_9, window_bounds = array<i64: 256, 128>}]} {
    %c0_i32 = arith.constant 0 : i32
    %0 = arith.cmpi eq, %arg1, %c0_i32 : i32
    %1 = arith.extui %0 : i1 to i32
    %c0_i32_0 = arith.constant 0 : i32
    %2 = arith.cmpi ne, %1, %c0_i32_0 : i32
    scf.if %2 {
      %cst_23 = arith.constant 0.000000e+00 : f32
      %47 = vector.broadcast %cst_23 : f32 to vector<256x128xf32>
      %c0_24 = arith.constant 0 : index
      %c0_25 = arith.constant 0 : index
      %48 = vector.load %arg12[%c0_24, %c0_25] : memref<256x128xf32, #tpu.memory_space<vmem>>, vector<256x128xf32>
      tpu.vector_store %arg12[%c0_24, %c0_25], %47 {strides = array<i32>} : memref<256x128xf32, #tpu.memory_space<vmem>>, vector<256x128xf32>,
    } else {
    }
    %c0 = arith.constant 0 : index
    %c0_1 = arith.constant 0 : index
    %3 = vector.load %arg2[%c0, %c0_1] : memref<256x128xf32, #tpu.memory_space<vmem>>, vector<256x128xf32>
    %cst = arith.constant 2.000000e+01 : f32
    %4 = vector.broadcast %cst : f32 to vector<256x128xf32>
    %5 = arith.minimumf %3, %4 : vector<256x128xf32>
    %6 = math.exp %5 : vector<256x128xf32>
    %cst_2 = arith.constant 2.000000e+00 : f32
    %7 = vector.broadcast %cst_2 : f32 to vector<256x128xf32>
    %8 = arith.addf %6, %7 : vector<256x128xf32>
    %9 = arith.mulf %6, %8 : vector<256x128xf32>
    %cst_3 = arith.constant 2.000000e+00 : f32
    %10 = vector.broadcast %cst_3 : f32 to vector<256x128xf32>
    %11 = arith.addf %9, %10 : vector<256x128xf32>
    %12 = tpu.reciprocal %11 {approx = true} : vector<256x128xf32> -> vector<256x128xf32>
    %cst_4 = arith.constant 2.000000e+01 : f32
    %13 = vector.broadcast %cst_4 : f32 to vector<256x128xf32>
    %14 = arith.cmpf ogt, %3, %13 : vector<256x128xf32>
    %15 = arith.mulf %9, %12 : vector<256x128xf32>
    %16 = arith.mulf %3, %15 : vector<256x128xf32>
    %17 = arith.select %14, %3, %16 : vector<256x128xi1>, vector<256x128xf32>
    %18 = arith.truncf %17 : vector<256x128xf32> to vector<256x128xbf16>
    %c0_5 = arith.constant 0 : index
    %c0_6 = arith.constant 0 : index
    %19 = vector.load %arg3[%c0_5, %c0_6] : memref<128x128xbf16, #tpu.memory_space<vmem>>, vector<128x128xbf16>
    %cst_7 = arith.constant dense<0.000000e+00> : vector<256x128xf32>
    %20 = tpu.matmul %18, %19, %cst_7 {dimension_numbers = #tpu.dot_dimension_numbers<[1], [0], [0], [1], [0, 0, 1, 1], [], []>} : vector<256x128xbf16>, vector<128x128xbf16>, vector<256x128xf32> -> vector<256x128xf32>
    %c0_8 = arith.constant 0 : index
    %c0_9 = arith.constant 0 : index
    %21 = vector.load %arg4[%c0_8, %c0_9] : memref<1x128xf32, #tpu.memory_space<vmem>>, vector<1x128xf32>
    %22 = vector.broadcast %21 : vector<1x128xf32> to vector<256x128xf32>
    %23 = arith.addf %20, %22 : vector<256x128xf32>
    %cst_10 = arith.constant 2.000000e+01 : f32
    %24 = vector.broadcast %cst_10 : f32 to vector<256x128xf32>
    %25 = arith.minimumf %23, %24 : vector<256x128xf32>
    %26 = math.exp %25 : vector<256x128xf32>
    %cst_11 = arith.constant 2.000000e+00 : f32
    %27 = vector.broadcast %cst_11 : f32 to vector<256x128xf32>
    %28 = arith.addf %26, %27 : vector<256x128xf32>
    %29 = arith.mulf %26, %28 : vector<256x128xf32>
    %cst_12 = arith.constant 2.000000e+00 : f32
    %30 = vector.broadcast %cst_12 : f32 to vector<256x128xf32>
    %31 = arith.addf %29, %30 : vector<256x128xf32>
    %32 = tpu.reciprocal %31 {approx = true} : vector<256x128xf32> -> vector<256x128xf32>
    %cst_13 = arith.constant 2.000000e+01 : f32
    %33 = vector.broadcast %cst_13 : f32 to vector<256x128xf32>
    %34 = arith.cmpf ogt, %23, %33 : vector<256x128xf32>
    %35 = arith.mulf %29, %32 : vector<256x128xf32>
    %36 = arith.mulf %23, %35 : vector<256x128xf32>
    %37 = arith.select %34, %23, %36 : vector<256x128xi1>, vector<256x128xf32>
    %c0_14 = arith.constant 0 : index
    %c0_15 = arith.constant 0 : index
    %38 = vector.load %arg12[%c0_14, %c0_15] : memref<256x128xf32, #tpu.memory_space<vmem>>, vector<256x128xf32>
    %39 = arith.truncf %37 : vector<256x128xf32> to vector<256x128xbf16>
    %c0_16 = arith.constant 0 : index
    %c0_17 = arith.constant 0 : index
    %40 = vector.load %arg5[%c0_16, %c0_17] : memref<128x128xbf16, #tpu.memory_space<vmem>>, vector<128x128xbf16>
    %cst_18 = arith.constant dense<0.000000e+00> : vector<256x128xf32>
    %41 = tpu.matmul %39, %40, %cst_18 {dimension_numbers = #tpu.dot_dimension_numbers<[1], [0], [0], [1], [0, 0, 1, 1], [], []>} : vector<256x128xbf16>, vector<128x128xbf16>, vector<256x128xf32> -> vector<256x128xf32>
    %42 = arith.addf %38, %41 : vector<256x128xf32>
    %c0_19 = arith.constant 0 : index
    %c0_20 = arith.constant 0 : index
    %43 = vector.load %arg12[%c0_19, %c0_20] : memref<256x128xf32, #tpu.memory_space<vmem>>, vector<256x128xf32>
    tpu.vector_store %arg12[%c0_19, %c0_20], %42 {strides = array<i32>} : memref<256x128xf32, #tpu.memory_space<vmem>>, vector<256x128xf32>,
    %c0_i32_21 = arith.constant 0 : i32
    %44 = arith.cmpi eq, %arg1, %c0_i32_21 : i32
    %45 = arith.extui %44 : i1 to i32
    %c0_i32_22 = arith.constant 0 : i32
    %46 = arith.cmpi ne, %45, %c0_i32_22 : i32
    scf.if %46 {
      %c0_23 = arith.constant 0 : index
      %c0_24 = arith.constant 0 : index
      %47 = vector.load %arg12[%c0_23, %c0_24] : memref<256x128xf32, #tpu.memory_space<vmem>>, vector<256x128xf32>
      %c0_25 = arith.constant 0 : index
      %c0_26 = arith.constant 0 : index
      %48 = vector.load %arg6[%c0_25, %c0_26] : memref<1x128xf32, #tpu.memory_space<vmem>>, vector<1x128xf32>
      %49 = vector.broadcast %48 : vector<1x128xf32> to vector<256x128xf32>
      %50 = arith.addf %47, %49 : vector<256x128xf32>
      %51 = arith.addf %50, %3 : vector<256x128xf32>
      %c0_27 = arith.constant 0 : index
      %c0_28 = arith.constant 0 : index
      %52 = vector.load %arg11[%c0_27, %c0_28] : memref<256x128xf32, #tpu.memory_space<vmem>>, vector<256x128xf32>
      tpu.vector_store %arg11[%c0_27, %c0_28], %51 {strides = array<i32>} : memref<256x128xf32, #tpu.memory_space<vmem>>, vector<256x128xf32>,
    } else {
    }
    return
  }
  func.func @transform_0(%arg0: i32, %arg1: i32) -> (i32, i32) {
    %c0_i32 = arith.constant 0 : i32
    %c0_i32_0 = arith.constant 0 : i32
    return %arg0, %c0_i32 : i32, i32
  }
  func.func @transform_1(%arg0: i32, %arg1: i32) -> (i32, i32) {
    %c0_i32 = arith.constant 0 : i32
    %c0_i32_0 = arith.constant 0 : i32
    return %c0_i32, %arg1 : i32, i32
  }
  func.func @transform_2(%arg0: i32, %arg1: i32) -> (i32, i32) {
    %c0_i32 = arith.constant 0 : i32
    %c0_i32_0 = arith.constant 0 : i32
    return %c0_i32, %arg1 : i32, i32
  }
  func.func @transform_3(%arg0: i32, %arg1: i32) -> (i32, i32) {
    %c0_i32 = arith.constant 0 : i32
    %c0_i32_0 = arith.constant 0 : i32
    return %arg1, %c0_i32 : i32, i32
  }
  func.func @transform_4(%arg0: i32, %arg1: i32) -> (i32, i32) {
    %c0_i32 = arith.constant 0 : i32
    %c0_i32_0 = arith.constant 0 : i32
    %c0_i32_1 = arith.constant 0 : i32
    return %c0_i32, %c0_i32_0 : i32, i32
  }
  func.func @transform_5(%arg0: i32, %arg1: i32) -> (i32, i32) {
    %c0_i32 = arith.constant 0 : i32
    %c0_i32_0 = arith.constant 0 : i32
    %c0_i32_1 = arith.constant 0 : i32
    return %c0_i32, %c0_i32_0 : i32, i32
  }
  func.func @transform_6(%arg0: i32, %arg1: i32) -> (i32, i32) {
    %c0_i32 = arith.constant 0 : i32
    %c0_i32_0 = arith.constant 0 : i32
    %c0_i32_1 = arith.constant 0 : i32
    return %c0_i32, %c0_i32_0 : i32, i32
  }
  func.func @transform_7(%arg0: i32, %arg1: i32) -> (i32, i32) {
    %c0_i32 = arith.constant 0 : i32
    %c0_i32_0 = arith.constant 0 : i32
    %c0_i32_1 = arith.constant 0 : i32
    return %c0_i32, %c0_i32_0 : i32, i32
  }
  func.func @transform_8(%arg0: i32, %arg1: i32) -> (i32, i32) {
    %c0_i32 = arith.constant 0 : i32
    %c0_i32_0 = arith.constant 0 : i32
    %c0_i32_1 = arith.constant 0 : i32
    return %c0_i32, %c0_i32_0 : i32, i32
  }
  func.func @transform_9(%arg0: i32, %arg1: i32) -> (i32, i32) {
    %c0_i32 = arith.constant 0 : i32
    %c0_i32_0 = arith.constant 0 : i32
    return %arg0, %c0_i32 : i32, i32
  }
}

module attributes {stable_mosaic.version = 11 : i64} {
  func.func @_resblock_kernel(%arg0: i32, %arg1: i32, %arg2: memref<256x128xf32, #tpu.memory_space<vmem>>, %arg3: memref<128x128xbf16, #tpu.memory_space<vmem>>, %arg4: memref<1x128xf32, #tpu.memory_space<vmem>>, %arg5: memref<128x128xbf16, #tpu.memory_space<vmem>>, %arg6: memref<1x128xf32, #tpu.memory_space<vmem>>, %arg7: memref<1x128xf32, #tpu.memory_space<vmem>>, %arg8: memref<1x128xf32, #tpu.memory_space<vmem>>, %arg9: memref<1x128xf32, #tpu.memory_space<vmem>>, %arg10: memref<1x128xf32, #tpu.memory_space<vmem>>, %arg11: memref<256x128xf32, #tpu.memory_space<vmem>>, %arg12: memref<256x128xf32, #tpu.memory_space<vmem>>) attributes {dimension_semantics = [#tpu.dimension_semantics<parallel>, #tpu.dimension_semantics<arbitrary>], iteration_bounds = array<i64: 1, 1>, scalar_prefetch = 0 : i64, scratch_operands = 1 : i64, tpu.core_type = #tpu.core_type<tc>, window_params = [{transform_indices = @transform_0, window_bounds = array<i64: 256, 128>}, {transform_indices = @transform_1, window_bounds = array<i64: 128, 128>}, {transform_indices = @transform_2, window_bounds = array<i64: 1, 128>}, {transform_indices = @transform_3, window_bounds = array<i64: 128, 128>}, {pipeline_mode = #tpu.pipeline_mode<synchronous>, transform_indices = @transform_4, window_bounds = array<i64: 1, 128>}, {pipeline_mode = #tpu.pipeline_mode<synchronous>, transform_indices = @transform_5, window_bounds = array<i64: 1, 128>}, {pipeline_mode = #tpu.pipeline_mode<synchronous>, transform_indices = @transform_6, window_bounds = array<i64: 1, 128>}, {pipeline_mode = #tpu.pipeline_mode<synchronous>, transform_indices = @transform_7, window_bounds = array<i64: 1, 128>}, {pipeline_mode = #tpu.pipeline_mode<synchronous>, transform_indices = @transform_8, window_bounds = array<i64: 1, 128>}, {transform_indices = @transform_9, window_bounds = array<i64: 256, 128>}]} {
    %c0_i32 = arith.constant 0 : i32
    %0 = arith.cmpi eq, %arg1, %c0_i32 : i32
    %1 = arith.extui %0 : i1 to i32
    %c0_i32_0 = arith.constant 0 : i32
    %2 = arith.cmpi ne, %1, %c0_i32_0 : i32
    scf.if %2 {
      %cst_23 = arith.constant 0.000000e+00 : f32
      %47 = vector.broadcast %cst_23 : f32 to vector<256x128xf32>
      %c0_24 = arith.constant 0 : index
      %c0_25 = arith.constant 0 : index
      %48 = vector.load %arg12[%c0_24, %c0_25] : memref<256x128xf32, #tpu.memory_space<vmem>>, vector<256x128xf32>
      tpu.vector_store %arg12[%c0_24, %c0_25], %47 {strides = array<i32>} : memref<256x128xf32, #tpu.memory_space<vmem>>, vector<256x128xf32>,
    } else {
    }
    %c0 = arith.constant 0 : index
    %c0_1 = arith.constant 0 : index
    %3 = vector.load %arg2[%c0, %c0_1] : memref<256x128xf32, #tpu.memory_space<vmem>>, vector<256x128xf32>
    %cst = arith.constant 2.000000e+01 : f32
    %4 = vector.broadcast %cst : f32 to vector<256x128xf32>
    %5 = arith.minimumf %3, %4 : vector<256x128xf32>
    %6 = math.exp %5 : vector<256x128xf32>
    %cst_2 = arith.constant 2.000000e+00 : f32
    %7 = vector.broadcast %cst_2 : f32 to vector<256x128xf32>
    %8 = arith.addf %6, %7 : vector<256x128xf32>
    %9 = arith.mulf %6, %8 : vector<256x128xf32>
    %cst_3 = arith.constant 2.000000e+00 : f32
    %10 = vector.broadcast %cst_3 : f32 to vector<256x128xf32>
    %11 = arith.addf %9, %10 : vector<256x128xf32>
    %12 = tpu.reciprocal %11 {approx = true} : vector<256x128xf32> -> vector<256x128xf32>
    %cst_4 = arith.constant 2.000000e+01 : f32
    %13 = vector.broadcast %cst_4 : f32 to vector<256x128xf32>
    %14 = arith.cmpf ogt, %3, %13 : vector<256x128xf32>
    %15 = arith.mulf %9, %12 : vector<256x128xf32>
    %16 = arith.mulf %3, %15 : vector<256x128xf32>
    %17 = arith.select %14, %3, %16 : vector<256x128xi1>, vector<256x128xf32>
    %18 = arith.truncf %17 : vector<256x128xf32> to vector<256x128xbf16>
    %c0_5 = arith.constant 0 : index
    %c0_6 = arith.constant 0 : index
    %19 = vector.load %arg3[%c0_5, %c0_6] : memref<128x128xbf16, #tpu.memory_space<vmem>>, vector<128x128xbf16>
    %cst_7 = arith.constant dense<0.000000e+00> : vector<256x128xf32>
    %20 = tpu.matmul %18, %19, %cst_7 {dimension_numbers = #tpu.dot_dimension_numbers<[1], [0], [0], [1], [0, 0, 1, 1], [], []>} : vector<256x128xbf16>, vector<128x128xbf16>, vector<256x128xf32> -> vector<256x128xf32>
    %c0_8 = arith.constant 0 : index
    %c0_9 = arith.constant 0 : index
    %21 = vector.load %arg4[%c0_8, %c0_9] : memref<1x128xf32, #tpu.memory_space<vmem>>, vector<1x128xf32>
    %22 = vector.broadcast %21 : vector<1x128xf32> to vector<256x128xf32>
    %23 = arith.addf %20, %22 : vector<256x128xf32>
    %cst_10 = arith.constant 2.000000e+01 : f32
    %24 = vector.broadcast %cst_10 : f32 to vector<256x128xf32>
    %25 = arith.minimumf %23, %24 : vector<256x128xf32>
    %26 = math.exp %25 : vector<256x128xf32>
    %cst_11 = arith.constant 2.000000e+00 : f32
    %27 = vector.broadcast %cst_11 : f32 to vector<256x128xf32>
    %28 = arith.addf %26, %27 : vector<256x128xf32>
    %29 = arith.mulf %26, %28 : vector<256x128xf32>
    %cst_12 = arith.constant 2.000000e+00 : f32
    %30 = vector.broadcast %cst_12 : f32 to vector<256x128xf32>
    %31 = arith.addf %29, %30 : vector<256x128xf32>
    %32 = tpu.reciprocal %31 {approx = true} : vector<256x128xf32> -> vector<256x128xf32>
    %cst_13 = arith.constant 2.000000e+01 : f32
    %33 = vector.broadcast %cst_13 : f32 to vector<256x128xf32>
    %34 = arith.cmpf ogt, %23, %33 : vector<256x128xf32>
    %35 = arith.mulf %29, %32 : vector<256x128xf32>
    %36 = arith.mulf %23, %35 : vector<256x128xf32>
    %37 = arith.select %34, %23, %36 : vector<256x128xi1>, vector<256x128xf32>
    %c0_14 = arith.constant 0 : index
    %c0_15 = arith.constant 0 : index
    %38 = vector.load %arg12[%c0_14, %c0_15] : memref<256x128xf32, #tpu.memory_space<vmem>>, vector<256x128xf32>
    %39 = arith.truncf %37 : vector<256x128xf32> to vector<256x128xbf16>
    %c0_16 = arith.constant 0 : index
    %c0_17 = arith.constant 0 : index
    %40 = vector.load %arg5[%c0_16, %c0_17] : memref<128x128xbf16, #tpu.memory_space<vmem>>, vector<128x128xbf16>
    %cst_18 = arith.constant dense<0.000000e+00> : vector<256x128xf32>
    %41 = tpu.matmul %39, %40, %cst_18 {dimension_numbers = #tpu.dot_dimension_numbers<[1], [0], [0], [1], [0, 0, 1, 1], [], []>} : vector<256x128xbf16>, vector<128x128xbf16>, vector<256x128xf32> -> vector<256x128xf32>
    %42 = arith.addf %38, %41 : vector<256x128xf32>
    %c0_19 = arith.constant 0 : index
    %c0_20 = arith.constant 0 : index
    %43 = vector.load %arg12[%c0_19, %c0_20] : memref<256x128xf32, #tpu.memory_space<vmem>>, vector<256x128xf32>
    tpu.vector_store %arg12[%c0_19, %c0_20], %42 {strides = array<i32>} : memref<256x128xf32, #tpu.memory_space<vmem>>, vector<256x128xf32>,
    %c0_i32_21 = arith.constant 0 : i32
    %44 = arith.cmpi eq, %arg1, %c0_i32_21 : i32
    %45 = arith.extui %44 : i1 to i32
    %c0_i32_22 = arith.constant 0 : i32
    %46 = arith.cmpi ne, %45, %c0_i32_22 : i32
    scf.if %46 {
      %c0_23 = arith.constant 0 : index
      %c0_24 = arith.constant 0 : index
      %47 = vector.load %arg12[%c0_23, %c0_24] : memref<256x128xf32, #tpu.memory_space<vmem>>, vector<256x128xf32>
      %c0_25 = arith.constant 0 : index
      %c0_26 = arith.constant 0 : index
      %48 = vector.load %arg6[%c0_25, %c0_26] : memref<1x128xf32, #tpu.memory_space<vmem>>, vector<1x128xf32>
      %49 = vector.broadcast %48 : vector<1x128xf32> to vector<256x128xf32>
      %50 = arith.addf %47, %49 : vector<256x128xf32>
      %51 = arith.addf %50, %3 : vector<256x128xf32>
      %c0_27 = arith.constant 0 : index
      %c0_28 = arith.constant 0 : index
      %52 = vector.load %arg11[%c0_27, %c0_28] : memref<256x128xf32, #tpu.memory_space<vmem>>, vector<256x128xf32>
      tpu.vector_store %arg11[%c0_27, %c0_28], %51 {strides = array<i32>} : memref<256x128xf32, #tpu.memory_space<vmem>>, vector<256x128xf32>,
    } else {
    }
    return
  }
  func.func @transform_0(%arg0: i32, %arg1: i32) -> (i32, i32) {
    %c0_i32 = arith.constant 0 : i32
    %c0_i32_0 = arith.constant 0 : i32
    return %arg0, %c0_i32 : i32, i32
  }
  func.func @transform_1(%arg0: i32, %arg1: i32) -> (i32, i32) {
    %c0_i32 = arith.constant 0 : i32
    %c0_i32_0 = arith.constant 0 : i32
    return %c0_i32, %arg1 : i32, i32
  }
  func.func @transform_2(%arg0: i32, %arg1: i32) -> (i32, i32) {
    %c0_i32 = arith.constant 0 : i32
    %c0_i32_0 = arith.constant 0 : i32
    return %c0_i32, %arg1 : i32, i32
  }
  func.func @transform_3(%arg0: i32, %arg1: i32) -> (i32, i32) {
    %c0_i32 = arith.constant 0 : i32
    %c0_i32_0 = arith.constant 0 : i32
    return %arg1, %c0_i32 : i32, i32
  }
  func.func @transform_4(%arg0: i32, %arg1: i32) -> (i32, i32) {
    %c0_i32 = arith.constant 0 : i32
    %c0_i32_0 = arith.constant 0 : i32
    %c0_i32_1 = arith.constant 0 : i32
    return %c0_i32, %c0_i32_0 : i32, i32
  }
  func.func @transform_5(%arg0: i32, %arg1: i32) -> (i32, i32) {
    %c0_i32 = arith.constant 0 : i32
    %c0_i32_0 = arith.constant 0 : i32
    %c0_i32_1 = arith.constant 0 : i32
    return %c0_i32, %c0_i32_0 : i32, i32
  }
  func.func @transform_6(%arg0: i32, %arg1: i32) -> (i32, i32) {
    %c0_i32 = arith.constant 0 : i32
    %c0_i32_0 = arith.constant 0 : i32
    %c0_i32_1 = arith.constant 0 : i32
    return %c0_i32, %c0_i32_0 : i32, i32
  }
  func.func @transform_7(%arg0: i32, %arg1: i32) -> (i32, i32) {
    %c0_i32 = arith.constant 0 : i32
    %c0_i32_0 = arith.constant 0 : i32
    %c0_i32_1 = arith.constant 0 : i32
    return %c0_i32, %c0_i32_0 : i32, i32
  }
  func.func @transform_8(%arg0: i32, %arg1: i32) -> (i32, i32) {
    %c0_i32 = arith.constant 0 : i32
    %c0_i32_0 = arith.constant 0 : i32
    %c0_i32_1 = arith.constant 0 : i32
    return %c0_i32, %c0_i32_0 : i32, i32
  }
  func.func @transform_9(%arg0: i32, %arg1: i32) -> (i32, i32) {
    %c0_i32 = arith.constant 0 : i32
    %c0_i32_0 = arith.constant 0 : i32
    return %arg0, %c0_i32 : i32, i32
  }
}

</mosaic_0001>

<bundles_post_ra>
// kernel: tpu_custom_call.1
= control target key start
LH: loop header
LB: loop body
LE: loop exit
PB: predicated region body
PF: predicated region fallthrough
CT: control target
= control target key end

     0   :  { %14 = vsyncpa [#allocation4], 0  ;;  %s2964_s0 = inlined_call_operand.hbm [shape: f32[256,128], index: 0, kind: input, shape index: {}]   ;;  %s2965_s1 = inlined_call_operand.hbm [shape: bf16[128,128], index: 1, kind: input, shape index: {}]   ;;  %s2966_s2 = inlined_call_operand.vmem [shape: f32[1,128], index: 2, kind: input, shape index: {}]   ;;  %s2967_s3 = inlined_call_operand.hbm [shape: bf16[128,128], index: 3, kind: input, shape index: {}]   ;;  %s2968_s4 = inlined_call_operand.vmem [shape: f32[1,128], index: 4, kind: input, shape index: {}]   ;;  %s2969_s5 = inlined_call_operand.vmem [shape: f32[1,128], index: 5, kind: input, shape index: {}]   ;;  %s2970_s6 = inlined_call_operand.vmem [shape: f32[1,128], index: 6, kind: input, shape index: {}]   ;;  %s2971_s7 = inlined_call_operand.vmem [shape: f32[1,128], index: 7, kind: input, shape index: {}]   ;;  %s2972_s8 = inlined_call_operand.vmem [shape: f32[1,128], index: 8, kind: input, shape index: {}]   ;;  %s2973_s9 = inlined_call_operand.hbm [shape: f32[256,128], index: 9, kind: output, shape index: {}]  }
   0x1   :  { %15 = vsyncpa [#allocation7], 0 }
   0x2   :  { %16 = vsyncpa [#allocation5], 0  ;;  %s2148_s30 = smov [#allocation6]  }
   0x3   :  { %s34_s10 = sshll.u32 %s2148_s30, 4  ;;  %s35_s10 = int_to_ptr.vmem [resolvable:$true] %s34_s10 }
   0x4   :  { %s2070_s11 = scalar_lea.vmem %s35_s10, 1024  ;;  %p2075_p1 = scmp.lt.s32.totalorder %s35_s10, %s35_s10 }
   0x5   :  { %p2071_p0 = scmp.ne.s32.totalorder %s35_s10, %s2070_s11  ;;  %p2076_p2 = scmp.lt.s32.totalorder %s2070_s11, %s2070_s11 }
   0x7   :  { %p2077_p3 = por %p2076_p2, %p2075_p1 }
   0x9   :  { %p2078_p4 = pnand %p2077_p3, %p2071_p0 }
   0xb   :  { %2081 = shalt.err (!%p2078_p4)
}
   0xc   :  { %s2149_s5 = smov 64   ;;  %s2150_s6 = smov 4  }
   0xd   :  { %40 = dma.hbm_to_vmem [thread:$0]  %s2965_s1, 1024, %s35_s10, [#allocation7], %s2149_s5, %s2149_s5, %s2150_s6  }
   0xe   :  { %s2151_s12 = smov [#allocation3]  }
   0xf   :  { %s22_s13 = sshll.u32 %s2151_s12, 4  ;;  %s23_s13 = int_to_ptr.vmem [resolvable:$true] %s22_s13 }
  0x10   :  { %s2090_s14 = scalar_lea.vmem %s23_s13, 4096  ;;  %p2095_p6 = scmp.lt.s32.totalorder %s23_s13, %s23_s13 }
  0x11   :  { %p2091_p5 = scmp.ne.s32.totalorder %s23_s13, %s2090_s14  ;;  %p2096_p7 = scmp.lt.s32.totalorder %s2090_s14, %s2090_s14 }
  0x13   :  { %p2097_p8 = por %p2096_p7, %p2095_p6 }
  0x15   :  { %p2098_p9 = pnand %p2097_p8, %p2091_p5 }
  0x17   :  { %2101 = shalt.err (!%p2098_p9)
}
  0x18   :  { %s2152_s15 = smov 128   ;;  %s2153_s16 = smov 8  }
  0x19   :  { %28 = dma.hbm_to_vmem [thread:$0]  %s2964_s0, 4096, %s23_s13, [#allocation4], %s2152_s15, %s2152_s15, %s2153_s16  }
  0x1a   :  { %s2154_s1 = smov [#allocation8]  }
  0x1b   :  { %s48_s19 = sshll.u32 %s2154_s1, 4  ;;  %s49_s19 = int_to_ptr.vmem [resolvable:$true] %s48_s19 }
  0x1c   :  { %s2110_s20 = scalar_lea.vmem %s49_s19, 1024  ;;  %p2115_p11 = scmp.lt.s32.totalorder %s49_s19, %s49_s19 }
  0x1d   :  { %p2111_p10 = scmp.ne.s32.totalorder %s49_s19, %s2110_s20  ;;  %p2116_p12 = scmp.lt.s32.totalorder %s2110_s20, %s2110_s20 }
  0x1f   :  { %p2117_p13 = por %p2116_p12, %p2115_p11 }
  0x21   :  { %p2118_p0 = pnand %p2117_p13, %p2111_p10 }
  0x23   :  { %2121 = shalt.err (!%p2118_p0)
}
  0x24   :  { %54 = dma.hbm_to_vmem [thread:$0]  %s2967_s3, 1024, %s49_s19, [#allocation7], %s2149_s5, %s2149_s5, %s2150_s6  }
  0x25   :  { %2142 = dma.done.wait [#allocation4], 4096  }
  0x26   :  { %2143 = vsyncadd [#allocation4], 4294963200 }
  0x27   :  { %2144 = dma.done.wait [#allocation7], 2048  }
  0x28   :  { %2145 = vsyncadd [#allocation7], 4294965248  ;;  %v1758_v0 = vld [vmem:[#allocation6 + $0x38] sm:$0xff]   ;;  %v1759_v1 = vld [vmem:[#allocation6 + $0x30] sm:$0xff]  }
  0x29   :  { %1654 = vmatprep.subr.bf16.mxu0 %v1758_v0  ;;  %v1760_v2 = vld [vmem:[#allocation6 + $0x28] sm:$0xff]   ;;  %v1761_v3 = vld [vmem:[#allocation6 + $0x20] sm:$0xff]   ;;  %v2222_v6 = vld [vmem:[#allocation3 + $0x10] sm:$0xff] }
  0x2a   :  { %1655 = vmatpush3.bf16.msra.mxu0 %v1758_v0  ;;  %v2218_v4 = vld [vmem:[#allocation3] sm:$0xff]  ;;  %v2220_v5 = vld [vmem:[#allocation3 + $0x8] sm:$0xff]  ;;  %v2226_v9 = vld [vmem:[#allocation3 + $0x18] sm:$0xff]  ;;  %v145_v11 = vmin.f32 %v2222_v6, 20.0  ;;  %vm369_vm2 = vcmp.gt.f32.partialorder %v2222_v6, 20.0 }
  0x2b   :  { %1656 = vmatprep.subr.bf16.mxu0 %v1759_v1  ;;  %v143_v7 = vmin.f32 %v2218_v4, 20.0  ;;  %v144_v8 = vmin.f32 %v2220_v5, 20.0  ;;  %v2228_v10 = vld [vmem:[#allocation3 + $0x20] sm:$0xff]  ;;  %v146_v12 = vmin.f32 %v2226_v9, 20.0  ;;  %v2232_v13 = vld [vmem:[#allocation3 + $0x28] sm:$0xff]  ;;  %v2234_v14 = vld [vmem:[#allocation3 + $0x30] sm:$0xff] }
  0x2c   :  { %v147_v17 = vmin.f32 %v2228_v10, 20.0  ;;  %v148_v18 = vmin.f32 %v2232_v13, 20.0  ;;  %v1762_v19 = vld [vmem:[#allocation6 + $0x18] sm:$0xff]   ;;  %v179_v20 = vmul.f32 1.442695, %v145_v11  ;;  %v149_v24 = vmin.f32 %v2234_v14, 20.0 }
  0x2d   :  { %v175_v15 = vmul.f32 1.442695, %v143_v7  ;;  %v177_v16 = vmul.f32 1.442695, %v144_v8  ;;  %v181_v21 = vmul.f32 1.442695, %v146_v12 }
  0x2e   :  { %1657 = vmatpush3.bf16.msra.mxu0 %v1759_v1  ;;  %v183_v22 = vmul.f32 1.442695, %v147_v17  ;;  %v2238_v23 = vld [vmem:[#allocation3 + $0x38] sm:$0xff]  ;;  %v185_v25 = vmul.f32 1.442695, %v148_v18  ;;  %v2242_v27 = vld [vmem:[#allocation3 + $0x40] sm:$0xff] }
  0x2f   :  { %1658 = vmatprep.subr.bf16.mxu0 %v1760_v2  ;;  %1774 = vpow2.f32 %v175_v15  ;;  %v150_v26 = vmin.f32 %v2238_v23, 20.0  ;;  %v2244_v28 = vld [vmem:[#allocation3 + $0x48] sm:$0xff]  ;;  %v2246_v29 = vld [vmem:[#allocation3 + $0x50] sm:$0xff]  ;;  %v187_v30 = vmul.f32 1.442695, %v149_v24  ;;  %v151_v31 = vmin.f32 %v2242_v27, 20.0 }
  0x30   :  { %1776 = vpow2.f32 %v177_v16  ;;  %v152_v32 = vmin.f32 %v2244_v28, 20.0  ;;  %v2250_v33 = vld [vmem:[#allocation3 + $0x58] sm:$0xff]  ;;  %v1763_v34 = vld [vmem:[#allocation6 + $0x10] sm:$0xff]   ;;  %v2252_v36 = vld [vmem:[#allocation3 + $0x60] sm:$0xff]  ;;  %v153_v39 = vmin.f32 %v2246_v29, 20.0  ;;  %vm367_vm0 = vcmp.gt.f32.partialorder %v2218_v4, 20.0 }
  0x31   :  { %1778 = vpow2.f32 %v179_v20  ;;  %v189_v35 = vmul.f32 1.442695, %v150_v26  ;;  %v2254_v37 = vld [vmem:[#allocation3 + $0x68] sm:$0xff]  ;;  %v191_v38 = vmul.f32 1.442695, %v151_v31  ;;  %v154_v41 = vmin.f32 %v2250_v33, 20.0 }
  0x32   :  { %1659 = vmatpush3.bf16.msra.mxu0 %v1760_v2  ;;  %1780 = vpow2.f32 %v181_v21  ;;  %v193_v40 = vmul.f32 1.442695, %v152_v32  ;;  %v2258_v42 = vld [vmem:[#allocation3 + $0x70] sm:$0xff]  ;;  %v195_v43 = vmul.f32 1.442695, %v153_v39  ;;  %v155_v44 = vmin.f32 %v2252_v36, 20.0 }
  0x33   :  { %1660 = vmatprep.subr.bf16.mxu0 %v1761_v3  ;;  %1782 = vpow2.f32 %v183_v22  ;;  %v156_v45 = vmin.f32 %v2254_v37, 20.0  ;;  %v2262_v46 = vld [vmem:[#allocation3 + $0x78] sm:$0xff]  ;;  %v1764_v47 = vld [vmem:[#allocation6 + $0x8] sm:$0xff]   ;;  %v197_v48 = vmul.f32 1.442695, %v154_v41  ;;  %v2264_v49 = vld [vmem:[#allocation3 + $0x80] sm:$0xff] }
  0x34   :  { %1784 = vpow2.f32 %v185_v25  ;;  %v2266_v50 = vld [vmem:[#allocation3 + $0x88] sm:$0xff]  ;;  %v199_v51 = vmul.f32 1.442695, %v155_v44  ;;  %v157_v52 = vmin.f32 %v2258_v42, 20.0  ;;  %v158_v54 = vmin.f32 %v2262_v46, 20.0  ;;  %v2270_v55 = vld [vmem:[#allocation3 + $0x90] sm:$0xff] }
  0x35   :  { %1786 = vpow2.f32 %v187_v30  ;;  %v201_v53 = vmul.f32 1.442695, %v156_v45  ;;  %v159_v57 = vmin.f32 %v2264_v49, 20.0  ;;  %v160_v58 = vmin.f32 %v2266_v50, 20.0  ;;  %v2274_v59 = vld [vmem:[#allocation3 + $0x98] sm:$0xff]  ;;  %v1765_v60 = vld [vmem:[#allocation6] sm:$0xff]  }
  0x36   :  { %1661 = vmatpush3.bf16.msra.mxu0 %v1761_v3  ;;  %1788 = vpow2.f32 %v189_v35  ;;  %v203_v56 = vmul.f32 1.442695, %v157_v52  ;;  %v205_v61 = vmul.f32 1.442695, %v158_v54  ;;  %v2276_v62 = vld [vmem:[#allocation3 + $0xa0] sm:$0xff]  ;;  %v161_v0 = vmin.f32 %v2270_v55, 20.0 }
  0x37   :  { %1662 = vmatprep.subr.bf16.mxu0 %v1762_v19  ;;  %1790 = vpow2.f32 %v191_v38  ;;  %v207_v63 = vmul.f32 1.442695, %v159_v57  ;;  %v2279_v1 = vld [vmem:[#allocation3 + $0xa8] sm:$0xff]  ;;  %v209_v3 = vmul.f32 1.442695, %v160_v58  ;;  %v162_v7 = vmin.f32 %v2274_v59, 20.0 }
  0x38   :  { %1792 = vpow2.f32 %v193_v40  ;;  %v211_v12 = vmul.f32 1.442695, %v161_v0  ;;  %v163_v15 = vmin.f32 %v2276_v62, 20.0  ;;  %vm368_vm1 = vcmp.gt.f32.partialorder %v2220_v5, 20.0 }
  0x39   :  { %1794 = vpow2.f32 %v195_v43  ;;  %v213_v18 = vmul.f32 1.442695, %v162_v7  ;;  %vm370_vm3 = vcmp.gt.f32.partialorder %v2226_v9, 20.0  ;;  %vm371_vm4 = vcmp.gt.f32.partialorder %v2228_v10, 20.0 }
  0x3a   :  { %1663 = vmatpush3.bf16.msra.mxu0 %v1762_v19  ;;  %1796 = vpow2.f32 %v197_v48  ;;  %v164_v19 = vmin.f32 %v2279_v1, 20.0  ;;  %v2286_v24 = vmul.f32 1.442695, %v163_v15  ;;  %vm372_vm5 = vcmp.gt.f32.partialorder %v2232_v13, 20.0 }
  0x3b   :  { %1664 = vmatprep.subr.bf16.mxu0 %v1763_v34  ;;  %1798 = vpow2.f32 %v199_v51  ;;  %vm373_vm6 = vcmp.gt.f32.partialorder %v2234_v14, 20.0  ;;  %vm374_vm7 = vcmp.gt.f32.partialorder %v2238_v23, 20.0  ;;  %vm375_vm8 = vcmp.gt.f32.partialorder %v2242_v27, 20.0 }
  0x3c   :  { %v1775_v2 = vpop.eup %1774  ;;  %1800 = vpow2.f32 %v201_v53  ;;  %v2290_v31 = vmul.f32 1.442695, %v164_v19  ;;  %vm376_vm9 = vcmp.gt.f32.partialorder %v2244_v28, 20.0  ;;  %vm377_vm10 = vcmp.gt.f32.partialorder %v2246_v29, 20.0 }
  0x3d   :  { %v1777_v8 = vpop.eup %1776  ;;  %v239_v11 = vadd.f32 2.0, %v1775_v2  ;;  %1802 = vpow2.f32 %v203_v56  ;;  %vm378_vm11 = vcmp.gt.f32.partialorder %v2250_v33, 20.0  ;;  %vm379_vm12 = vcmp.gt.f32.partialorder %v2252_v36, 20.0 }
  0x3e   :  { %1665 = vmatpush3.bf16.msra.mxu0 %v1763_v34  ;;  %v1779_v16 = vpop.eup %1778  ;;  %v240_v17 = vadd.f32 2.0, %v1777_v8  ;;  %1804 = vpow2.f32 %v205_v61  ;;  %vm380_vm13 = vcmp.gt.f32.partialorder %v2254_v37, 20.0  ;;  %vm381_vm14 = vcmp.gt.f32.partialorder %v2258_v42, 20.0 }
  0x3f   :  { %1666 = vmatprep.subr.bf16.mxu0 %v1764_v47  ;;  %v1781_v20 = vpop.eup %1780  ;;  %v2284_v21 = vmul.f32 %v1775_v2, %v239_v11  ;;  %v241_v22 = vadd.f32 2.0, %v1779_v16  ;;  %1806 = vpow2.f32 %v207_v63  ;;  %vm382_vm15 = vcmp.gt.f32.partialorder %v2262_v46, 20.0 }
  0x40   :  { %v1783_v25 = vpop.eup %1782  ;;  %v2288_v26 = vmul.f32 %v1777_v8, %v240_v17  ;;  %v242_v30 = vadd.f32 2.0, %v1781_v20  ;;  %1808 = vpow2.f32 %v209_v3 }
  0x41   :  { %v1785_v32 = vpop.eup %1784  ;;  %v303_v34 = vadd.f32 2.0, %v2284_v21  ;;  %v2293_v35 = vmul.f32 %v1779_v16, %v241_v22  ;;  %v243_v38 = vadd.f32 2.0, %v1783_v25  ;;  %1810 = vpow2.f32 %v211_v12 }
  0x42   :  { %1667 = vmatpush3.bf16.msra.mxu0 %v1764_v47  ;;  %v1787_v39 = vpop.eup %1786  ;;  %v304_v40 = vadd.f32 2.0, %v2288_v26  ;;  %v2296_v41 = vmul.f32 %v1781_v20, %v242_v30  ;;  %v244_v43 = vadd.f32 2.0, %v1785_v32  ;;  %1812 = vpow2.f32 %v213_v18 }
  0x43   :  { %1668 = vmatprep.subr.bf16.mxu0 %v1765_v60  ;;  %v1789_v44 = vpop.eup %1788  ;;  %1814 = vrcp.f32 %v303_v34  ;;  %v305_v45 = vadd.f32 2.0, %v2293_v35  ;;  %v2299_v47 = vmul.f32 %v1783_v25, %v243_v38  ;;  %v245_v48 = vadd.f32 2.0, %v1787_v39 }
  0x44   :  { %v1791_v51 = vpop.eup %1790  ;;  %1816 = vrcp.f32 %v304_v40  ;;  %v306_v52 = vadd.f32 2.0, %v2296_v41  ;;  %v2302_v53 = vmul.f32 %v1785_v32, %v244_v43  ;;  %v246_v54 = vadd.f32 2.0, %v1789_v44 }
  0x45   :  { %v1793_v56 = vpop.eup %1792  ;;  %1818 = vrcp.f32 %v305_v45  ;;  %v307_v57 = vadd.f32 2.0, %v2299_v47  ;;  %v2305_v58 = vmul.f32 %v1787_v39, %v245_v48 }
  0x46   :  { %1669 = vmatpush3.bf16.msra.mxu0 %v1765_v60  ;;  %v247_v60 = vadd.f32 2.0, %v1791_v51  ;;  %v1795_v61 = vpop.eup %1794  ;;  %1820 = vrcp.f32 %v306_v52  ;;  %v308_v63 = vadd.f32 2.0, %v2302_v53  ;;  %v2308_v0 = vmul.f32 %v1789_v44, %v246_v54 }
  0x47   :  { %v248_v2 = vadd.f32 2.0, %v1793_v56  ;;  %v1797_v3 = vpop.eup %1796  ;;  %1822 = vrcp.f32 %v307_v57  ;;  %v309_v7 = vadd.f32 2.0, %v2305_v58  ;;  %v249_v11 = vadd.f32 2.0, %v1795_v61 }
  0x48   :  { %v2311_v8 = vmul.f32 %v1791_v51, %v247_v60  ;;  %v1799_v12 = vpop.eup %1798  ;;  %1824 = vrcp.f32 %v308_v63  ;;  %v310_v15 = vadd.f32 2.0, %v2308_v0  ;;  %v250_v17 = vadd.f32 2.0, %v1797_v3 }
  0x49   :  { %v2314_v16 = vmul.f32 %v1793_v56, %v248_v2  ;;  %v1801_v18 = vpop.eup %1800  ;;  %1826 = vrcp.f32 %v309_v7  ;;  %v2317_v20 = vmul.f32 %v1795_v61, %v249_v11  ;;  %v251_v22 = vadd.f32 2.0, %v1799_v12 }
  0x4a   :  { %v311_v19 = vadd.f32 2.0, %v2311_v8  ;;  %v1803_v25 = vpop.eup %1802  ;;  %1828 = vrcp.f32 %v310_v15  ;;  %v2321_v32 = vmul.f32 %v1797_v3, %v250_v17  ;;  %v252_v34 = vadd.f32 2.0, %v1801_v18 }
  0x4b   :  { %v312_v30 = vadd.f32 2.0, %v2314_v16  ;;  %v1805_v38 = vpop.eup %1804  ;;  %v313_v39 = vadd.f32 2.0, %v2317_v20  ;;  %v2325_v40 = vmul.f32 %v1799_v12, %v251_v22  ;;  %v253_v43 = vadd.f32 2.0, %v1803_v25 }
  0x4c   :  { %1830 = vrcp.f32 %v311_v19  ;;  %v1807_v44 = vpop.eup %1806  ;;  %v314_v45 = vadd.f32 2.0, %v2321_v32  ;;  %v2329_v48 = vmul.f32 %v1801_v18, %v252_v34  ;;  %v254_v51 = vadd.f32 2.0, %v1805_v38 }
  0x4d   :  { %1832 = vrcp.f32 %v312_v30  ;;  %v1809_v52 = vpop.eup %1808  ;;  %v315_v54 = vadd.f32 2.0, %v2325_v40  ;;  %v2333_v56 = vmul.f32 %v1803_v25, %v253_v43  ;;  %v255_v57 = vadd.f32 2.0, %v1807_v44 }
  0x4e   :  { %1834 = vrcp.f32 %v313_v39  ;;  %v1811_v60 = vpop.eup %1810  ;;  %v316_v61 = vadd.f32 2.0, %v2329_v48  ;;  %v2337_v63 = vmul.f32 %v1805_v38, %v254_v51  ;;  %v256_v2 = vadd.f32 2.0, %v1809_v52 }
  0x4f   :  { %1836 = vrcp.f32 %v314_v45  ;;  %v1813_v3 = vpop.eup %1812  ;;  %v317_v7 = vadd.f32 2.0, %v2333_v56  ;;  %v2341_v11 = vmul.f32 %v1807_v44, %v255_v57  ;;  %v257_v12 = vadd.f32 2.0, %v1811_v60 }
  0x50   :  { %1838 = vrcp.f32 %v315_v54  ;;  %v1815_v15 = vpop.eup %1814  ;;  %v318_v17 = vadd.f32 2.0, %v2337_v63  ;;  %v2344_v18 = vmul.f32 %v1809_v52, %v256_v2  ;;  %v258_v19 = vadd.f32 2.0, %v1813_v3 }
  0x51   :  { %1840 = vrcp.f32 %v316_v61  ;;  %v1817_v22 = vpop.eup %1816  ;;  %v399_v25 = vmul.f32 %v1815_v15, %v2284_v21  ;;  %v319_v30 = vadd.f32 2.0, %v2341_v11  ;;  %v2350_v34 = vmul.f32 %v1811_v60, %v257_v12 }
  0x52   :  { %1842 = vrcp.f32 %v317_v7  ;;  %v1819_v38 = vpop.eup %1818  ;;  %v400_v39 = vmul.f32 %v1817_v22, %v2288_v26  ;;  %v320_v43 = vadd.f32 2.0, %v2344_v18  ;;  %v2355_v44 = vmul.f32 %v1813_v3, %v258_v19 }
  0x53   :  { %1844 = vrcp.f32 %v318_v17  ;;  %v1821_v21 = vpop.eup %1820  ;;  %v431_v45 = vmul.f32 %v399_v25, %v2218_v4  ;;  %v401_v51 = vmul.f32 %v1819_v38, %v2293_v35  ;;  %v321_v52 = vadd.f32 2.0, %v2350_v34 }
  0x54   :  { %1846 = vrcp.f32 %v319_v30  ;;  %v1823_v54 = vpop.eup %1822  ;;  %v432_v57 = vmul.f32 %v400_v39, %v2220_v5  ;;  %v402_v26 = vmul.f32 %v1821_v21, %v2296_v41  ;;  %v322_v60 = vadd.f32 2.0, %v2355_v44 }
  0x55   :  { %1848 = vrcp.f32 %v320_v43  ;;  %v1825_v61 = vpop.eup %1824  ;;  %v463_v2 = vsel %vm367_vm0, %v2218_v4, %v431_v45  ;;  %v433_v3 = vmul.f32 %v401_v51, %v2222_v6  ;;  %v403_v35 = vmul.f32 %v1823_v54, %v2299_v47 }
  0x56   :  { %1850 = vrcp.f32 %v321_v52  ;;  %v1827_v7 = vpop.eup %1826  ;;  %v464_v12 = vsel %vm368_vm1, %v2220_v5, %v432_v57  ;;  %v434_v41 = vmul.f32 %v402_v26, %v2226_v9  ;;  %v404_v15 = vmul.f32 %v1825_v61, %v2302_v53 }
  0x57   :  { %1852 = vrcp.f32 %v322_v60  ;;  %v1829_v17 = vpop.eup %1828  ;;  %v495_v19 = vpack.c.bf16 %v464_v12, %v463_v2  ;;  %v465_v4 = vsel %vm369_vm2, %v2222_v6, %v433_v3  ;;  %v435_v22 = vmul.f32 %v403_v35, %v2228_v10  ;;  %v2411_v60 = vld [vmem:[#allocation3 + $0xb0] sm:$0xff] }
  0x58   :  { %v405_v47 = vmul.f32 %v1827_v7, %v2305_v58  ;;  %v466_v5 = vsel %vm370_vm3, %v2226_v9, %v434_v41  ;;  %v436_v30 = vmul.f32 %v404_v15, %v2232_v13  ;;  %v406_v53 = vmul.f32 %v1829_v17, %v2308_v0 }
  0x59   :  { %v1831_v25 = vpop.eup %1830  ;;  %1854 = vpow2.f32 %v2286_v24  ;;  %1670 = vmatprep.mubr.bf16.mxu0 %v495_v19  ;;  %v496_v39 = vpack.c.bf16 %v466_v5, %v465_v4  ;;  %v467_v6 = vsel %vm371_vm4, %v2228_v10, %v435_v22  ;;  %v165_v15 = vmin.f32 %v2411_v60, 20.0 }
  0x5a   :  { %v1833_v38 = vpop.eup %1832  ;;  %v437_v58 = vmul.f32 %v405_v47, %v2234_v14  ;;  %v407_v43 = vmul.f32 %v1831_v25, %v2311_v8  ;;  %v468_v9 = vsel %vm372_vm5, %v2232_v13, %v436_v30  ;;  %v438_v0 = vmul.f32 %v406_v53, %v2238_v23 }
  0x5b   :  { %v1835_v21 = vpop.eup %1834  ;;  %v408_v24 = vmul.f32 %v1833_v38, %v2314_v16  ;;  %1856 = vpow2.f32 %v2290_v31  ;;  %1671 = vmatmul.mubr.bf16.vlgmr.msra.gmra.mxu0 %v496_v39  ;;  %v497_v51 = vpack.c.bf16 %v468_v9, %v467_v6  ;;  %v219_v38 = vmul.f32 1.442695, %v165_v15 }
  0x5c   :  { %v1837_v45 = vpop.eup %1836  ;;  %v439_v10 = vmul.f32 %v407_v43, %v2242_v27  ;;  %v409_v8 = vmul.f32 %v1835_v21, %v2317_v20  ;;  %v469_v13 = vsel %vm373_vm6, %v2234_v14, %v437_v58  ;;  %v470_v16 = vsel %vm374_vm7, %v2238_v23, %v438_v0  ;;  %v2451_v21 = vld [vmem:[#allocation3 + $0xd0] sm:$0xff] }
  0x5d   :  { %v1839_v52 = vpop.eup %1838  ;;  %v440_v31 = vmul.f32 %v408_v24, %v2244_v28  ;;  %v410_v54 = vmul.f32 %v1837_v45, %v2321_v32  ;;  %1674 = vmatprep.mubr.bf16.mxu0 %v497_v51  ;;  %v498_v2 = vpack.c.bf16 %v470_v16, %v469_v13  ;;  %vm383_vm0 = vcmp.gt.f32.partialorder %v2264_v49, 20.0  ;;  %v2459_v51 = vld [vmem:[#allocation3 + $0xd8] sm:$0xff] }
  0x5e   :  { %v1841_v57 = vpop.eup %1840  ;;  %v471_v26 = vsel %vm375_vm8, %v2242_v27, %v439_v10  ;;  %v411_v20 = vmul.f32 %v1839_v52, %v2325_v40  ;;  %v441_v3 = vmul.f32 %v409_v8, %v2246_v29  ;;  %v2420_v40 = vld [vmem:[#allocation3 + $0xb8] sm:$0xff]  ;;  %vm384_vm1 = vcmp.gt.f32.partialorder %v2266_v50, 20.0 }
  0x5f   :  { %v1843_v14 = vpop.eup %1842  ;;  %v472_v61 = vsel %vm376_vm9, %v2244_v28, %v440_v31  ;;  %v412_v23 = vmul.f32 %v1841_v57, %v2329_v48  ;;  %v442_v27 = vmul.f32 %v410_v54, %v2250_v33  ;;  %v166_v4 = vmin.f32 %v2420_v40, 20.0  ;;  %v2472_v57 = vld [vmem:[#allocation3 + $0xe0] sm:$0xff] }
  0x60   :  { %v1845_v32 = vpop.eup %1844  ;;  %v443_v35 = vmul.f32 %v411_v20, %v2252_v36  ;;  %v499_v12 = vpack.c.bf16 %v472_v61, %v471_v26  ;;  %v413_v41 = vmul.f32 %v1843_v14, %v2333_v56  ;;  %v473_v47 = vsel %vm377_vm10, %v2246_v29, %v441_v3  ;;  %v2474_v26 = vld [vmem:[#allocation3 + $0xe8] sm:$0xff] }
  0x61   :  { %v1847_v7 = vpop.eup %1846  ;;  %v444_v28 = vmul.f32 %v412_v23, %v2254_v37  ;;  %v414_v48 = vmul.f32 %v1845_v32, %v2337_v63  ;;  %v474_v56 = vsel %vm378_vm11, %v2250_v33, %v442_v27  ;;  %v221_v33 = vmul.f32 1.442695, %v166_v4 }
  0x62   :  { %v1849_v17 = vpop.eup %1848  ;;  %v475_v25 = vsel %vm379_vm12, %v2252_v36, %v443_v35  ;;  %v415_v5 = vmul.f32 %v1847_v7, %v2341_v11  ;;  %v445_v30 = vmul.f32 %v413_v41, %v2258_v42  ;;  %1858 = vpow2.f32 %v219_v38  ;;  %v2448_v11 = vld [vmem:[#allocation3 + $0xc8] sm:$0xff] }
  0x63   :  { %v1851_v19 = vpop.eup %1850  ;;  %1675 = vmatmul.mubr.bf16.gmra.mxu0 %v498_v2  ;;  %v476_v63 = vsel %vm380_vm13, %v2254_v37, %v444_v28  ;;  %v416_v53 = vmul.f32 %v1849_v17, %v2344_v18  ;;  %v446_v29 = vmul.f32 %v414_v48, %v2262_v46  ;;  %v2446_v37 = vld [vmem:[#allocation3 + $0xc0] sm:$0xff]  ;;  %v500_v6 = vpack.c.bf16 %v474_v56, %v473_v47  ;;  %v2486_v2 = vld [vmem:[#allocation3 + $0xf8] sm:$0xff] }
  0x64   :  { %v1853_v22 = vpop.eup %1852  ;;  %1678 = vmatprep.mubr.bf16.mxu0 %v499_v12  ;;  %v501_v58 = vpack.c.bf16 %v476_v63, %v475_v25  ;;  %v447_v43 = vmul.f32 %v415_v5, %v2264_v49  ;;  %1860 = vpow2.f32 %v221_v33  ;;  %v477_v9 = vsel %vm381_vm14, %v2258_v42, %v445_v30 }
  0x65   :  { %v448_v0 = vmul.f32 %v416_v53, %v2266_v50  ;;  %v478_v10 = vsel %vm382_vm15, %v2262_v46, %v446_v29  ;;  %v417_v8 = vmul.f32 %v1851_v19, %v2350_v34  ;;  %v167_v52 = vmin.f32 %v2446_v37, 20.0 }
  0x66   :  { %v1855_v39 = vpop.eup %1854  ;;  %v168_v13 = vmin.f32 %v2448_v11, 20.0  ;;  %v418_v16 = vmul.f32 %v1853_v22, %v2355_v44  ;;  %v169_v54 = vmin.f32 %v2451_v21, 20.0  ;;  %v479_v46 = vsel %vm383_vm0, %v2264_v49, %v447_v43  ;;  %v2480_v44 = vld [vmem:[#allocation3 + $0xf0] sm:$0xff] }
  0x67   :  { %v259_v36 = vadd.f32 2.0, %v1855_v39  ;;  %v223_v34 = vmul.f32 1.442695, %v167_v52  ;;  %v170_v14 = vmin.f32 %v2459_v51, 20.0  ;;  %v480_v61 = vsel %vm384_vm1, %v2266_v50, %v448_v0 }
  0x68   :  { %v1857_v18 = vpop.eup %1856  ;;  %v225_v20 = vmul.f32 1.442695, %v168_v13  ;;  %v227_v32 = vmul.f32 1.442695, %v169_v54  ;;  %v171_v49 = vmin.f32 %v2472_v57, 20.0  ;;  %v172_v27 = vmin.f32 %v2474_v26, 20.0 }
  0x69   :  { %v260_v24 = vadd.f32 2.0, %v1857_v18  ;;  %v2457_v45 = vmul.f32 %v1855_v39, %v259_v36  ;;  %v229_v3 = vmul.f32 1.442695, %v170_v14  ;;  %v502_v35 = vpack.c.bf16 %v478_v10, %v477_v9 }
  0x6a   :  { %v449_v7 = vmul.f32 %v417_v8, %v2270_v55  ;;  %v173_v12 = vmin.f32 %v2480_v44, 20.0  ;;  %v231_v50 = vmul.f32 1.442695, %v171_v49  ;;  %v233_v28 = vmul.f32 1.442695, %v172_v27 }
  0x6b   :  { %v2468_v42 = vmul.f32 %v1857_v18, %v260_v24  ;;  %v323_v31 = vadd.f32 2.0, %v2457_v45  ;;  %1679 = vmatmul.mubr.bf16.gmra.mxu0 %v500_v6  ;;  %v174_v41 = vmin.f32 %v2486_v2, 20.0  ;;  %v503_v15 = vpack.c.bf16 %v480_v61, %v479_v46 }
  0x6c   :  { %1682 = vmatprep.mubr.bf16.mxu0 %v501_v58  ;;  %v450_v17 = vmul.f32 %v418_v16, %v2274_v59  ;;  %v235_v48 = vmul.f32 1.442695, %v173_v12  ;;  %vm385_vm2 = vcmp.gt.f32.partialorder %v2270_v55, 20.0  ;;  %vm386_vm3 = vcmp.gt.f32.partialorder %v2274_v59, 20.0 }
  0x6d   :  { %v324_v23 = vadd.f32 2.0, %v2468_v42  ;;  %1862 = vrcp.f32 %v323_v31  ;;  %v237_v19 = vmul.f32 1.442695, %v174_v41  ;;  %v481_v47 = vsel %vm385_vm2, %v2270_v55, %v449_v7 }
  0x6e   :  { %1864 = vpow2.f32 %v223_v34  ;;  %v482_v56 = vsel %vm386_vm3, %v2274_v59, %v450_v17  ;;  %vm387_vm4 = vcmp.gt.f32.partialorder %v2276_v62, 20.0  ;;  %vm388_vm5 = vcmp.gt.f32.partialorder %v2279_v1, 20.0 }
  0x6f   :  { %1866 = vrcp.f32 %v324_v23  ;;  %v1859_v4 = vpop.eup %1858  ;;  %v504_v30 = vpack.c.bf16 %v482_v56, %v481_v47  ;;  %vm389_vm6 = vcmp.gt.f32.partialorder %v2411_v60, 20.0  ;;  %vm390_vm7 = vcmp.gt.f32.partialorder %v2420_v40, 20.0 }
  0x70   :  { %1868 = vpow2.f32 %v225_v20  ;;  %v261_v25 = vadd.f32 2.0, %v1859_v4  ;;  %vm391_vm8 = vcmp.gt.f32.partialorder %v2446_v37, 20.0  ;;  %vm392_vm9 = vcmp.gt.f32.partialorder %v2448_v11, 20.0 }
  0x71   :  { %1870 = vpow2.f32 %v227_v32  ;;  %v1861_v22 = vpop.eup %1860  ;;  %vm393_vm10 = vcmp.gt.f32.partialorder %v2451_v21, 20.0  ;;  %vm394_vm11 = vcmp.gt.f32.partialorder %v2459_v51, 20.0  ;;  %vm395_vm12 = vcmp.gt.f32.partialorder %v2472_v57, 20.0 }
  0x72   :  { %1872 = vpow2.f32 %v229_v3  ;;  %v262_v5 = vadd.f32 2.0, %v1861_v22  ;;  %v293_v63 = vmul.f32 %v1859_v4, %v261_v25  ;;  %vm396_vm13 = vcmp.gt.f32.partialorder %v2474_v26, 20.0 }
  0x73   :  { %1874 = vpow2.f32 %v231_v50  ;;  %1683 = vmatmul.mubr.bf16.gmra.mxu0 %v502_v35  ;;  %vm397_vm14 = vcmp.gt.f32.partialorder %v2480_v44, 20.0  ;;  %vm398_vm15 = vcmp.gt.f32.partialorder %v2486_v2, 20.0 }
  0x74   :  { %1876 = vpow2.f32 %v233_v28  ;;  %1686 = vmatprep.mubr.bf16.mxu0 %v503_v15  ;;  %v294_v53 = vmul.f32 %v1861_v22, %v262_v5  ;;  %v325_v38 = vadd.f32 2.0, %v293_v63 }
  0x75   :  { %1878 = vpow2.f32 %v235_v48 }
  0x76   :  { %1880 = vpow2.f32 %v237_v19  ;;  %v326_v29 = vadd.f32 2.0, %v294_v53 }
  0x77   :  { %1882 = vrcp.f32 %v325_v38 }
  0x78   :  { %1884 = vrcp.f32 %v326_v29 }
  0x7a   :  { %v1863_v39 = vpop.eup %1862 }
  0x7b   :  { %v1865_v33 = vpop.eup %1864  ;;  %v419_v36 = vmul.f32 %v1863_v39, %v2457_v45  ;;  %1687 = vmatmul.mubr.bf16.gmra.mxu0 %v504_v30 }
  0x7c   :  { %v1867_v18 = vpop.eup %1866  ;;  %v263_v55 = vadd.f32 2.0, %v1865_v33 }
  0x7d   :  { %v1869_v59 = vpop.eup %1868  ;;  %v420_v6 = vmul.f32 %v1867_v18, %v2468_v42  ;;  %v451_v58 = vmul.f32 %v419_v36, %v2276_v62 }
  0x7e   :  { %v1871_v43 = vpop.eup %1870  ;;  %v264_v9 = vadd.f32 2.0, %v1869_v59  ;;  %v295_v0 = vmul.f32 %v1865_v33, %v263_v55 }
  0x7f   :  { %v1873_v24 = vpop.eup %1872  ;;  %v452_v45 = vmul.f32 %v420_v6, %v2279_v1  ;;  %v483_v10 = vsel %vm387_vm4, %v2276_v62, %v451_v58  ;;  %v265_v8 = vadd.f32 2.0, %v1871_v43 }
  0x80   :  { %v1875_v52 = vpop.eup %1874  ;;  %v296_v13 = vmul.f32 %v1869_v59, %v264_v9  ;;  %v327_v16 = vadd.f32 2.0, %v295_v0  ;;  %v266_v31 = vadd.f32 2.0, %v1873_v24 }
  0x81   :  { %v1877_v54 = vpop.eup %1876  ;;  %v484_v42 = vsel %vm388_vm5, %v2279_v1, %v452_v45  ;;  %v297_v46 = vmul.f32 %v1871_v43, %v265_v8  ;;  %v267_v34 = vadd.f32 2.0, %v1875_v52 }
  0x82   :  { %v1879_v20 = vpop.eup %1878  ;;  %v505_v14 = vpack.c.bf16 %v484_v42, %v483_v10  ;;  %v328_v61 = vadd.f32 2.0, %v296_v13  ;;  %1886 = vrcp.f32 %v327_v16  ;;  %v298_v23 = vmul.f32 %v1873_v24, %v266_v31 }
  0x83   :  { %v1881_v32 = vpop.eup %1880  ;;  %v329_v3 = vadd.f32 2.0, %v297_v46  ;;  %v268_v49 = vadd.f32 2.0, %v1877_v54  ;;  %v299_v27 = vmul.f32 %v1875_v52, %v267_v34  ;;  %v269_v62 = vadd.f32 2.0, %v1879_v20 }
  0x84   :  { %1690 = vmatprep.mubr.bf16.mxu0 %v505_v14  ;;  %1888 = vrcp.f32 %v328_v61  ;;  %v330_v35 = vadd.f32 2.0, %v298_v23  ;;  %v270_v7 = vadd.f32 2.0, %v1881_v32  ;;  %v1883_v17 = vpop.eup %1882 }
  0x85   :  { %1890 = vrcp.f32 %v329_v3  ;;  %v300_v12 = vmul.f32 %v1877_v54, %v268_v49  ;;  %v331_v50 = vadd.f32 2.0, %v299_v27  ;;  %v301_v1 = vmul.f32 %v1879_v20, %v269_v62  ;;  %v1885_v19 = vpop.eup %1884  ;;  %v1770_v3 = vld [vmem:[#allocation8 + $0x18] sm:$0xff]   ;;  %v1773_v49 = vld [vmem:[#allocation8] sm:$0xff]  }
  0x86   :  { %1892 = vrcp.f32 %v330_v35  ;;  %v302_v28 = vmul.f32 %v1881_v32, %v270_v7  ;;  %v421_v4 = vmul.f32 %v1883_v17, %v293_v63  ;;  %v422_v22 = vmul.f32 %v1885_v19, %v294_v53  ;;  %v1768_v32 = vld [vmem:[#allocation8 + $0x28] sm:$0xff]  }
  0x87   :  { %v332_v41 = vadd.f32 2.0, %v300_v12  ;;  %1894 = vrcp.f32 %v331_v50  ;;  %v333_v15 = vadd.f32 2.0, %v301_v1 }
  0x88   :  { %v334_v48 = vadd.f32 2.0, %v302_v28  ;;  %v453_v47 = vmul.f32 %v421_v4, %v2411_v60  ;;  %v454_v56 = vmul.f32 %v422_v22, %v2420_v40 }
  0x89   :  { %1896 = vrcp.f32 %v332_v41 }
  0x8a   :  { %1898 = vrcp.f32 %v333_v15  ;;  %v485_v25 = vsel %vm389_vm6, %v2411_v60, %v453_v47  ;;  %v486_v5 = vsel %vm390_vm7, %v2420_v40, %v454_v56 }
  0x8b   :  { %1900 = vrcp.f32 %v334_v48  ;;  %v506_v38 = vpack.c.bf16 %v486_v5, %v485_v25 }
  0x8d   :  { %1691 = vmatmul.mubr.bf16.gmra.mxu0 %v506_v38 }
  0x8f   :  { %v1887_v30 = vpop.eup %1886 }
  0x90   :  { %v423_v39 = vmul.f32 %v1887_v30, %v295_v0 }
  0x91   :  { %v1889_v63 = vpop.eup %1888 }
  0x92   :  { %v1891_v53 = vpop.eup %1890  ;;  %v424_v29 = vmul.f32 %v1889_v63, %v296_v13  ;;  %v455_v33 = vmul.f32 %v423_v39, %v2446_v37 }
  0x93   :  { %v1893_v36 = vpop.eup %1892  ;;  %v425_v18 = vmul.f32 %v1891_v53, %v297_v46 }
  0x94   :  { %v1895_v55 = vpop.eup %1894  ;;  %v456_v60 = vmul.f32 %v424_v29, %v2448_v11  ;;  %v487_v40 = vsel %vm391_vm8, %v2446_v37, %v455_v33  ;;  %v426_v59 = vmul.f32 %v1893_v36, %v298_v23  ;;  %v1766_v23 = vld [vmem:[#allocation8 + $0x38] sm:$0xff]  }
  0x95   :  { %v457_v6 = vmul.f32 %v425_v18, %v2451_v21  ;;  %v427_v58 = vmul.f32 %v1895_v55, %v299_v27  ;;  %1702 = vmatprep.subr.bf16.mxu1 %v1766_v23  ;;  %v2539_v27 = vld [vmem:[%s2966_s2] ss:$0 sm:$0xff] }
  0x96   :  { %v1897_v43 = vpop.eup %1896  ;;  %v488_v9 = vsel %vm392_vm9, %v2448_v11, %v456_v60  ;;  %v458_v0 = vmul.f32 %v426_v59, %v2459_v51  ;;  %1703 = vmatpush3.bf16.msra.mxu1 %v1766_v23 }
  0x97   :  { %v1899_v24 = vpop.eup %1898  ;;  %v507_v45 = vpack.c.bf16 %v488_v9, %v487_v40  ;;  %v489_v10 = vsel %vm393_vm10, %v2451_v21, %v457_v6  ;;  %v428_v37 = vmul.f32 %v1897_v43, %v300_v12  ;;  %v459_v8 = vmul.f32 %v427_v58, %v2472_v57 }
  0x98   :  { %v1901_v52 = vpop.eup %1900  ;;  %v490_v13 = vsel %vm394_vm11, %v2459_v51, %v458_v0  ;;  %v429_v16 = vmul.f32 %v1899_v24, %v301_v1 }
  0x99   :  { %1694 = vmatprep.mubr.bf16.mxu0 %v507_v45  ;;  %v508_v11 = vpack.c.bf16 %v490_v13, %v489_v10  ;;  %v460_v31 = vmul.f32 %v428_v37, %v2474_v26  ;;  %v491_v54 = vsel %vm395_vm12, %v2472_v57, %v459_v8  ;;  %v430_v42 = vmul.f32 %v1901_v52, %v302_v28  ;;  %v1767_v57 = vld [vmem:[#allocation8 + $0x30] sm:$0xff]  }
  0x9a   :  { %v461_v21 = vmul.f32 %v429_v16, %v2480_v44  ;;  %1704 = vmatprep.subr.bf16.mxu1 %v1767_v57 }
  0x9b   :  { %1695 = vmatmul.mubr.bf16.gmra.mxu0 %v508_v11  ;;  %v492_v46 = vsel %vm396_vm13, %v2474_v26, %v460_v31  ;;  %v462_v51 = vmul.f32 %v430_v42, %v2486_v2  ;;  %1705 = vmatpush3.bf16.msra.mxu1 %v1767_v57  ;;  %v1769_v26 = vld [vmem:[#allocation8 + $0x20] sm:$0xff]  }
  0x9c   :  { %v509_v34 = vpack.c.bf16 %v492_v46, %v491_v54  ;;  %v493_v20 = vsel %vm397_vm14, %v2480_v44, %v461_v21  ;;  %1706 = vmatprep.subr.bf16.mxu1 %v1768_v32  ;;  %v1771_v44 = vld [vmem:[#allocation8 + $0x10] sm:$0xff]  }
  0x9d   :  { %v494_v14 = vsel %vm398_vm15, %v2486_v2, %v462_v51  ;;  %v1772_v2 = vld [vmem:[#allocation8 + $0x8] sm:$0xff]  }
  0x9e   :  { %1698 = vmatprep.mubr.bf16.mxu0 %v509_v34  ;;  %v510_v61 = vpack.c.bf16 %v494_v14, %v493_v20 }
  0x9f   :  { %1707 = vmatpush3.bf16.msra.mxu1 %v1768_v32 }
  0xa0   :  { %1708 = vmatprep.subr.bf16.mxu1 %v1769_v26 }
  0xa3   :  { %1699 = vmatmul.mubr.bf16.gmra.mxu0 %v510_v61  ;;  %1709 = vmatpush3.bf16.msra.mxu1 %v1769_v26 }
  0xa4   :  { %1710 = vmatprep.subr.bf16.mxu1 %v1770_v3 }
  0xa7   :  { %1711 = vmatpush3.bf16.msra.mxu1 %v1770_v3 }
  0xa8   :  { %1712 = vmatprep.subr.bf16.mxu1 %v1771_v44 }
  0xab   :  { %1713 = vmatpush3.bf16.msra.mxu1 %v1771_v44 }
  0xac   :  { %1714 = vmatprep.subr.bf16.mxu1 %v1772_v2 }
  0xaf   :  { %1715 = vmatpush3.bf16.msra.mxu1 %v1772_v2 }
  0xb0   :  { %1716 = vmatprep.subr.bf16.mxu1 %v1773_v49 }
  0xb3   :  { %1717 = vmatpush3.bf16.msra.mxu1 %v1773_v49 }
 0x11b   :  { %v1672_v62 = vpop.f32.mrf.mxu0 }
 0x11c   :  { %v2542_v35 = vadd.f32 %v1672_v62, %v2539_v27 }
 0x11d   :  { %v616_v7 = vpop.f32.mrf.mxu0 }
 0x11e   :  { %v745_v12 = vmin.f32 %v2542_v35, 20.0  ;;  %v2546_v50 = vadd.f32 %v2539_v27, %v616_v7  ;;  %vm969_vm0 = vcmp.gt.f32.partialorder %v2542_v35, 20.0 }
 0x11f   :  { %v1673_v1 = vpop.f32.mrf.mxu0 }
 0x120   :  { %v779_v28 = vmul.f32 1.442695, %v745_v12  ;;  %v743_v41 = vmin.f32 %v2546_v50, 20.0  ;;  %v2550_v15 = vadd.f32 %v1673_v1, %v2539_v27  ;;  %vm967_vm1 = vcmp.gt.f32.partialorder %v2546_v50, 20.0 }
 0x121   :  { %v619_v17 = vpop.f32.mrf.mxu0 }
 0x122   :  { %1902 = vpow2.f32 %v779_v28  ;;  %v775_v48 = vmul.f32 1.442695, %v743_v41  ;;  %v746_v19 = vmin.f32 %v2550_v15, 20.0  ;;  %v2554_v4 = vadd.f32 %v2539_v27, %v619_v17 }
 0x123   :  { %v1676_v22 = vpop.f32.mrf.mxu0  ;;  %vm970_vm2 = vcmp.gt.f32.partialorder %v2550_v15, 20.0 }
 0x124   :  { %1904 = vpow2.f32 %v775_v48  ;;  %v781_v47 = vmul.f32 1.442695, %v746_v19  ;;  %v744_v56 = vmin.f32 %v2554_v4, 20.0  ;;  %v2558_v25 = vadd.f32 %v1676_v22, %v2539_v27 }
 0x125   :  { %v632_v5 = vpop.f32.mrf.mxu0  ;;  %vm968_vm3 = vcmp.gt.f32.partialorder %v2554_v4, 20.0 }
 0x126   :  { %1906 = vpow2.f32 %v781_v47  ;;  %v777_v30 = vmul.f32 1.442695, %v744_v56  ;;  %v749_v38 = vmin.f32 %v2558_v25, 20.0  ;;  %v2562_v39 = vadd.f32 %v2539_v27, %v632_v5 }
 0x127   :  { %v1677_v63 = vpop.f32.mrf.mxu0  ;;  %vm973_vm4 = vcmp.gt.f32.partialorder %v2558_v25, 20.0 }
 0x128   :  { %1908 = vpow2.f32 %v777_v30  ;;  %v787_v53 = vmul.f32 1.442695, %v749_v38  ;;  %v747_v29 = vmin.f32 %v2562_v39, 20.0  ;;  %v2566_v33 = vadd.f32 %v1677_v63, %v2539_v27 }
 0x129   :  { %v635_v36 = vpop.f32.mrf.mxu0  ;;  %vm971_vm5 = vcmp.gt.f32.partialorder %v2562_v39, 20.0 }
 0x12a   :  { %1910 = vpow2.f32 %v787_v53  ;;  %v783_v18 = vmul.f32 1.442695, %v747_v29  ;;  %v750_v55 = vmin.f32 %v2566_v33, 20.0  ;;  %v2570_v60 = vadd.f32 %v2539_v27, %v635_v36 }
 0x12b   :  { %v1680_v40 = vpop.f32.mrf.mxu0  ;;  %vm974_vm7 = vcmp.gt.f32.partialorder %v2566_v33, 20.0 }
 0x12c   :  { %1912 = vpow2.f32 %v783_v18  ;;  %v789_v59 = vmul.f32 1.442695, %v750_v55  ;;  %v748_v6 = vmin.f32 %v2570_v60, 20.0  ;;  %v2574_v58 = vadd.f32 %v1680_v40, %v2539_v27 }
 0x12d   :  { %v648_v43 = vpop.f32.mrf.mxu0  ;;  %vm972_vm6 = vcmp.gt.f32.partialorder %v2570_v60, 20.0 }
 0x12e   :  { %1914 = vpow2.f32 %v789_v59  ;;  %v785_v9 = vmul.f32 1.442695, %v748_v6  ;;  %v753_v0 = vmin.f32 %v2574_v58, 20.0  ;;  %v2578_v24 = vadd.f32 %v2539_v27, %v648_v43 }
 0x12f   :  { %v1903_v45 = vpop.eup %1902  ;;  %v1681_v10 = vpop.f32.mrf.mxu0  ;;  %vm977_vm10 = vcmp.gt.f32.partialorder %v2574_v58, 20.0 }
 0x130   :  { %v841_v37 = vadd.f32 2.0, %v1903_v45  ;;  %1916 = vpow2.f32 %v785_v9  ;;  %v795_v8 = vmul.f32 1.442695, %v753_v0  ;;  %v751_v52 = vmin.f32 %v2578_v24, 20.0 }
 0x131   :  { %v1905_v13 = vpop.eup %1904  ;;  %v2582_v16 = vadd.f32 %v1681_v10, %v2539_v27  ;;  %v651_v11 = vpop.f32.mrf.mxu0  ;;  %vm975_vm9 = vcmp.gt.f32.partialorder %v2578_v24, 20.0 }
 0x132   :  { %v2584_v31 = vmul.f32 %v1903_v45, %v841_v37  ;;  %1918 = vpow2.f32 %v795_v8  ;;  %v791_v54 = vmul.f32 1.442695, %v751_v52  ;;  %v2587_v42 = vadd.f32 %v2539_v27, %v651_v11 }
 0x133   :  { %v1907_v21 = vpop.eup %1906  ;;  %v754_v46 = vmin.f32 %v2582_v16, 20.0  ;;  %v1684_v51 = vpop.f32.mrf.mxu0  ;;  %v839_v34 = vadd.f32 2.0, %v1905_v13  ;;  %vm978_vm11 = vcmp.gt.f32.partialorder %v2582_v16, 20.0 }
 0x134   :  { %v905_v20 = vadd.f32 2.0, %v2584_v31  ;;  %v842_v14 = vadd.f32 2.0, %v1907_v21  ;;  %1920 = vpow2.f32 %v791_v54  ;;  %v752_v61 = vmin.f32 %v2587_v42, 20.0 }
 0x135   :  { %v1909_v23 = vpop.eup %1908  ;;  %v797_v57 = vmul.f32 1.442695, %v754_v46  ;;  %v2593_v32 = vadd.f32 %v1684_v51, %v2539_v27  ;;  %v664_v26 = vpop.f32.mrf.mxu0  ;;  %v2595_v3 = vmul.f32 %v1905_v13, %v839_v34  ;;  %vm976_vm8 = vcmp.gt.f32.partialorder %v2587_v42, 20.0 }
 0x136   :  { %1922 = vrcp.f32 %v905_v20  ;;  %v2597_v44 = vmul.f32 %v1907_v21, %v842_v14  ;;  %v793_v2 = vmul.f32 1.442695, %v752_v61  ;;  %v2600_v49 = vadd.f32 %v2539_v27, %v664_v26 }
 0x137   :  { %v1911_v62 = vpop.eup %1910  ;;  %1924 = vpow2.f32 %v797_v57  ;;  %v757_v7 = vmin.f32 %v2593_v32, 20.0  ;;  %v1685_v12 = vpop.f32.mrf.mxu0  ;;  %v840_v1 = vadd.f32 2.0, %v1909_v23  ;;  %v903_v28 = vadd.f32 2.0, %v2595_v3 }
 0x138   :  { %v906_v41 = vadd.f32 2.0, %v2597_v44  ;;  %v845_v17 = vadd.f32 2.0, %v1911_v62  ;;  %1926 = vpow2.f32 %v793_v2  ;;  %v755_v48 = vmin.f32 %v2600_v49, 20.0 }
 0x139   :  { %v1913_v19 = vpop.eup %1912  ;;  %v803_v22 = vmul.f32 1.442695, %v757_v7  ;;  %v2607_v47 = vadd.f32 %v1685_v12, %v2539_v27  ;;  %v667_v56 = vpop.f32.mrf.mxu0  ;;  %v2609_v5 = vmul.f32 %v1909_v23, %v840_v1  ;;  %1928 = vrcp.f32 %v903_v28 }
 0x13a   :  { %1930 = vrcp.f32 %v906_v41  ;;  %v2611_v30 = vmul.f32 %v1911_v62, %v845_v17  ;;  %v843_v38 = vadd.f32 2.0, %v1913_v19  ;;  %v799_v63 = vmul.f32 1.442695, %v755_v48 }
 0x13b   :  { %v1915_v53 = vpop.eup %1914  ;;  %1932 = vpow2.f32 %v803_v22  ;;  %v758_v29 = vmin.f32 %v2607_v47, 20.0  ;;  %v2615_v36 = vadd.f32 %v2539_v27, %v667_v56  ;;  %v1688_v18 = vpop.f32.mrf.mxu0  ;;  %v904_v55 = vadd.f32 2.0, %v2609_v5 }
 0x13c   :  { %v909_v40 = vadd.f32 2.0, %v2611_v30  ;;  %v2619_v59 = vmul.f32 %v1913_v19, %v843_v38  ;;  %v846_v6 = vadd.f32 2.0, %v1915_v53  ;;  %1934 = vpow2.f32 %v799_v63 }
 0x13d   :  { %v1917_v43 = vpop.eup %1916  ;;  %v805_v9 = vmul.f32 1.442695, %v758_v29  ;;  %v756_v0 = vmin.f32 %v2615_v36, 20.0  ;;  %v2623_v45 = vadd.f32 %v1688_v18, %v2539_v27  ;;  %v680_v10 = vpop.f32.mrf.mxu0  ;;  %1936 = vrcp.f32 %v904_v55 }
 0x13e   :  { %1938 = vrcp.f32 %v909_v40  ;;  %v907_v37 = vadd.f32 2.0, %v2619_v59  ;;  %v2626_v8 = vmul.f32 %v1915_v53, %v846_v6  ;;  %v844_v52 = vadd.f32 2.0, %v1917_v43 }
 0x13f   :  { %v1919_v13 = vpop.eup %1918  ;;  %1940 = vpow2.f32 %v805_v9  ;;  %v801_v11 = vmul.f32 1.442695, %v756_v0  ;;  %v761_v54 = vmin.f32 %v2623_v45, 20.0  ;;  %v2630_v21 = vadd.f32 %v2539_v27, %v680_v10  ;;  %v1689_v46 = vpop.f32.mrf.mxu0 }
 0x140   :  { %1942 = vrcp.f32 %v907_v37  ;;  %v910_v51 = vadd.f32 2.0, %v2626_v8  ;;  %v2633_v34 = vmul.f32 %v1917_v43, %v844_v52  ;;  %v849_v20 = vadd.f32 2.0, %v1919_v13 }
 0x141   :  { %v1921_v14 = vpop.eup %1920  ;;  %1944 = vpow2.f32 %v801_v11  ;;  %v811_v61 = vmul.f32 1.442695, %v761_v54  ;;  %v759_v23 = vmin.f32 %v2630_v21, 20.0  ;;  %v2637_v57 = vadd.f32 %v1689_v46, %v2539_v27  ;;  %v683_v26 = vpop.f32.mrf.mxu0 }
 0x142   :  { %1946 = vrcp.f32 %v910_v51  ;;  %v908_v2 = vadd.f32 2.0, %v2633_v34  ;;  %v2640_v62 = vmul.f32 %v1919_v13, %v849_v20  ;;  %v847_v7 = vadd.f32 2.0, %v1921_v14 }
 0x143   :  { %v1923_v12 = vpop.eup %1922  ;;  %1948 = vpow2.f32 %v811_v61  ;;  %v807_v1 = vmul.f32 1.442695, %v759_v23  ;;  %v762_v28 = vmin.f32 %v2637_v57, 20.0  ;;  %v2644_v41 = vadd.f32 %v2539_v27, %v683_v26 }
 0x144   :  { %v1925_v17 = vpop.eup %1924  ;;  %v1001_v48 = vmul.f32 %v1923_v12, %v2584_v31  ;;  %1950 = vrcp.f32 %v908_v2  ;;  %v913_v19 = vadd.f32 2.0, %v2640_v62  ;;  %v2649_v22 = vmul.f32 %v1921_v14, %v847_v7 }
 0x145   :  { %v1927_v56 = vpop.eup %1926  ;;  %v850_v38 = vadd.f32 2.0, %v1925_v17  ;;  %1952 = vpow2.f32 %v807_v1  ;;  %v813_v63 = vmul.f32 1.442695, %v762_v28  ;;  %v760_v53 = vmin.f32 %v2644_v41, 20.0 }
 0x146   :  { %v1929_v29 = vpop.eup %1928  ;;  %1954 = vrcp.f32 %v913_v19  ;;  %v911_v18 = vadd.f32 2.0, %v2649_v22  ;;  %v848_v55 = vadd.f32 2.0, %v1927_v56  ;;  %v1033_v0 = vmul.f32 %v1001_v48, %v2542_v35 }
 0x147   :  { %v1931_v40 = vpop.eup %1930  ;;  %v2654_v31 = vmul.f32 %v1925_v17, %v850_v38  ;;  %1956 = vpow2.f32 %v813_v63  ;;  %v809_v6 = vmul.f32 1.442695, %v760_v53  ;;  %v999_v43 = vmul.f32 %v1929_v29, %v2595_v3 }
 0x148   :  { %v1933_v9 = vpop.eup %1932  ;;  %v1002_v10 = vmul.f32 %v1931_v40, %v2597_v44  ;;  %1958 = vrcp.f32 %v911_v18  ;;  %v2659_v37 = vmul.f32 %v1927_v56, %v848_v55  ;;  %v1065_v2 = vsel %vm969_vm0, %v2542_v35, %v1033_v0 }
 0x149   :  { %v1935_v52 = vpop.eup %1934  ;;  %v914_v13 = vadd.f32 2.0, %v2654_v31  ;;  %v853_v11 = vadd.f32 2.0, %v1933_v9  ;;  %1960 = vpow2.f32 %v809_v6  ;;  %v1031_v54 = vmul.f32 %v999_v43, %v2546_v50 }
 0x14a   :  { %v1937_v46 = vpop.eup %1936  ;;  %v1034_v51 = vmul.f32 %v1002_v10, %v2550_v15  ;;  %v912_v3 = vadd.f32 2.0, %v2659_v37  ;;  %v851_v20 = vadd.f32 2.0, %v1935_v52  ;;  %vm979_vm12 = vcmp.gt.f32.partialorder %v2600_v49, 20.0 }
 0x14b   :  { %v1939_v14 = vpop.eup %1938  ;;  %1962 = vrcp.f32 %v914_v13  ;;  %v2666_v44 = vmul.f32 %v1933_v9, %v853_v11  ;;  %v1000_v61 = vmul.f32 %v1937_v46, %v2609_v5  ;;  %v1063_v5 = vsel %vm967_vm1, %v2546_v50, %v1031_v54 }
 0x14c   :  { %v1941_v23 = vpop.eup %1940  ;;  %1964 = vrcp.f32 %v912_v3  ;;  %v2670_v26 = vmul.f32 %v1935_v52, %v851_v20  ;;  %v1066_v7 = vsel %vm970_vm2, %v2550_v15, %v1034_v51  ;;  %v1005_v19 = vmul.f32 %v1939_v14, %v2611_v30 }
 0x14d   :  { %v1943_v12 = vpop.eup %1942  ;;  %v917_v1 = vadd.f32 2.0, %v2666_v44  ;;  %v854_v28 = vadd.f32 2.0, %v1941_v23  ;;  %v1032_v17 = vmul.f32 %v1000_v61, %v2554_v4  ;;  %v1128_v15 = vpack.c.bf16 %v1066_v7, %v1065_v2  ;;  %v1692_v30 = vpop.f32.mrf.mxu0 }
 0x14e   :  { %v1945_v48 = vpop.eup %1944  ;;  %v1003_v56 = vmul.f32 %v1943_v12, %v2619_v59  ;;  %v915_v35 = vadd.f32 2.0, %v2670_v26  ;;  %v2696_v0 = vadd.f32 %v1692_v30, %v2539_v27  ;;  %vm980_vm13 = vcmp.gt.f32.partialorder %v2615_v36, 20.0 }
 0x14f   :  { %v1947_v38 = vpop.eup %1946  ;;  %1966 = vrcp.f32 %v917_v1  ;;  %v2685_v63 = vmul.f32 %v1941_v23, %v854_v28  ;;  %v852_v53 = vadd.f32 2.0, %v1945_v48  ;;  %v1064_v29 = vsel %vm968_vm3, %v2554_v4, %v1032_v17  ;;  %v696_v13 = vpop.f32.mrf.mxu0 }
 0x150   :  { %v1949_v50 = vpop.eup %1948  ;;  %v1035_v18 = vmul.f32 %v1003_v56, %v2562_v39  ;;  %v1006_v55 = vmul.f32 %v1947_v38, %v2626_v8  ;;  %1968 = vrcp.f32 %v915_v35  ;;  %v1127_v59 = vpack.c.bf16 %v1064_v29, %v1063_v5 }
 0x151   :  { %v1951_v40 = vpop.eup %1950  ;;  %v918_v6 = vadd.f32 2.0, %v2685_v63  ;;  %v2693_v43 = vmul.f32 %v1945_v48, %v852_v53  ;;  %v857_v9 = vadd.f32 2.0, %v1949_v50  ;;  %v1037_v4 = vmul.f32 %v1005_v19, %v2558_v25  ;;  %v1693_v61 = vpop.f32.mrf.mxu0 }
 0x152   :  { %v1953_v10 = vpop.eup %1952  ;;  %v2700_v52 = vmul.f32 %v1006_v55, %v2566_v33  ;;  %v1004_v8 = vmul.f32 %v1951_v40, %v2633_v34  ;;  %1718 = vmatprep.mubr.bf16.mxu1 %v1127_v59  ;;  %v765_v14 = vmin.f32 %v2696_v0, 20.0  ;;  %v2711_v34 = vadd.f32 %v2539_v27, %v696_v13 }
 0x153   :  { %v1955_v11 = vpop.eup %1954  ;;  %1970 = vrcp.f32 %v918_v6  ;;  %v916_v54 = vadd.f32 2.0, %v2693_v43  ;;  %v2705_v46 = vmul.f32 %v1949_v50, %v857_v9  ;;  %v855_v51 = vadd.f32 2.0, %v1953_v10  ;;  %1719 = vmatmul.mubr.bf16.vlgmr.msra.gmra.mxu1 %v1128_v15  ;;  %v699_v48 = vpop.f32.mrf.mxu0 }
 0x154   :  { %v1957_v3 = vpop.eup %1956  ;;  %v1009_v20 = vmul.f32 %v1955_v11, %v2640_v62  ;;  %v2714_v23 = vsel %vm971_vm5, %v2562_v39, %v1035_v18  ;;  %v1036_v17 = vmul.f32 %v1004_v8, %v2570_v60  ;;  %v819_v62 = vmul.f32 1.442695, %v765_v14 }
 0x155   :  { %v1959_v2 = vpop.eup %1958  ;;  %1972 = vrcp.f32 %v916_v54  ;;  %v921_v7 = vadd.f32 2.0, %v2705_v46  ;;  %v2717_v12 = vmul.f32 %v1953_v10, %v855_v51  ;;  %v858_v1 = vadd.f32 2.0, %v1957_v3 }
 0x156   :  { %v1961_v28 = vpop.eup %1960  ;;  %v763_v5 = vmin.f32 %v2711_v34, 20.0  ;;  %v2724_v19 = vsel %vm973_vm4, %v2558_v25, %v1037_v4  ;;  %v2731_v38 = vmul.f32 %v1009_v20, %v2574_v58  ;;  %v2734_v29 = vadd.f32 %v1693_v61, %v2539_v27 }
 0x157   :  { %1974 = vrcp.f32 %v921_v7  ;;  %v919_v39 = vadd.f32 2.0, %v2717_v12  ;;  %v2727_v56 = vmul.f32 %v1957_v3, %v858_v1  ;;  %v856_v35 = vadd.f32 2.0, %v1961_v28 }
 0x158   :  { %v1963_v15 = vpop.eup %1962  ;;  %1976 = vpow2.f32 %v819_v62  ;;  %v815_v53 = vmul.f32 1.442695, %v763_v5  ;;  %v1007_v25 = vmul.f32 %v1959_v2, %v2649_v22  ;;  %v766_v59 = vmin.f32 %v2734_v29, 20.0 }
 0x159   :  { %v1965_v50 = vpop.eup %1964  ;;  %1978 = vrcp.f32 %v919_v39  ;;  %v922_v18 = vadd.f32 2.0, %v2727_v56  ;;  %v2738_v55 = vmul.f32 %v1961_v28, %v856_v35  ;;  %v2744_v40 = vadd.f32 %v2539_v27, %v699_v48 }
 0x15a   :  { %v1008_v30 = vmul.f32 %v1965_v50, %v2659_v37  ;;  %1980 = vpow2.f32 %v815_v53  ;;  %v1010_v22 = vmul.f32 %v1963_v15, %v2654_v31  ;;  %v821_v8 = vmul.f32 1.442695, %v766_v59 }
 0x15b   :  { %v1696_v6 = vpop.f32.mrf.mxu0  ;;  %1982 = vrcp.f32 %v922_v18  ;;  %v920_v9 = vadd.f32 2.0, %v2738_v55  ;;  %v764_v13 = vmin.f32 %v2744_v40, 20.0  ;;  %v1068_v54 = vsel %vm972_vm6, %v2570_v60, %v1036_v17 }
 0x15c   :  { %v2750_v10 = vadd.f32 %v1696_v6, %v2539_v27  ;;  %v1967_v37 = vpop.eup %1966  ;;  %v1040_v4 = vmul.f32 %v1008_v30, %v2587_v42  ;;  %v1129_v7 = vpack.c.bf16 %v1068_v54, %v2714_v23  ;;  %v1039_v60 = vmul.f32 %v1007_v25, %v2578_v24 }
 0x15d   :  { %v712_v11 = vpop.f32.mrf.mxu0  ;;  %v1969_v31 = vpop.eup %1968  ;;  %v1013_v51 = vmul.f32 %v1967_v37, %v2666_v44  ;;  %1984 = vrcp.f32 %v920_v9  ;;  %v817_v61 = vmul.f32 1.442695, %v764_v13  ;;  %v1042_v62 = vmul.f32 %v1010_v22, %v2582_v16 }
 0x15e   :  { %v769_v3 = vmin.f32 %v2750_v10, 20.0  ;;  %v2762_v20 = vadd.f32 %v2539_v27, %v712_v11  ;;  %v1011_v14 = vmul.f32 %v1969_v31, %v2670_v26  ;;  %1986 = vpow2.f32 %v821_v8  ;;  %1722 = vmatprep.mubr.bf16.mxu1 %v1129_v7 }
 0x15f   :  { %v1697_v2 = vpop.f32.mrf.mxu0  ;;  %v2773_v5 = vmul.f32 %v1013_v51, %v2593_v32  ;;  %1988 = vpow2.f32 %v817_v61  ;;  %v1070_v23 = vsel %vm974_vm7, %v2566_v33, %v2700_v52  ;;  %v1072_v33 = vsel %vm976_vm8, %v2587_v42, %v1040_v4 }
 0x160   :  { %v827_v1 = vmul.f32 1.442695, %v769_v3  ;;  %v767_v28 = vmin.f32 %v2762_v20, 20.0  ;;  %v2769_v44 = vadd.f32 %v1697_v2, %v2539_v27  ;;  %v1971_v17 = vpop.eup %1970  ;;  %v2782_v53 = vmul.f32 %v1011_v14, %v2600_v49 }
 0x161   :  { %v715_v26 = vpop.f32.mrf.mxu0  ;;  %v1014_v48 = vmul.f32 %v1971_v17, %v2685_v63  ;;  %v1130_v18 = vpack.c.bf16 %v1070_v23, %v2724_v19  ;;  %v1071_v30 = vsel %vm975_vm9, %v2578_v24, %v1039_v60  ;;  %v1073_v42 = vsel %vm977_vm10, %v2574_v58, %v2731_v38 }
 0x162   :  { %1990 = vpow2.f32 %v827_v1  ;;  %v823_v39 = vmul.f32 1.442695, %v767_v28  ;;  %v770_v35 = vmin.f32 %v2769_v44, 20.0  ;;  %v1973_v15 = vpop.eup %1972  ;;  %v2785_v50 = vadd.f32 %v2539_v27, %v715_v26 }
 0x163   :  { %v1700_v25 = vpop.f32.mrf.mxu0  ;;  %v1012_v63 = vmul.f32 %v1973_v15, %v2693_v43  ;;  %1723 = vmatmul.mubr.bf16.gmra.mxu1 %v1130_v18  ;;  %v1131_v19 = vpack.c.bf16 %v1072_v33, %v1071_v30  ;;  %v2806_v24 = vmul.f32 %v1014_v48, %v2607_v47  ;;  %v1074_v4 = vsel %vm978_vm11, %v2582_v16, %v1042_v62 }
 0x164   :  { %1992 = vpow2.f32 %v823_v39  ;;  %v829_v52 = vmul.f32 1.442695, %v770_v35  ;;  %v1975_v59 = vpop.eup %1974  ;;  %v768_v6 = vmin.f32 %v2785_v50, 20.0  ;;  %v2797_v22 = vadd.f32 %v1700_v25, %v2539_v27 }
 0x165   :  { %v728_v9 = vpop.f32.mrf.mxu0  ;;  %v1977_v43 = vpop.eup %1976  ;;  %v1044_v13 = vmul.f32 %v1012_v63, %v2615_v36  ;;  %1726 = vmatprep.mubr.bf16.mxu1 %v1131_v19  ;;  %v2817_v51 = vmul.f32 %v1975_v59, %v2705_v46  ;;  %v1132_v62 = vpack.c.bf16 %v1074_v4, %v1073_v42  ;;  %vm981_vm14 = vcmp.gt.f32.partialorder %v2593_v32, 20.0 }
 0x166   :  { %1994 = vpow2.f32 %v829_v52  ;;  %v2809_v37 = vadd.f32 %v2539_v27, %v728_v9  ;;  %v1979_v8 = vpop.eup %1978  ;;  %v861_v58 = vadd.f32 2.0, %v1977_v43  ;;  %v825_v38 = vmul.f32 1.442695, %v768_v6 }
 0x167   :  { %v773_v11 = vmin.f32 %v2797_v22, 20.0  ;;  %v1701_v54 = vpop.f32.mrf.mxu0  ;;  %v1981_v31 = vpop.eup %1980  ;;  %v1015_v3 = vmul.f32 %v1979_v8, %v2717_v12  ;;  %vm982_vm15 = vcmp.gt.f32.partialorder %v2607_v47, 20.0  ;;  %vm983_vm0 = vcmp.gt.f32.partialorder %v2630_v21, 20.0 }
 0x168   :  { %v771_v14 = vmin.f32 %v2809_v37, 20.0  ;;  %v2822_v61 = vadd.f32 %v1701_v54, %v2539_v27  ;;  %v1983_v16 = vpop.eup %1982  ;;  %v2824_v2 = vmul.f32 %v1977_v43, %v861_v58  ;;  %v859_v7 = vadd.f32 2.0, %v1981_v31 }
 0x169   :  { %1996 = vpow2.f32 %v825_v38  ;;  %v835_v60 = vmul.f32 1.442695, %v773_v11  ;;  %v731_v1 = vpop.f32.mrf.mxu0  ;;  %v1018_v28 = vmul.f32 %v1983_v16, %v2727_v56  ;;  %v1047_v35 = vmul.f32 %v1015_v3, %v2630_v21 }
 0x16a   :  { %v831_v17 = vmul.f32 1.442695, %v771_v14  ;;  %v774_v46 = vmin.f32 %v2822_v61, 20.0  ;;  %v1985_v26 = vpop.eup %1984  ;;  %v925_v12 = vadd.f32 2.0, %v2824_v2  ;;  %v2829_v23 = vmul.f32 %v1981_v31, %v859_v7 }
 0x16b   :  { %1998 = vpow2.f32 %v835_v60  ;;  %v2832_v48 = vadd.f32 %v2539_v27, %v731_v1  ;;  %v1987_v39 = vpop.eup %1986  ;;  %v1016_v15 = vmul.f32 %v1985_v26, %v2738_v55  ;;  %1727 = vmatmul.mubr.bf16.gmra.mxu1 %v1132_v62  ;;  %v1050_v52 = vmul.f32 %v1018_v28, %v2637_v57 }
 0x16c   :  { %2000 = vpow2.f32 %v831_v17  ;;  %v837_v56 = vmul.f32 1.442695, %v774_v46  ;;  %v923_v25 = vadd.f32 2.0, %v2829_v23  ;;  %v862_v18 = vadd.f32 2.0, %v1987_v39  ;;  %v1989_v63 = vpop.eup %1988 }
 0x16d   :  { %2002 = vrcp.f32 %v925_v12  ;;  %v772_v33 = vmin.f32 %v2832_v48, 20.0  ;;  %v1075_v27 = vsel %vm979_vm12, %v2600_v49, %v2782_v53  ;;  %v1076_v55 = vsel %vm980_vm13, %v2615_v36, %v1044_v13 }
 0x16e   :  { %2004 = vpow2.f32 %v837_v56  ;;  %v2846_v59 = vmul.f32 %v1987_v39, %v862_v18  ;;  %v860_v6 = vadd.f32 2.0, %v1989_v63  ;;  %v1048_v19 = vmul.f32 %v1016_v15, %v2644_v41 }
 0x16f   :  { %v1991_v30 = vpop.eup %1990  ;;  %2006 = vrcp.f32 %v923_v25  ;;  %v833_v9 = vmul.f32 1.442695, %v772_v33  ;;  %v1133_v43 = vpack.c.bf16 %v1076_v55, %v1075_v27  ;;  %v1077_v13 = vsel %vm981_vm14, %v2593_v32, %v2773_v5 }
 0x170   :  { %v865_v42 = vadd.f32 2.0, %v1991_v30  ;;  %v926_v8 = vadd.f32 2.0, %v2846_v59  ;;  %v2851_v49 = vmul.f32 %v1989_v63, %v860_v6  ;;  %v1078_v58 = vsel %vm982_vm15, %v2607_v47, %v2806_v24 }
 0x171   :  { %v1993_v4 = vpop.eup %1992  ;;  %2008 = vpow2.f32 %v833_v9  ;;  %1730 = vmatprep.mubr.bf16.mxu1 %v1133_v43  ;;  %v1134_v54 = vpack.c.bf16 %v1078_v58, %v1077_v13  ;;  %vm984_vm1 = vcmp.gt.f32.partialorder %v2644_v41, 20.0  ;;  %v1079_v32 = vsel %vm983_vm0, %v2630_v21, %v1047_v35 }
 0x172   :  { %v2854_v36 = vmul.f32 %v1991_v30, %v865_v42  ;;  %v863_v53 = vadd.f32 2.0, %v1993_v4  ;;  %2010 = vrcp.f32 %v926_v8  ;;  %v924_v11 = vadd.f32 2.0, %v2851_v49 }
 0x173   :  { %v1995_v38 = vpop.eup %1994  ;;  %1731 = vmatmul.mubr.bf16.gmra.mxu1 %v1134_v54  ;;  %v1080_v47 = vsel %vm984_vm1, %v2644_v41, %v1048_v19  ;;  %v1049_v24 = vmul.f32 %v2817_v51, %v2623_v45  ;;  %vm986_vm2 = vcmp.gt.f32.partialorder %v2637_v57, 20.0  ;;  %vm985_vm3 = vcmp.gt.f32.partialorder %v2623_v45, 20.0 }
 0x174   :  { %v929_v31 = vadd.f32 2.0, %v2854_v36  ;;  %v2863_v3 = vmul.f32 %v1993_v4, %v863_v53  ;;  %v866_v14 = vadd.f32 2.0, %v1995_v38  ;;  %2012 = vrcp.f32 %v924_v11 }
 0x175   :  { %v1135_v60 = vpack.c.bf16 %v1080_v47, %v1079_v32  ;;  %v1082_v21 = vsel %vm986_vm2, %v2637_v57, %v1050_v52  ;;  %v1081_v12 = vsel %vm985_vm3, %v2623_v45, %v1049_v24  ;;  %vm990_vm4 = vcmp.gt.f32.partialorder %v2734_v29, 20.0 }
 0x176   :  { %v1997_v5 = vpop.eup %1996  ;;  %v927_v16 = vadd.f32 2.0, %v2863_v3  ;;  %v898_v7 = vmul.f32 %v1995_v38, %v866_v14  ;;  %2014 = vrcp.f32 %v929_v31  ;;  %v1136_v56 = vpack.c.bf16 %v1082_v21, %v1081_v12 }
 0x177   :  { %v864_v1 = vadd.f32 2.0, %v1997_v5  ;;  %1734 = vmatprep.mubr.bf16.mxu1 %v1135_v60  ;;  %vm987_vm5 = vcmp.gt.f32.partialorder %v2711_v34, 20.0  ;;  %vm988_vm6 = vcmp.gt.f32.partialorder %v2744_v40, 20.0  ;;  %vm989_vm7 = vcmp.gt.f32.partialorder %v2696_v0, 20.0 }
 0x178   :  { %v1999_v28 = vpop.eup %1998  ;;  %2016 = vrcp.f32 %v927_v16  ;;  %v930_v17 = vadd.f32 2.0, %v898_v7  ;;  %vm994_vm8 = vcmp.gt.f32.partialorder %v2769_v44, 20.0  ;;  %vm991_vm9 = vcmp.gt.f32.partialorder %v2762_v20, 20.0 }
 0x179   :  { %v2001_v46 = vpop.eup %2000  ;;  %v896_v41 = vmul.f32 %v1997_v5, %v864_v1  ;;  %v869_v62 = vadd.f32 2.0, %v1999_v28  ;;  %vm992_vm10 = vcmp.gt.f32.partialorder %v2785_v50, 20.0  ;;  %vm993_vm11 = vcmp.gt.f32.partialorder %v2750_v10, 20.0 }
 0x17a   :  { %v2003_v51 = vpop.eup %2002  ;;  %2018 = vrcp.f32 %v930_v17  ;;  %v867_v26 = vadd.f32 2.0, %v2001_v46  ;;  %vm998_vm12 = vcmp.gt.f32.partialorder %v2822_v61, 20.0  ;;  %vm995_vm13 = vcmp.gt.f32.partialorder %v2809_v37, 20.0 }
 0x17b   :  { %v2005_v39 = vpop.eup %2004  ;;  %v928_v35 = vadd.f32 2.0, %v896_v41  ;;  %v2875_v15 = vmul.f32 %v1999_v28, %v869_v62  ;;  %1735 = vmatmul.mubr.bf16.gmra.mxu1 %v1136_v56  ;;  %v1021_v6 = vmul.f32 %v2003_v51, %v2824_v2  ;;  %vm996_vm14 = vcmp.gt.f32.partialorder %v2832_v48, 20.0 }
 0x17c   :  { %v2007_v25 = vpop.eup %2006  ;;  %v899_v18 = vmul.f32 %v2001_v46, %v867_v26  ;;  %v870_v33 = vadd.f32 2.0, %v2005_v39  ;;  %vm997_vm15 = vcmp.gt.f32.partialorder %v2797_v22, 20.0 }
 0x17d   :  { %2020 = vrcp.f32 %v928_v35  ;;  %v933_v57 = vadd.f32 2.0, %v2875_v15  ;;  %v1019_v55 = vmul.f32 %v2007_v25, %v2829_v23  ;;  %v1053_v58 = vmul.f32 %v1021_v6, %v2696_v0 }
 0x17e   :  { %v2009_v63 = vpop.eup %2008  ;;  %v931_v52 = vadd.f32 2.0, %v899_v18  ;;  %v902_v27 = vmul.f32 %v2005_v39, %v870_v33 }
 0x17f   :  { %2022 = vrcp.f32 %v933_v57  ;;  %v868_v30 = vadd.f32 2.0, %v2009_v63  ;;  %v2011_v45 = vpop.eup %2010  ;;  %v1051_v4 = vmul.f32 %v1019_v55, %v2711_v34  ;;  %v1085_v5 = vsel %vm989_vm7, %v2696_v0, %v1053_v58  ;;  %v2924_v57 = vld [vmem:[%s2968_s4] ss:$0 sm:$0xff]  ;;  %s2155_s4 = smov [#allocation9]  }
 0x180   :  { %2024 = vrcp.f32 %v931_v52  ;;  %v934_v9 = vadd.f32 2.0, %v902_v27  ;;  %v1022_v19 = vmul.f32 %v2011_v45, %v2846_v59  ;;  %s1575_s24 = sshll.u32 %s2155_s4, 4  ;;  %s1576_s24 = int_to_ptr.vmem [resolvable:$true] %s1575_s24 }
 0x181   :  { %v900_v42 = vmul.f32 %v2009_v63, %v868_v30  ;;  %v2013_v43 = vpop.eup %2012  ;;  %v2031_v30 = vld [vmem:[#allocation3] sm:$0xff]  ;;  %s2122_s25 = scalar_lea.vmem %s1576_s24, 4096  ;;  %p2127_p2 = scmp.lt.s32.totalorder %s1576_s24, %s1576_s24 }
 0x182   :  { %2026 = vrcp.f32 %v934_v9  ;;  %v1054_v8 = vmul.f32 %v1022_v19, %v2734_v29  ;;  %v1020_v53 = vmul.f32 %v2013_v43, %v2851_v49  ;;  %v1083_v49 = vsel %vm987_vm5, %v2711_v34, %v1051_v4  ;;  %v2032_v9 = vld [vmem:[#allocation3 + $0x18] sm:$0xff]  ;;  %v2033_v43 = vld [vmem:[#allocation3 + $0x8] sm:$0xff]  ;;  %p2123_p1 = scmp.ne.s32.totalorder %s1576_s24, %s2122_s25  ;;  %p2128_p3 = scmp.lt.s32.totalorder %s2122_s25, %s2122_s25 }
 0x183   :  { %v932_v13 = vadd.f32 2.0, %v900_v42  ;;  %v2015_v23 = vpop.eup %2014 }
 0x184   :  { %v1052_v2 = vmul.f32 %v1020_v53, %v2744_v40  ;;  %v1086_v59 = vsel %vm990_vm4, %v2734_v29, %v1054_v8  ;;  %v1025_v14 = vmul.f32 %v2015_v23, %v2854_v36  ;;  %v2034_v23 = vld [vmem:[#allocation3 + $0x30] sm:$0xff]  ;;  %p2129_p4 = por %p2128_p3, %p2127_p2 }
 0x185   :  { %v2017_v38 = vpop.eup %2016  ;;  %2028 = vrcp.f32 %v932_v13  ;;  %v1138_v24 = vpack.c.bf16 %v1086_v59, %v1085_v5  ;;  %v2035_v59 = vld [vmem:[#allocation3 + $0x20] sm:$0xff]  ;;  %v2037_v5 = vld [vmem:[#allocation3 + $0x28] sm:$0xff] }
 0x186   :  { %v1023_v54 = vmul.f32 %v2017_v38, %v2863_v3  ;;  %v1084_v31 = vsel %vm988_vm6, %v2744_v40, %v1052_v2  ;;  %v1057_v40 = vmul.f32 %v1025_v14, %v2750_v10  ;;  %p2130_p5 = pnand %p2129_p4, %p2123_p1 }
 0x187   :  { %v2019_v11 = vpop.eup %2018  ;;  %v1137_v47 = vpack.c.bf16 %v1084_v31, %v1083_v49  ;;  %v2036_v31 = vld [vmem:[#allocation3 + $0x38] sm:$0xff] }
 0x188   :  { %v1026_v32 = vmul.f32 %v2019_v11, %v898_v7  ;;  %v1055_v29 = vmul.f32 %v1023_v54, %v2762_v20  ;;  %v1089_v51 = vsel %vm993_vm11, %v2750_v10, %v1057_v40 }
 0x189   :  { %1738 = vmatprep.mubr.bf16.mxu1 %v1137_v47 }
 0x18a   :  { %v2021_v16 = vpop.eup %2020  ;;  %v1058_v60 = vmul.f32 %v1026_v32, %v2769_v44  ;;  %1739 = vmatmul.mubr.bf16.gmra.mxu1 %v1138_v24  ;;  %v1087_v17 = vsel %vm991_vm9, %v2762_v20, %v1055_v29  ;;  %v2038_v29 = vld [vmem:[#allocation3 + $0x50] sm:$0xff] }
 0x18b   :  { %v1024_v3 = vmul.f32 %v2021_v16, %v896_v41 }
 0x18c   :  { %v2023_v34 = vpop.eup %2022  ;;  %v1090_v0 = vsel %vm994_vm8, %v2769_v44, %v1058_v60 }
 0x18d   :  { %v2025_v1 = vpop.eup %2024  ;;  %v1056_v28 = vmul.f32 %v1024_v3, %v2785_v50  ;;  %v1029_v46 = vmul.f32 %v2023_v34, %v2875_v15  ;;  %v1140_v26 = vpack.c.bf16 %v1090_v0, %v1089_v51 }
 0x18e   :  { %v1027_v7 = vmul.f32 %v2025_v1, %v899_v18  ;;  %v2039_v1 = vld [vmem:[#allocation3 + $0x40] sm:$0xff] }
 0x18f   :  { %v2027_v36 = vpop.eup %2026  ;;  %v1088_v21 = vsel %vm992_vm10, %v2785_v50, %v1056_v28  ;;  %v1061_v20 = vmul.f32 %v1029_v46, %v2797_v22 }
 0x190   :  { %v1030_v41 = vmul.f32 %v2027_v36, %v902_v27  ;;  %v1139_v62 = vpack.c.bf16 %v1088_v21, %v1087_v17  ;;  %v1059_v44 = vmul.f32 %v1027_v7, %v2809_v37  ;;  %v2040_v7 = vld [vmem:[#allocation3 + $0x58] sm:$0xff] }
 0x191   :  { %v1093_v18 = vsel %vm997_vm15, %v2797_v22, %v1061_v20  ;;  %v2043_v20 = vld [vmem:[#allocation3 + $0x60] sm:$0xff] }
 0x192   :  { %v2029_v12 = vpop.eup %2028  ;;  %v1062_v39 = vmul.f32 %v1030_v41, %v2822_v61  ;;  %1742 = vmatprep.mubr.bf16.mxu1 %v1139_v62  ;;  %v1091_v15 = vsel %vm995_vm13, %v2809_v37, %v1059_v44  ;;  %v2030_v37 = vld [vmem:[#allocation3 + $0x10] sm:$0xff]  ;;  %v2041_v41 = vld [vmem:[#allocation3 + $0x48] sm:$0xff] }
 0x193   :  { %v1028_v35 = vmul.f32 %v2029_v12, %v900_v42  ;;  %1743 = vmatmul.mubr.bf16.gmra.mxu1 %v1140_v26  ;;  %v2042_v12 = vld [vmem:[#allocation3 + $0x70] sm:$0xff] }
 0x194   :  { %v1094_v10 = vsel %vm998_vm12, %v2822_v61, %v1062_v39 }
 0x195   :  { %v1060_v50 = vmul.f32 %v1028_v35, %v2832_v48  ;;  %v1142_v33 = vpack.c.bf16 %v1094_v10, %v1093_v18 }
 0x197   :  { %v1092_v56 = vsel %vm996_vm14, %v2832_v48, %v1060_v50 }
 0x198   :  { %v1141_v25 = vpack.c.bf16 %v1092_v56, %v1091_v15  ;;  %v2044_v56 = vld [vmem:[#allocation3 + $0x78] sm:$0xff] }
 0x19a   :  { %1746 = vmatprep.mubr.bf16.mxu1 %v1141_v25 }
 0x19b   :  { %1747 = vmatmul.mubr.bf16.gmra.mxu1 %v1142_v33 }
 0x213   :  { %v1720_v63 = vpop.f32.mrf.mxu1 }
 0x214   :  { %v1476_v61 = vadd.f32 %v1720_v63, %v2924_v57  ;;  %v2045_v63 = vld [vmem:[#allocation3 + $0x68] sm:$0xff] }
 0x215   :  { %v1241_v52 = vpop.f32.mrf.mxu1 }
 0x216   :  { %v1508_v27 = vadd.f32 %v2030_v37, %v1476_v61  ;;  %v1474_v48 = vadd.f32 %v2924_v57, %v1241_v52 }
 0x217   :  { %v1721_v55 = vpop.f32.mrf.mxu1 }
 0x218   :  { %1540 = vst [vmem:[#allocation9 + $0x10] sm:$0xff] %v1508_v27  ;;  %v1506_v22 = vadd.f32 %v2031_v30, %v1474_v48  ;;  %v1477_v45 = vadd.f32 %v1721_v55, %v2924_v57  ;;  %v2046_v27 = vld [vmem:[#allocation3 + $0x90] sm:$0xff] }
 0x219   :  { %v1244_v6 = vpop.f32.mrf.mxu1 }
 0x21a   :  { %1538 = vst [vmem:[#allocation9] sm:$0xff] %v1506_v22  ;;  %v1509_v19 = vadd.f32 %v2032_v9, %v1477_v45  ;;  %v1475_v42 = vadd.f32 %v2924_v57, %v1244_v6  ;;  %v2047_v22 = vld [vmem:[#allocation3 + $0x80] sm:$0xff] }
 0x21c   :  { %1541 = vst [vmem:[#allocation9 + $0x18] sm:$0xff] %v1509_v19  ;;  %v1507_v4 = vadd.f32 %v2033_v43, %v1475_v42  ;;  %v2048_v19 = vld [vmem:[#allocation3 + $0x98] sm:$0xff] }
 0x21e   :  { %1539 = vst [vmem:[#allocation9 + $0x8] sm:$0xff] %v1507_v4  ;;  %v2049_v4 = vld [vmem:[#allocation3 + $0x88] sm:$0xff] }
 0x223   :  { %v1724_v8 = vpop.f32.mrf.mxu1 }
 0x224   :  { %v1480_v53 = vadd.f32 %v1724_v8, %v2924_v57 }
 0x225   :  { %v1257_v13 = vpop.f32.mrf.mxu1 }
 0x226   :  { %v1512_v58 = vadd.f32 %v2034_v23, %v1480_v53  ;;  %v1478_v38 = vadd.f32 %v2924_v57, %v1257_v13 }
 0x227   :  { %v1725_v2 = vpop.f32.mrf.mxu1 }
 0x228   :  { %1544 = vst [vmem:[#allocation9 + $0x30] sm:$0xff] %v1512_v58  ;;  %v1510_v11 = vadd.f32 %v2035_v59, %v1478_v38  ;;  %v1481_v54 = vadd.f32 %v1725_v2, %v2924_v57  ;;  %v2050_v58 = vld [vmem:[#allocation3 + $0xb0] sm:$0xff] }
 0x229   :  { %v1260_v49 = vpop.f32.mrf.mxu1 }
 0x22a   :  { %1542 = vst [vmem:[#allocation9 + $0x20] sm:$0xff] %v1510_v11  ;;  %v1513_v14 = vadd.f32 %v2036_v31, %v1481_v54  ;;  %v1479_v32 = vadd.f32 %v2924_v57, %v1260_v49  ;;  %v2051_v11 = vld [vmem:[#allocation3 + $0xa0] sm:$0xff] }
 0x22b   :  { %v1728_v47 = vpop.f32.mrf.mxu1 }
 0x22c   :  { %1545 = vst [vmem:[#allocation9 + $0x38] sm:$0xff] %v1513_v14  ;;  %v1511_v24 = vadd.f32 %v2037_v5, %v1479_v32  ;;  %v1484_v16 = vadd.f32 %v1728_v47, %v2924_v57  ;;  %v2052_v14 = vld [vmem:[#allocation3 + $0xb8] sm:$0xff] }
 0x22d   :  { %v1273_v60 = vpop.f32.mrf.mxu1 }
 0x22e   :  { %1543 = vst [vmem:[#allocation9 + $0x28] sm:$0xff] %v1511_v24  ;;  %v1516_v3 = vadd.f32 %v2038_v29, %v1484_v16  ;;  %v1482_v34 = vadd.f32 %v2924_v57, %v1273_v60  ;;  %v2053_v24 = vld [vmem:[#allocation3 + $0xa8] sm:$0xff] }
 0x22f   :  { %v1729_v40 = vpop.f32.mrf.mxu1 }
 0x230   :  { %1548 = vst [vmem:[#allocation9 + $0x50] sm:$0xff] %v1516_v3  ;;  %v1514_v28 = vadd.f32 %v2039_v1, %v1482_v34  ;;  %v1485_v0 = vadd.f32 %v1729_v40, %v2924_v57  ;;  %v2054_v3 = vld [vmem:[#allocation3 + $0xd0] sm:$0xff] }
 0x231   :  { %v1276_v36 = vpop.f32.mrf.mxu1 }
 0x232   :  { %1546 = vst [vmem:[#allocation9 + $0x40] sm:$0xff] %v1514_v28  ;;  %v1517_v17 = vadd.f32 %v2040_v7, %v1485_v0  ;;  %v1483_v21 = vadd.f32 %v2924_v57, %v1276_v36  ;;  %v2055_v28 = vld [vmem:[#allocation3 + $0xc0] sm:$0xff] }
 0x233   :  { %v1732_v46 = vpop.f32.mrf.mxu1 }
 0x234   :  { %1549 = vst [vmem:[#allocation9 + $0x58] sm:$0xff] %v1517_v17  ;;  %v1515_v62 = vadd.f32 %v2041_v41, %v1483_v21  ;;  %v1488_v51 = vadd.f32 %v1732_v46, %v2924_v57  ;;  %v2056_v17 = vld [vmem:[#allocation3 + $0xd8] sm:$0xff] }
 0x235   :  { %v1289_v26 = vpop.f32.mrf.mxu1 }
 0x236   :  { %1547 = vst [vmem:[#allocation9 + $0x48] sm:$0xff] %v1515_v62  ;;  %v1520_v39 = vadd.f32 %v2042_v12, %v1488_v51  ;;  %v1486_v44 = vadd.f32 %v2924_v57, %v1289_v26  ;;  %v2057_v62 = vld [vmem:[#allocation3 + $0xc8] sm:$0xff] }
 0x237   :  { %v1733_v35 = vpop.f32.mrf.mxu1 }
 0x238   :  { %1552 = vst [vmem:[#allocation9 + $0x70] sm:$0xff] %v1520_v39  ;;  %v1518_v50 = vadd.f32 %v2043_v20, %v1486_v44  ;;  %v1489_v10 = vadd.f32 %v1733_v35, %v2924_v57  ;;  %v2058_v39 = vld [vmem:[#allocation3 + $0xf0] sm:$0xff] }
 0x239   :  { %v1292_v15 = vpop.f32.mrf.mxu1 }
 0x23a   :  { %1550 = vst [vmem:[#allocation9 + $0x60] sm:$0xff] %v1518_v50  ;;  %v1521_v25 = vadd.f32 %v2044_v56, %v1489_v10  ;;  %v1487_v18 = vadd.f32 %v2924_v57, %v1292_v15  ;;  %v2059_v50 = vld [vmem:[#allocation3 + $0xe0] sm:$0xff] }
 0x23b   :  { %v1736_v33 = vpop.f32.mrf.mxu1 }
 0x23c   :  { %1553 = vst [vmem:[#allocation9 + $0x78] sm:$0xff] %v1521_v25  ;;  %v1519_v61 = vadd.f32 %v2045_v63, %v1487_v18  ;;  %v1492_v52 = vadd.f32 %v1736_v33, %v2924_v57  ;;  %v2060_v25 = vld [vmem:[#allocation3 + $0xf8] sm:$0xff]  ;;  %v2061_v63 = vld [vmem:[#allocation3 + $0xe8] sm:$0xff] }
 0x23d   :  { %v1305_v37 = vpop.f32.mrf.mxu1 }
 0x23e   :  { %1551 = vst [vmem:[#allocation9 + $0x68] sm:$0xff] %v1519_v61  ;;  %v1524_v48 = vadd.f32 %v2046_v27, %v1492_v52  ;;  %v1490_v55 = vadd.f32 %v2924_v57, %v1305_v37 }
 0x23f   :  { %v1737_v30 = vpop.f32.mrf.mxu1 }
 0x240   :  { %1556 = vst [vmem:[#allocation9 + $0x90] sm:$0xff] %v1524_v48  ;;  %v1522_v45 = vadd.f32 %v2047_v22, %v1490_v55  ;;  %v1493_v6 = vadd.f32 %v1737_v30, %v2924_v57 }
 0x241   :  { %v1308_v9 = vpop.f32.mrf.mxu1 }
 0x242   :  { %1554 = vst [vmem:[#allocation9 + $0x80] sm:$0xff] %v1522_v45  ;;  %v1525_v42 = vadd.f32 %v2048_v19, %v1493_v6  ;;  %v1491_v43 = vadd.f32 %v2924_v57, %v1308_v9 }
 0x244   :  { %1557 = vst [vmem:[#allocation9 + $0x98] sm:$0xff] %v1525_v42  ;;  %v1523_v8 = vadd.f32 %v2049_v4, %v1491_v43 }
 0x246   :  { %1555 = vst [vmem:[#allocation9 + $0x88] sm:$0xff] %v1523_v8 }
 0x24a   :  { %v1740_v53 = vpop.f32.mrf.mxu1 }
 0x24b   :  { %v1496_v13 = vadd.f32 %v1740_v53, %v2924_v57 }
 0x24c   :  { %v1321_v23 = vpop.f32.mrf.mxu1 }
 0x24d   :  { %v1528_v38 = vadd.f32 %v2050_v58, %v1496_v13  ;;  %v1494_v2 = vadd.f32 %v2924_v57, %v1321_v23 }
 0x24e   :  { %v1741_v59 = vpop.f32.mrf.mxu1 }
 0x24f   :  { %1560 = vst [vmem:[#allocation9 + $0xb0] sm:$0xff] %v1528_v38  ;;  %v1526_v54 = vadd.f32 %v2051_v11, %v1494_v2  ;;  %v1497_v49 = vadd.f32 %v1741_v59, %v2924_v57 }
 0x250   :  { %v1324_v31 = vpop.f32.mrf.mxu1 }
 0x251   :  { %1558 = vst [vmem:[#allocation9 + $0xa0] sm:$0xff] %v1526_v54  ;;  %v1529_v32 = vadd.f32 %v2052_v14, %v1497_v49  ;;  %v1495_v47 = vadd.f32 %v2924_v57, %v1324_v31 }
 0x253   :  { %v1744_v5 = vpop.f32.mrf.mxu1  ;;  %1561 = vst [vmem:[#allocation9 + $0xb8] sm:$0xff] %v1529_v32  ;;  %v1527_v16 = vadd.f32 %v2053_v24, %v1495_v47 }
 0x254   :  { %v1500_v60 = vadd.f32 %v1744_v5, %v2924_v57 }
 0x255   :  { %v1337_v29 = vpop.f32.mrf.mxu1  ;;  %1559 = vst [vmem:[#allocation9 + $0xa8] sm:$0xff] %v1527_v16 }
 0x256   :  { %v1532_v34 = vadd.f32 %v2054_v3, %v1500_v60  ;;  %v1498_v40 = vadd.f32 %v2924_v57, %v1337_v29 }
 0x257   :  { %v1745_v1 = vpop.f32.mrf.mxu1 }
 0x258   :  { %1564 = vst [vmem:[#allocation9 + $0xd0] sm:$0xff] %v1532_v34  ;;  %v1530_v0 = vadd.f32 %v2055_v28, %v1498_v40  ;;  %v1501_v36 = vadd.f32 %v1745_v1, %v2924_v57 }
 0x259   :  { %v1340_v7 = vpop.f32.mrf.mxu1 }
 0x25a   :  { %1562 = vst [vmem:[#allocation9 + $0xc0] sm:$0xff] %v1530_v0  ;;  %v1533_v21 = vadd.f32 %v2056_v17, %v1501_v36  ;;  %v1499_v46 = vadd.f32 %v2924_v57, %v1340_v7 }
 0x25b   :  { %v1748_v41 = vpop.f32.mrf.mxu1 }
 0x25c   :  { %1565 = vst [vmem:[#allocation9 + $0xd8] sm:$0xff] %v1533_v21  ;;  %v1531_v51 = vadd.f32 %v2057_v62, %v1499_v46  ;;  %v1504_v26 = vadd.f32 %v1748_v41, %v2924_v57 }
 0x25d   :  { %v1353_v12 = vpop.f32.mrf.mxu1 }
 0x25e   :  { %1563 = vst [vmem:[#allocation9 + $0xc8] sm:$0xff] %v1531_v51  ;;  %v1536_v44 = vadd.f32 %v2058_v39, %v1504_v26  ;;  %v1502_v35 = vadd.f32 %v2924_v57, %v1353_v12 }
 0x25f   :  { %v1749_v20 = vpop.f32.mrf.mxu1 }
 0x260   :  { %1568 = vst [vmem:[#allocation9 + $0xf0] sm:$0xff] %v1536_v44  ;;  %v1534_v10 = vadd.f32 %v2059_v50, %v1502_v35  ;;  %v1505_v15 = vadd.f32 %v1749_v20, %v2924_v57 }
 0x261   :  { %v1356_v56 = vpop.f32.mrf.mxu1 }
 0x262   :  { %1566 = vst [vmem:[#allocation9 + $0xe0] sm:$0xff] %v1534_v10  ;;  %v1537_v18 = vadd.f32 %v2060_v25, %v1505_v15  ;;  %v1503_v33 = vadd.f32 %v2924_v57, %v1356_v56 }
 0x264   :  { %1569 = vst [vmem:[#allocation9 + $0xf8] sm:$0xff] %v1537_v18  ;;  %v1535_v61 = vadd.f32 %v2061_v63, %v1503_v33 }
 0x266   :  { %1567 = vst [vmem:[#allocation9 + $0xe8] sm:$0xff] %v1535_v61 }
 0x267   :  { %2133 = shalt.err (!%p2130_p5)
}
 0x268   :  { %1581 = dma.vmem_to_hbm [thread:$0]  %s1576_s24, 4096, %s2973_s9, [#allocation5], %s2152_s15, %s2152_s15, %s2153_s16  }
 0x269   :  { %2146 = dma.done.wait [#allocation5], 4096  }
 0x26a   :  { %2147 = vsyncadd [#allocation5], 4294963200 }
 0x26b   :  { %1585 = vsyncpa [#allocation4], 1 }
 0x26c   :  { %1586 = vsyncpa [#allocation7], 1 }
 0x26d   :  { %1587 = vsyncpa [#allocation5], 1 }

// kernel: tpu_custom_call.1
= control target key start
LH: loop header
LB: loop body
LE: loop exit
PB: predicated region body
PF: predicated region fallthrough
CT: control target
= control target key end

     0   :  { %14 = vsyncpa [#allocation4], 0  ;;  %s2964_s0 = inlined_call_operand.hbm [shape: f32[256,128], index: 0, kind: input, shape index: {}]   ;;  %s2965_s1 = inlined_call_operand.hbm [shape: bf16[128,128], index: 1, kind: input, shape index: {}]   ;;  %s2966_s2 = inlined_call_operand.vmem [shape: f32[1,128], index: 2, kind: input, shape index: {}]   ;;  %s2967_s3 = inlined_call_operand.hbm [shape: bf16[128,128], index: 3, kind: input, shape index: {}]   ;;  %s2968_s4 = inlined_call_operand.vmem [shape: f32[1,128], index: 4, kind: input, shape index: {}]   ;;  %s2969_s5 = inlined_call_operand.vmem [shape: f32[1,128], index: 5, kind: input, shape index: {}]   ;;  %s2970_s6 = inlined_call_operand.vmem [shape: f32[1,128], index: 6, kind: input, shape index: {}]   ;;  %s2971_s7 = inlined_call_operand.vmem [shape: f32[1,128], index: 7, kind: input, shape index: {}]   ;;  %s2972_s8 = inlined_call_operand.vmem [shape: f32[1,128], index: 8, kind: input, shape index: {}]   ;;  %s2973_s9 = inlined_call_operand.hbm [shape: f32[256,128], index: 9, kind: output, shape index: {}]  }
   0x1   :  { %15 = vsyncpa [#allocation7], 0 }
   0x2   :  { %16 = vsyncpa [#allocation5], 0  ;;  %s2148_s30 = smov [#allocation6]  }
   0x3   :  { %s34_s10 = sshll.u32 %s2148_s30, 4  ;;  %s35_s10 = int_to_ptr.vmem [resolvable:$true] %s34_s10 }
   0x4   :  { %s2070_s11 = scalar_lea.vmem %s35_s10, 1024  ;;  %p2075_p1 = scmp.lt.s32.totalorder %s35_s10, %s35_s10 }
   0x5   :  { %p2071_p0 = scmp.ne.s32.totalorder %s35_s10, %s2070_s11  ;;  %p2076_p2 = scmp.lt.s32.totalorder %s2070_s11, %s2070_s11 }
   0x7   :  { %p2077_p3 = por %p2076_p2, %p2075_p1 }
   0x9   :  { %p2078_p4 = pnand %p2077_p3, %p2071_p0 }
   0xb   :  { %2081 = shalt.err (!%p2078_p4)
}
   0xc   :  { %s2149_s5 = smov 64   ;;  %s2150_s6 = smov 4  }
   0xd   :  { %40 = dma.hbm_to_vmem [thread:$0]  %s2965_s1, 1024, %s35_s10, [#allocation7], %s2149_s5, %s2149_s5, %s2150_s6  }
   0xe   :  { %s2151_s12 = smov [#allocation3]  }
   0xf   :  { %s22_s13 = sshll.u32 %s2151_s12, 4  ;;  %s23_s13 = int_to_ptr.vmem [resolvable:$true] %s22_s13 }
  0x10   :  { %s2090_s14 = scalar_lea.vmem %s23_s13, 4096  ;;  %p2095_p6 = scmp.lt.s32.totalorder %s23_s13, %s23_s13 }
  0x11   :  { %p2091_p5 = scmp.ne.s32.totalorder %s23_s13, %s2090_s14  ;;  %p2096_p7 = scmp.lt.s32.totalorder %s2090_s14, %s2090_s14 }
  0x13   :  { %p2097_p8 = por %p2096_p7, %p2095_p6 }
  0x15   :  { %p2098_p9 = pnand %p2097_p8, %p2091_p5 }
  0x17   :  { %2101 = shalt.err (!%p2098_p9)
}
  0x18   :  { %s2152_s15 = smov 128   ;;  %s2153_s16 = smov 8  }
  0x19   :  { %28 = dma.hbm_to_vmem [thread:$0]  %s2964_s0, 4096, %s23_s13, [#allocation4], %s2152_s15, %s2152_s15, %s2153_s16  }
  0x1a   :  { %s2154_s1 = smov [#allocation8]  }
  0x1b   :  { %s48_s19 = sshll.u32 %s2154_s1, 4  ;;  %s49_s19 = int_to_ptr.vmem [resolvable:$true] %s48_s19 }
  0x1c   :  { %s2110_s20 = scalar_lea.vmem %s49_s19, 1024  ;;  %p2115_p11 = scmp.lt.s32.totalorder %s49_s19, %s49_s19 }
  0x1d   :  { %p2111_p10 = scmp.ne.s32.totalorder %s49_s19, %s2110_s20  ;;  %p2116_p12 = scmp.lt.s32.totalorder %s2110_s20, %s2110_s20 }
  0x1f   :  { %p2117_p13 = por %p2116_p12, %p2115_p11 }
  0x21   :  { %p2118_p0 = pnand %p2117_p13, %p2111_p10 }
  0x23   :  { %2121 = shalt.err (!%p2118_p0)
}
  0x24   :  { %54 = dma.hbm_to_vmem [thread:$0]  %s2967_s3, 1024, %s49_s19, [#allocation7], %s2149_s5, %s2149_s5, %s2150_s6  }
  0x25   :  { %2142 = dma.done.wait [#allocation4], 4096  }
  0x26   :  { %2143 = vsyncadd [#allocation4], 4294963200 }
  0x27   :  { %2144 = dma.done.wait [#allocation7], 2048  }
  0x28   :  { %2145 = vsyncadd [#allocation7], 4294965248  ;;  %v1758_v0 = vld [vmem:[#allocation6 + $0x38] sm:$0xff]   ;;  %v1759_v1 = vld [vmem:[#allocation6 + $0x30] sm:$0xff]  }
  0x29   :  { %1654 = vmatprep.subr.bf16.mxu0 %v1758_v0  ;;  %v1760_v2 = vld [vmem:[#allocation6 + $0x28] sm:$0xff]   ;;  %v1761_v3 = vld [vmem:[#allocation6 + $0x20] sm:$0xff]   ;;  %v2222_v6 = vld [vmem:[#allocation3 + $0x10] sm:$0xff] }
  0x2a   :  { %1655 = vmatpush3.bf16.msra.mxu0 %v1758_v0  ;;  %v2218_v4 = vld [vmem:[#allocation3] sm:$0xff]  ;;  %v2220_v5 = vld [vmem:[#allocation3 + $0x8] sm:$0xff]  ;;  %v2226_v9 = vld [vmem:[#allocation3 + $0x18] sm:$0xff]  ;;  %v145_v11 = vmin.f32 %v2222_v6, 20.0  ;;  %vm369_vm2 = vcmp.gt.f32.partialorder %v2222_v6, 20.0 }
  0x2b   :  { %1656 = vmatprep.subr.bf16.mxu0 %v1759_v1  ;;  %v143_v7 = vmin.f32 %v2218_v4, 20.0  ;;  %v144_v8 = vmin.f32 %v2220_v5, 20.0  ;;  %v2228_v10 = vld [vmem:[#allocation3 + $0x20] sm:$0xff]  ;;  %v146_v12 = vmin.f32 %v2226_v9, 20.0  ;;  %v2232_v13 = vld [vmem:[#allocation3 + $0x28] sm:$0xff]  ;;  %v2234_v14 = vld [vmem:[#allocation3 + $0x30] sm:$0xff] }
  0x2c   :  { %v147_v17 = vmin.f32 %v2228_v10, 20.0  ;;  %v148_v18 = vmin.f32 %v2232_v13, 20.0  ;;  %v1762_v19 = vld [vmem:[#allocation6 + $0x18] sm:$0xff]   ;;  %v179_v20 = vmul.f32 1.442695, %v145_v11  ;;  %v149_v24 = vmin.f32 %v2234_v14, 20.0 }
  0x2d   :  { %v175_v15 = vmul.f32 1.442695, %v143_v7  ;;  %v177_v16 = vmul.f32 1.442695, %v144_v8  ;;  %v181_v21 = vmul.f32 1.442695, %v146_v12 }
  0x2e   :  { %1657 = vmatpush3.bf16.msra.mxu0 %v1759_v1  ;;  %v183_v22 = vmul.f32 1.442695, %v147_v17  ;;  %v2238_v23 = vld [vmem:[#allocation3 + $0x38] sm:$0xff]  ;;  %v185_v25 = vmul.f32 1.442695, %v148_v18  ;;  %v2242_v27 = vld [vmem:[#allocation3 + $0x40] sm:$0xff] }
  0x2f   :  { %1658 = vmatprep.subr.bf16.mxu0 %v1760_v2  ;;  %1774 = vpow2.f32 %v175_v15  ;;  %v150_v26 = vmin.f32 %v2238_v23, 20.0  ;;  %v2244_v28 = vld [vmem:[#allocation3 + $0x48] sm:$0xff]  ;;  %v2246_v29 = vld [vmem:[#allocation3 + $0x50] sm:$0xff]  ;;  %v187_v30 = vmul.f32 1.442695, %v149_v24  ;;  %v151_v31 = vmin.f32 %v2242_v27, 20.0 }
  0x30   :  { %1776 = vpow2.f32 %v177_v16  ;;  %v152_v32 = vmin.f32 %v2244_v28, 20.0  ;;  %v2250_v33 = vld [vmem:[#allocation3 + $0x58] sm:$0xff]  ;;  %v1763_v34 = vld [vmem:[#allocation6 + $0x10] sm:$0xff]   ;;  %v2252_v36 = vld [vmem:[#allocation3 + $0x60] sm:$0xff]  ;;  %v153_v39 = vmin.f32 %v2246_v29, 20.0  ;;  %vm367_vm0 = vcmp.gt.f32.partialorder %v2218_v4, 20.0 }
  0x31   :  { %1778 = vpow2.f32 %v179_v20  ;;  %v189_v35 = vmul.f32 1.442695, %v150_v26  ;;  %v2254_v37 = vld [vmem:[#allocation3 + $0x68] sm:$0xff]  ;;  %v191_v38 = vmul.f32 1.442695, %v151_v31  ;;  %v154_v41 = vmin.f32 %v2250_v33, 20.0 }
  0x32   :  { %1659 = vmatpush3.bf16.msra.mxu0 %v1760_v2  ;;  %1780 = vpow2.f32 %v181_v21  ;;  %v193_v40 = vmul.f32 1.442695, %v152_v32  ;;  %v2258_v42 = vld [vmem:[#allocation3 + $0x70] sm:$0xff]  ;;  %v195_v43 = vmul.f32 1.442695, %v153_v39  ;;  %v155_v44 = vmin.f32 %v2252_v36, 20.0 }
  0x33   :  { %1660 = vmatprep.subr.bf16.mxu0 %v1761_v3  ;;  %1782 = vpow2.f32 %v183_v22  ;;  %v156_v45 = vmin.f32 %v2254_v37, 20.0  ;;  %v2262_v46 = vld [vmem:[#allocation3 + $0x78] sm:$0xff]  ;;  %v1764_v47 = vld [vmem:[#allocation6 + $0x8] sm:$0xff]   ;;  %v197_v48 = vmul.f32 1.442695, %v154_v41  ;;  %v2264_v49 = vld [vmem:[#allocation3 + $0x80] sm:$0xff] }
  0x34   :  { %1784 = vpow2.f32 %v185_v25  ;;  %v2266_v50 = vld [vmem:[#allocation3 + $0x88] sm:$0xff]  ;;  %v199_v51 = vmul.f32 1.442695, %v155_v44  ;;  %v157_v52 = vmin.f32 %v2258_v42, 20.0  ;;  %v158_v54 = vmin.f32 %v2262_v46, 20.0  ;;  %v2270_v55 = vld [vmem:[#allocation3 + $0x90] sm:$0xff] }
  0x35   :  { %1786 = vpow2.f32 %v187_v30  ;;  %v201_v53 = vmul.f32 1.442695, %v156_v45  ;;  %v159_v57 = vmin.f32 %v2264_v49, 20.0  ;;  %v160_v58 = vmin.f32 %v2266_v50, 20.0  ;;  %v2274_v59 = vld [vmem:[#allocation3 + $0x98] sm:$0xff]  ;;  %v1765_v60 = vld [vmem:[#allocation6] sm:$0xff]  }
  0x36   :  { %1661 = vmatpush3.bf16.msra.mxu0 %v1761_v3  ;;  %1788 = vpow2.f32 %v189_v35  ;;  %v203_v56 = vmul.f32 1.442695, %v157_v52  ;;  %v205_v61 = vmul.f32 1.442695, %v158_v54  ;;  %v2276_v62 = vld [vmem:[#allocation3 + $0xa0] sm:$0xff]  ;;  %v161_v0 = vmin.f32 %v2270_v55, 20.0 }
  0x37   :  { %1662 = vmatprep.subr.bf16.mxu0 %v1762_v19  ;;  %1790 = vpow2.f32 %v191_v38  ;;  %v207_v63 = vmul.f32 1.442695, %v159_v57  ;;  %v2279_v1 = vld [vmem:[#allocation3 + $0xa8] sm:$0xff]  ;;  %v209_v3 = vmul.f32 1.442695, %v160_v58  ;;  %v162_v7 = vmin.f32 %v2274_v59, 20.0 }
  0x38   :  { %1792 = vpow2.f32 %v193_v40  ;;  %v211_v12 = vmul.f32 1.442695, %v161_v0  ;;  %v163_v15 = vmin.f32 %v2276_v62, 20.0  ;;  %vm368_vm1 = vcmp.gt.f32.partialorder %v2220_v5, 20.0 }
  0x39   :  { %1794 = vpow2.f32 %v195_v43  ;;  %v213_v18 = vmul.f32 1.442695, %v162_v7  ;;  %vm370_vm3 = vcmp.gt.f32.partialorder %v2226_v9, 20.0  ;;  %vm371_vm4 = vcmp.gt.f32.partialorder %v2228_v10, 20.0 }
  0x3a   :  { %1663 = vmatpush3.bf16.msra.mxu0 %v1762_v19  ;;  %1796 = vpow2.f32 %v197_v48  ;;  %v164_v19 = vmin.f32 %v2279_v1, 20.0  ;;  %v2286_v24 = vmul.f32 1.442695, %v163_v15  ;;  %vm372_vm5 = vcmp.gt.f32.partialorder %v2232_v13, 20.0 }
  0x3b   :  { %1664 = vmatprep.subr.bf16.mxu0 %v1763_v34  ;;  %1798 = vpow2.f32 %v199_v51  ;;  %vm373_vm6 = vcmp.gt.f32.partialorder %v2234_v14, 20.0  ;;  %vm374_vm7 = vcmp.gt.f32.partialorder %v2238_v23, 20.0  ;;  %vm375_vm8 = vcmp.gt.f32.partialorder %v2242_v27, 20.0 }
  0x3c   :  { %v1775_v2 = vpop.eup %1774  ;;  %1800 = vpow2.f32 %v201_v53  ;;  %v2290_v31 = vmul.f32 1.442695, %v164_v19  ;;  %vm376_vm9 = vcmp.gt.f32.partialorder %v2244_v28, 20.0  ;;  %vm377_vm10 = vcmp.gt.f32.partialorder %v2246_v29, 20.0 }
  0x3d   :  { %v1777_v8 = vpop.eup %1776  ;;  %v239_v11 = vadd.f32 2.0, %v1775_v2  ;;  %1802 = vpow2.f32 %v203_v56  ;;  %vm378_vm11 = vcmp.gt.f32.partialorder %v2250_v33, 20.0  ;;  %vm379_vm12 = vcmp.gt.f32.partialorder %v2252_v36, 20.0 }
  0x3e   :  { %1665 = vmatpush3.bf16.msra.mxu0 %v1763_v34  ;;  %v1779_v16 = vpop.eup %1778  ;;  %v240_v17 = vadd.f32 2.0, %v1777_v8  ;;  %1804 = vpow2.f32 %v205_v61  ;;  %vm380_vm13 = vcmp.gt.f32.partialorder %v2254_v37, 20.0  ;;  %vm381_vm14 = vcmp.gt.f32.partialorder %v2258_v42, 20.0 }
  0x3f   :  { %1666 = vmatprep.subr.bf16.mxu0 %v1764_v47  ;;  %v1781_v20 = vpop.eup %1780  ;;  %v2284_v21 = vmul.f32 %v1775_v2, %v239_v11  ;;  %v241_v22 = vadd.f32 2.0, %v1779_v16  ;;  %1806 = vpow2.f32 %v207_v63  ;;  %vm382_vm15 = vcmp.gt.f32.partialorder %v2262_v46, 20.0 }
  0x40   :  { %v1783_v25 = vpop.eup %1782  ;;  %v2288_v26 = vmul.f32 %v1777_v8, %v240_v17  ;;  %v242_v30 = vadd.f32 2.0, %v1781_v20  ;;  %1808 = vpow2.f32 %v209_v3 }
  0x41   :  { %v1785_v32 = vpop.eup %1784  ;;  %v303_v34 = vadd.f32 2.0, %v2284_v21  ;;  %v2293_v35 = vmul.f32 %v1779_v16, %v241_v22  ;;  %v243_v38 = vadd.f32 2.0, %v1783_v25  ;;  %1810 = vpow2.f32 %v211_v12 }
  0x42   :  { %1667 = vmatpush3.bf16.msra.mxu0 %v1764_v47  ;;  %v1787_v39 = vpop.eup %1786  ;;  %v304_v40 = vadd.f32 2.0, %v2288_v26  ;;  %v2296_v41 = vmul.f32 %v1781_v20, %v242_v30  ;;  %v244_v43 = vadd.f32 2.0, %v1785_v32  ;;  %1812 = vpow2.f32 %v213_v18 }
  0x43   :  { %1668 = vmatprep.subr.bf16.mxu0 %v1765_v60  ;;  %v1789_v44 = vpop.eup %1788  ;;  %1814 = vrcp.f32 %v303_v34  ;;  %v305_v45 = vadd.f32 2.0, %v2293_v35  ;;  %v2299_v47 = vmul.f32 %v1783_v25, %v243_v38  ;;  %v245_v48 = vadd.f32 2.0, %v1787_v39 }
  0x44   :  { %v1791_v51 = vpop.eup %1790  ;;  %1816 = vrcp.f32 %v304_v40  ;;  %v306_v52 = vadd.f32 2.0, %v2296_v41  ;;  %v2302_v53 = vmul.f32 %v1785_v32, %v244_v43  ;;  %v246_v54 = vadd.f32 2.0, %v1789_v44 }
  0x45   :  { %v1793_v56 = vpop.eup %1792  ;;  %1818 = vrcp.f32 %v305_v45  ;;  %v307_v57 = vadd.f32 2.0, %v2299_v47  ;;  %v2305_v58 = vmul.f32 %v1787_v39, %v245_v48 }
  0x46   :  { %1669 = vmatpush3.bf16.msra.mxu0 %v1765_v60  ;;  %v247_v60 = vadd.f32 2.0, %v1791_v51  ;;  %v1795_v61 = vpop.eup %1794  ;;  %1820 = vrcp.f32 %v306_v52  ;;  %v308_v63 = vadd.f32 2.0, %v2302_v53  ;;  %v2308_v0 = vmul.f32 %v1789_v44, %v246_v54 }
  0x47   :  { %v248_v2 = vadd.f32 2.0, %v1793_v56  ;;  %v1797_v3 = vpop.eup %1796  ;;  %1822 = vrcp.f32 %v307_v57  ;;  %v309_v7 = vadd.f32 2.0, %v2305_v58  ;;  %v249_v11 = vadd.f32 2.0, %v1795_v61 }
  0x48   :  { %v2311_v8 = vmul.f32 %v1791_v51, %v247_v60  ;;  %v1799_v12 = vpop.eup %1798  ;;  %1824 = vrcp.f32 %v308_v63  ;;  %v310_v15 = vadd.f32 2.0, %v2308_v0  ;;  %v250_v17 = vadd.f32 2.0, %v1797_v3 }
  0x49   :  { %v2314_v16 = vmul.f32 %v1793_v56, %v248_v2  ;;  %v1801_v18 = vpop.eup %1800  ;;  %1826 = vrcp.f32 %v309_v7  ;;  %v2317_v20 = vmul.f32 %v1795_v61, %v249_v11  ;;  %v251_v22 = vadd.f32 2.0, %v1799_v12 }
  0x4a   :  { %v311_v19 = vadd.f32 2.0, %v2311_v8  ;;  %v1803_v25 = vpop.eup %1802  ;;  %1828 = vrcp.f32 %v310_v15  ;;  %v2321_v32 = vmul.f32 %v1797_v3, %v250_v17  ;;  %v252_v34 = vadd.f32 2.0, %v1801_v18 }
  0x4b   :  { %v312_v30 = vadd.f32 2.0, %v2314_v16  ;;  %v1805_v38 = vpop.eup %1804  ;;  %v313_v39 = vadd.f32 2.0, %v2317_v20  ;;  %v2325_v40 = vmul.f32 %v1799_v12, %v251_v22  ;;  %v253_v43 = vadd.f32 2.0, %v1803_v25 }
  0x4c   :  { %1830 = vrcp.f32 %v311_v19  ;;  %v1807_v44 = vpop.eup %1806  ;;  %v314_v45 = vadd.f32 2.0, %v2321_v32  ;;  %v2329_v48 = vmul.f32 %v1801_v18, %v252_v34  ;;  %v254_v51 = vadd.f32 2.0, %v1805_v38 }
  0x4d   :  { %1832 = vrcp.f32 %v312_v30  ;;  %v1809_v52 = vpop.eup %1808  ;;  %v315_v54 = vadd.f32 2.0, %v2325_v40  ;;  %v2333_v56 = vmul.f32 %v1803_v25, %v253_v43  ;;  %v255_v57 = vadd.f32 2.0, %v1807_v44 }
  0x4e   :  { %1834 = vrcp.f32 %v313_v39  ;;  %v1811_v60 = vpop.eup %1810  ;;  %v316_v61 = vadd.f32 2.0, %v2329_v48  ;;  %v2337_v63 = vmul.f32 %v1805_v38, %v254_v51  ;;  %v256_v2 = vadd.f32 2.0, %v1809_v52 }
  0x4f   :  { %1836 = vrcp.f32 %v314_v45  ;;  %v1813_v3 = vpop.eup %1812  ;;  %v317_v7 = vadd.f32 2.0, %v2333_v56  ;;  %v2341_v11 = vmul.f32 %v1807_v44, %v255_v57  ;;  %v257_v12 = vadd.f32 2.0, %v1811_v60 }
  0x50   :  { %1838 = vrcp.f32 %v315_v54  ;;  %v1815_v15 = vpop.eup %1814  ;;  %v318_v17 = vadd.f32 2.0, %v2337_v63  ;;  %v2344_v18 = vmul.f32 %v1809_v52, %v256_v2  ;;  %v258_v19 = vadd.f32 2.0, %v1813_v3 }
  0x51   :  { %1840 = vrcp.f32 %v316_v61  ;;  %v1817_v22 = vpop.eup %1816  ;;  %v399_v25 = vmul.f32 %v1815_v15, %v2284_v21  ;;  %v319_v30 = vadd.f32 2.0, %v2341_v11  ;;  %v2350_v34 = vmul.f32 %v1811_v60, %v257_v12 }
  0x52   :  { %1842 = vrcp.f32 %v317_v7  ;;  %v1819_v38 = vpop.eup %1818  ;;  %v400_v39 = vmul.f32 %v1817_v22, %v2288_v26  ;;  %v320_v43 = vadd.f32 2.0, %v2344_v18  ;;  %v2355_v44 = vmul.f32 %v1813_v3, %v258_v19 }
  0x53   :  { %1844 = vrcp.f32 %v318_v17  ;;  %v1821_v21 = vpop.eup %1820  ;;  %v431_v45 = vmul.f32 %v399_v25, %v2218_v4  ;;  %v401_v51 = vmul.f32 %v1819_v38, %v2293_v35  ;;  %v321_v52 = vadd.f32 2.0, %v2350_v34 }
  0x54   :  { %1846 = vrcp.f32 %v319_v30  ;;  %v1823_v54 = vpop.eup %1822  ;;  %v432_v57 = vmul.f32 %v400_v39, %v2220_v5  ;;  %v402_v26 = vmul.f32 %v1821_v21, %v2296_v41  ;;  %v322_v60 = vadd.f32 2.0, %v2355_v44 }
  0x55   :  { %1848 = vrcp.f32 %v320_v43  ;;  %v1825_v61 = vpop.eup %1824  ;;  %v463_v2 = vsel %vm367_vm0, %v2218_v4, %v431_v45  ;;  %v433_v3 = vmul.f32 %v401_v51, %v2222_v6  ;;  %v403_v35 = vmul.f32 %v1823_v54, %v2299_v47 }
  0x56   :  { %1850 = vrcp.f32 %v321_v52  ;;  %v1827_v7 = vpop.eup %1826  ;;  %v464_v12 = vsel %vm368_vm1, %v2220_v5, %v432_v57  ;;  %v434_v41 = vmul.f32 %v402_v26, %v2226_v9  ;;  %v404_v15 = vmul.f32 %v1825_v61, %v2302_v53 }
  0x57   :  { %1852 = vrcp.f32 %v322_v60  ;;  %v1829_v17 = vpop.eup %1828  ;;  %v495_v19 = vpack.c.bf16 %v464_v12, %v463_v2  ;;  %v465_v4 = vsel %vm369_vm2, %v2222_v6, %v433_v3  ;;  %v435_v22 = vmul.f32 %v403_v35, %v2228_v10  ;;  %v2411_v60 = vld [vmem:[#allocation3 + $0xb0] sm:$0xff] }
  0x58   :  { %v405_v47 = vmul.f32 %v1827_v7, %v2305_v58  ;;  %v466_v5 = vsel %vm370_vm3, %v2226_v9, %v434_v41  ;;  %v436_v30 = vmul.f32 %v404_v15, %v2232_v13  ;;  %v406_v53 = vmul.f32 %v1829_v17, %v2308_v0 }
  0x59   :  { %v1831_v25 = vpop.eup %1830  ;;  %1854 = vpow2.f32 %v2286_v24  ;;  %1670 = vmatprep.mubr.bf16.mxu0 %v495_v19  ;;  %v496_v39 = vpack.c.bf16 %v466_v5, %v465_v4  ;;  %v467_v6 = vsel %vm371_vm4, %v2228_v10, %v435_v22  ;;  %v165_v15 = vmin.f32 %v2411_v60, 20.0 }
  0x5a   :  { %v1833_v38 = vpop.eup %1832  ;;  %v437_v58 = vmul.f32 %v405_v47, %v2234_v14  ;;  %v407_v43 = vmul.f32 %v1831_v25, %v2311_v8  ;;  %v468_v9 = vsel %vm372_vm5, %v2232_v13, %v436_v30  ;;  %v438_v0 = vmul.f32 %v406_v53, %v2238_v23 }
  0x5b   :  { %v1835_v21 = vpop.eup %1834  ;;  %v408_v24 = vmul.f32 %v1833_v38, %v2314_v16  ;;  %1856 = vpow2.f32 %v2290_v31  ;;  %1671 = vmatmul.mubr.bf16.vlgmr.msra.gmra.mxu0 %v496_v39  ;;  %v497_v51 = vpack.c.bf16 %v468_v9, %v467_v6  ;;  %v219_v38 = vmul.f32 1.442695, %v165_v15 }
  0x5c   :  { %v1837_v45 = vpop.eup %1836  ;;  %v439_v10 = vmul.f32 %v407_v43, %v2242_v27  ;;  %v409_v8 = vmul.f32 %v1835_v21, %v2317_v20  ;;  %v469_v13 = vsel %vm373_vm6, %v2234_v14, %v437_v58  ;;  %v470_v16 = vsel %vm374_vm7, %v2238_v23, %v438_v0  ;;  %v2451_v21 = vld [vmem:[#allocation3 + $0xd0] sm:$0xff] }
  0x5d   :  { %v1839_v52 = vpop.eup %1838  ;;  %v440_v31 = vmul.f32 %v408_v24, %v2244_v28  ;;  %v410_v54 = vmul.f32 %v1837_v45, %v2321_v32  ;;  %1674 = vmatprep.mubr.bf16.mxu0 %v497_v51  ;;  %v498_v2 = vpack.c.bf16 %v470_v16, %v469_v13  ;;  %vm383_vm0 = vcmp.gt.f32.partialorder %v2264_v49, 20.0  ;;  %v2459_v51 = vld [vmem:[#allocation3 + $0xd8] sm:$0xff] }
  0x5e   :  { %v1841_v57 = vpop.eup %1840  ;;  %v471_v26 = vsel %vm375_vm8, %v2242_v27, %v439_v10  ;;  %v411_v20 = vmul.f32 %v1839_v52, %v2325_v40  ;;  %v441_v3 = vmul.f32 %v409_v8, %v2246_v29  ;;  %v2420_v40 = vld [vmem:[#allocation3 + $0xb8] sm:$0xff]  ;;  %vm384_vm1 = vcmp.gt.f32.partialorder %v2266_v50, 20.0 }
  0x5f   :  { %v1843_v14 = vpop.eup %1842  ;;  %v472_v61 = vsel %vm376_vm9, %v2244_v28, %v440_v31  ;;  %v412_v23 = vmul.f32 %v1841_v57, %v2329_v48  ;;  %v442_v27 = vmul.f32 %v410_v54, %v2250_v33  ;;  %v166_v4 = vmin.f32 %v2420_v40, 20.0  ;;  %v2472_v57 = vld [vmem:[#allocation3 + $0xe0] sm:$0xff] }
  0x60   :  { %v1845_v32 = vpop.eup %1844  ;;  %v443_v35 = vmul.f32 %v411_v20, %v2252_v36  ;;  %v499_v12 = vpack.c.bf16 %v472_v61, %v471_v26  ;;  %v413_v41 = vmul.f32 %v1843_v14, %v2333_v56  ;;  %v473_v47 = vsel %vm377_vm10, %v2246_v29, %v441_v3  ;;  %v2474_v26 = vld [vmem:[#allocation3 + $0xe8] sm:$0xff] }
  0x61   :  { %v1847_v7 = vpop.eup %1846  ;;  %v444_v28 = vmul.f32 %v412_v23, %v2254_v37  ;;  %v414_v48 = vmul.f32 %v1845_v32, %v2337_v63  ;;  %v474_v56 = vsel %vm378_vm11, %v2250_v33, %v442_v27  ;;  %v221_v33 = vmul.f32 1.442695, %v166_v4 }
  0x62   :  { %v1849_v17 = vpop.eup %1848  ;;  %v475_v25 = vsel %vm379_vm12, %v2252_v36, %v443_v35  ;;  %v415_v5 = vmul.f32 %v1847_v7, %v2341_v11  ;;  %v445_v30 = vmul.f32 %v413_v41, %v2258_v42  ;;  %1858 = vpow2.f32 %v219_v38  ;;  %v2448_v11 = vld [vmem:[#allocation3 + $0xc8] sm:$0xff] }
  0x63   :  { %v1851_v19 = vpop.eup %1850  ;;  %1675 = vmatmul.mubr.bf16.gmra.mxu0 %v498_v2  ;;  %v476_v63 = vsel %vm380_vm13, %v2254_v37, %v444_v28  ;;  %v416_v53 = vmul.f32 %v1849_v17, %v2344_v18  ;;  %v446_v29 = vmul.f32 %v414_v48, %v2262_v46  ;;  %v2446_v37 = vld [vmem:[#allocation3 + $0xc0] sm:$0xff]  ;;  %v500_v6 = vpack.c.bf16 %v474_v56, %v473_v47  ;;  %v2486_v2 = vld [vmem:[#allocation3 + $0xf8] sm:$0xff] }
  0x64   :  { %v1853_v22 = vpop.eup %1852  ;;  %1678 = vmatprep.mubr.bf16.mxu0 %v499_v12  ;;  %v501_v58 = vpack.c.bf16 %v476_v63, %v475_v25  ;;  %v447_v43 = vmul.f32 %v415_v5, %v2264_v49  ;;  %1860 = vpow2.f32 %v221_v33  ;;  %v477_v9 = vsel %vm381_vm14, %v2258_v42, %v445_v30 }
  0x65   :  { %v448_v0 = vmul.f32 %v416_v53, %v2266_v50  ;;  %v478_v10 = vsel %vm382_vm15, %v2262_v46, %v446_v29  ;;  %v417_v8 = vmul.f32 %v1851_v19, %v2350_v34  ;;  %v167_v52 = vmin.f32 %v2446_v37, 20.0 }
  0x66   :  { %v1855_v39 = vpop.eup %1854  ;;  %v168_v13 = vmin.f32 %v2448_v11, 20.0  ;;  %v418_v16 = vmul.f32 %v1853_v22, %v2355_v44  ;;  %v169_v54 = vmin.f32 %v2451_v21, 20.0  ;;  %v479_v46 = vsel %vm383_vm0, %v2264_v49, %v447_v43  ;;  %v2480_v44 = vld [vmem:[#allocation3 + $0xf0] sm:$0xff] }
  0x67   :  { %v259_v36 = vadd.f32 2.0, %v1855_v39  ;;  %v223_v34 = vmul.f32 1.442695, %v167_v52  ;;  %v170_v14 = vmin.f32 %v2459_v51, 20.0  ;;  %v480_v61 = vsel %vm384_vm1, %v2266_v50, %v448_v0 }
  0x68   :  { %v1857_v18 = vpop.eup %1856  ;;  %v225_v20 = vmul.f32 1.442695, %v168_v13  ;;  %v227_v32 = vmul.f32 1.442695, %v169_v54  ;;  %v171_v49 = vmin.f32 %v2472_v57, 20.0  ;;  %v172_v27 = vmin.f32 %v2474_v26, 20.0 }
  0x69   :  { %v260_v24 = vadd.f32 2.0, %v1857_v18  ;;  %v2457_v45 = vmul.f32 %v1855_v39, %v259_v36  ;;  %v229_v3 = vmul.f32 1.442695, %v170_v14  ;;  %v502_v35 = vpack.c.bf16 %v478_v10, %v477_v9 }
  0x6a   :  { %v449_v7 = vmul.f32 %v417_v8, %v2270_v55  ;;  %v173_v12 = vmin.f32 %v2480_v44, 20.0  ;;  %v231_v50 = vmul.f32 1.442695, %v171_v49  ;;  %v233_v28 = vmul.f32 1.442695, %v172_v27 }
  0x6b   :  { %v2468_v42 = vmul.f32 %v1857_v18, %v260_v24  ;;  %v323_v31 = vadd.f32 2.0, %v2457_v45  ;;  %1679 = vmatmul.mubr.bf16.gmra.mxu0 %v500_v6  ;;  %v174_v41 = vmin.f32 %v2486_v2, 20.0  ;;  %v503_v15 = vpack.c.bf16 %v480_v61, %v479_v46 }
  0x6c   :  { %1682 = vmatprep.mubr.bf16.mxu0 %v501_v58  ;;  %v450_v17 = vmul.f32 %v418_v16, %v2274_v59  ;;  %v235_v48 = vmul.f32 1.442695, %v173_v12  ;;  %vm385_vm2 = vcmp.gt.f32.partialorder %v2270_v55, 20.0  ;;  %vm386_vm3 = vcmp.gt.f32.partialorder %v2274_v59, 20.0 }
  0x6d   :  { %v324_v23 = vadd.f32 2.0, %v2468_v42  ;;  %1862 = vrcp.f32 %v323_v31  ;;  %v237_v19 = vmul.f32 1.442695, %v174_v41  ;;  %v481_v47 = vsel %vm385_vm2, %v2270_v55, %v449_v7 }
  0x6e   :  { %1864 = vpow2.f32 %v223_v34  ;;  %v482_v56 = vsel %vm386_vm3, %v2274_v59, %v450_v17  ;;  %vm387_vm4 = vcmp.gt.f32.partialorder %v2276_v62, 20.0  ;;  %vm388_vm5 = vcmp.gt.f32.partialorder %v2279_v1, 20.0 }
  0x6f   :  { %1866 = vrcp.f32 %v324_v23  ;;  %v1859_v4 = vpop.eup %1858  ;;  %v504_v30 = vpack.c.bf16 %v482_v56, %v481_v47  ;;  %vm389_vm6 = vcmp.gt.f32.partialorder %v2411_v60, 20.0  ;;  %vm390_vm7 = vcmp.gt.f32.partialorder %v2420_v40, 20.0 }
  0x70   :  { %1868 = vpow2.f32 %v225_v20  ;;  %v261_v25 = vadd.f32 2.0, %v1859_v4  ;;  %vm391_vm8 = vcmp.gt.f32.partialorder %v2446_v37, 20.0  ;;  %vm392_vm9 = vcmp.gt.f32.partialorder %v2448_v11, 20.0 }
  0x71   :  { %1870 = vpow2.f32 %v227_v32  ;;  %v1861_v22 = vpop.eup %1860  ;;  %vm393_vm10 = vcmp.gt.f32.partialorder %v2451_v21, 20.0  ;;  %vm394_vm11 = vcmp.gt.f32.partialorder %v2459_v51, 20.0  ;;  %vm395_vm12 = vcmp.gt.f32.partialorder %v2472_v57, 20.0 }
  0x72   :  { %1872 = vpow2.f32 %v229_v3  ;;  %v262_v5 = vadd.f32 2.0, %v1861_v22  ;;  %v293_v63 = vmul.f32 %v1859_v4, %v261_v25  ;;  %vm396_vm13 = vcmp.gt.f32.partialorder %v2474_v26, 20.0 }
  0x73   :  { %1874 = vpow2.f32 %v231_v50  ;;  %1683 = vmatmul.mubr.bf16.gmra.mxu0 %v502_v35  ;;  %vm397_vm14 = vcmp.gt.f32.partialorder %v2480_v44, 20.0  ;;  %vm398_vm15 = vcmp.gt.f32.partialorder %v2486_v2, 20.0 }
  0x74   :  { %1876 = vpow2.f32 %v233_v28  ;;  %1686 = vmatprep.mubr.bf16.mxu0 %v503_v15  ;;  %v294_v53 = vmul.f32 %v1861_v22, %v262_v5  ;;  %v325_v38 = vadd.f32 2.0, %v293_v63 }
  0x75   :  { %1878 = vpow2.f32 %v235_v48 }
  0x76   :  { %1880 = vpow2.f32 %v237_v19  ;;  %v326_v29 = vadd.f32 2.0, %v294_v53 }
  0x77   :  { %1882 = vrcp.f32 %v325_v38 }
  0x78   :  { %1884 = vrcp.f32 %v326_v29 }
  0x7a   :  { %v1863_v39 = vpop.eup %1862 }
  0x7b   :  { %v1865_v33 = vpop.eup %1864  ;;  %v419_v36 = vmul.f32 %v1863_v39, %v2457_v45  ;;  %1687 = vmatmul.mubr.bf16.gmra.mxu0 %v504_v30 }
  0x7c   :  { %v1867_v18 = vpop.eup %1866  ;;  %v263_v55 = vadd.f32 2.0, %v1865_v33 }
  0x7d   :  { %v1869_v59 = vpop.eup %1868  ;;  %v420_v6 = vmul.f32 %v1867_v18, %v2468_v42  ;;  %v451_v58 = vmul.f32 %v419_v36, %v2276_v62 }
  0x7e   :  { %v1871_v43 = vpop.eup %1870  ;;  %v264_v9 = vadd.f32 2.0, %v1869_v59  ;;  %v295_v0 = vmul.f32 %v1865_v33, %v263_v55 }
  0x7f   :  { %v1873_v24 = vpop.eup %1872  ;;  %v452_v45 = vmul.f32 %v420_v6, %v2279_v1  ;;  %v483_v10 = vsel %vm387_vm4, %v2276_v62, %v451_v58  ;;  %v265_v8 = vadd.f32 2.0, %v1871_v43 }
  0x80   :  { %v1875_v52 = vpop.eup %1874  ;;  %v296_v13 = vmul.f32 %v1869_v59, %v264_v9  ;;  %v327_v16 = vadd.f32 2.0, %v295_v0  ;;  %v266_v31 = vadd.f32 2.0, %v1873_v24 }
  0x81   :  { %v1877_v54 = vpop.eup %1876  ;;  %v484_v42 = vsel %vm388_vm5, %v2279_v1, %v452_v45  ;;  %v297_v46 = vmul.f32 %v1871_v43, %v265_v8  ;;  %v267_v34 = vadd.f32 2.0, %v1875_v52 }
  0x82   :  { %v1879_v20 = vpop.eup %1878  ;;  %v505_v14 = vpack.c.bf16 %v484_v42, %v483_v10  ;;  %v328_v61 = vadd.f32 2.0, %v296_v13  ;;  %1886 = vrcp.f32 %v327_v16  ;;  %v298_v23 = vmul.f32 %v1873_v24, %v266_v31 }
  0x83   :  { %v1881_v32 = vpop.eup %1880  ;;  %v329_v3 = vadd.f32 2.0, %v297_v46  ;;  %v268_v49 = vadd.f32 2.0, %v1877_v54  ;;  %v299_v27 = vmul.f32 %v1875_v52, %v267_v34  ;;  %v269_v62 = vadd.f32 2.0, %v1879_v20 }
  0x84   :  { %1690 = vmatprep.mubr.bf16.mxu0 %v505_v14  ;;  %1888 = vrcp.f32 %v328_v61  ;;  %v330_v35 = vadd.f32 2.0, %v298_v23  ;;  %v270_v7 = vadd.f32 2.0, %v1881_v32  ;;  %v1883_v17 = vpop.eup %1882 }
  0x85   :  { %1890 = vrcp.f32 %v329_v3  ;;  %v300_v12 = vmul.f32 %v1877_v54, %v268_v49  ;;  %v331_v50 = vadd.f32 2.0, %v299_v27  ;;  %v301_v1 = vmul.f32 %v1879_v20, %v269_v62  ;;  %v1885_v19 = vpop.eup %1884  ;;  %v1770_v3 = vld [vmem:[#allocation8 + $0x18] sm:$0xff]   ;;  %v1773_v49 = vld [vmem:[#allocation8] sm:$0xff]  }
  0x86   :  { %1892 = vrcp.f32 %v330_v35  ;;  %v302_v28 = vmul.f32 %v1881_v32, %v270_v7  ;;  %v421_v4 = vmul.f32 %v1883_v17, %v293_v63  ;;  %v422_v22 = vmul.f32 %v1885_v19, %v294_v53  ;;  %v1768_v32 = vld [vmem:[#allocation8 + $0x28] sm:$0xff]  }
  0x87   :  { %v332_v41 = vadd.f32 2.0, %v300_v12  ;;  %1894 = vrcp.f32 %v331_v50  ;;  %v333_v15 = vadd.f32 2.0, %v301_v1 }
  0x88   :  { %v334_v48 = vadd.f32 2.0, %v302_v28  ;;  %v453_v47 = vmul.f32 %v421_v4, %v2411_v60  ;;  %v454_v56 = vmul.f32 %v422_v22, %v2420_v40 }
  0x89   :  { %1896 = vrcp.f32 %v332_v41 }
  0x8a   :  { %1898 = vrcp.f32 %v333_v15  ;;  %v485_v25 = vsel %vm389_vm6, %v2411_v60, %v453_v47  ;;  %v486_v5 = vsel %vm390_vm7, %v2420_v40, %v454_v56 }
  0x8b   :  { %1900 = vrcp.f32 %v334_v48  ;;  %v506_v38 = vpack.c.bf16 %v486_v5, %v485_v25 }
  0x8d   :  { %1691 = vmatmul.mubr.bf16.gmra.mxu0 %v506_v38 }
  0x8f   :  { %v1887_v30 = vpop.eup %1886 }
  0x90   :  { %v423_v39 = vmul.f32 %v1887_v30, %v295_v0 }
  0x91   :  { %v1889_v63 = vpop.eup %1888 }
  0x92   :  { %v1891_v53 = vpop.eup %1890  ;;  %v424_v29 = vmul.f32 %v1889_v63, %v296_v13  ;;  %v455_v33 = vmul.f32 %v423_v39, %v2446_v37 }
  0x93   :  { %v1893_v36 = vpop.eup %1892  ;;  %v425_v18 = vmul.f32 %v1891_v53, %v297_v46 }
  0x94   :  { %v1895_v55 = vpop.eup %1894  ;;  %v456_v60 = vmul.f32 %v424_v29, %v2448_v11  ;;  %v487_v40 = vsel %vm391_vm8, %v2446_v37, %v455_v33  ;;  %v426_v59 = vmul.f32 %v1893_v36, %v298_v23  ;;  %v1766_v23 = vld [vmem:[#allocation8 + $0x38] sm:$0xff]  }
  0x95   :  { %v457_v6 = vmul.f32 %v425_v18, %v2451_v21  ;;  %v427_v58 = vmul.f32 %v1895_v55, %v299_v27  ;;  %1702 = vmatprep.subr.bf16.mxu1 %v1766_v23  ;;  %v2539_v27 = vld [vmem:[%s2966_s2] ss:$0 sm:$0xff] }
  0x96   :  { %v1897_v43 = vpop.eup %1896  ;;  %v488_v9 = vsel %vm392_vm9, %v2448_v11, %v456_v60  ;;  %v458_v0 = vmul.f32 %v426_v59, %v2459_v51  ;;  %1703 = vmatpush3.bf16.msra.mxu1 %v1766_v23 }
  0x97   :  { %v1899_v24 = vpop.eup %1898  ;;  %v507_v45 = vpack.c.bf16 %v488_v9, %v487_v40  ;;  %v489_v10 = vsel %vm393_vm10, %v2451_v21, %v457_v6  ;;  %v428_v37 = vmul.f32 %v1897_v43, %v300_v12  ;;  %v459_v8 = vmul.f32 %v427_v58, %v2472_v57 }
  0x98   :  { %v1901_v52 = vpop.eup %1900  ;;  %v490_v13 = vsel %vm394_vm11, %v2459_v51, %v458_v0  ;;  %v429_v16 = vmul.f32 %v1899_v24, %v301_v1 }
  0x99   :  { %1694 = vmatprep.mubr.bf16.mxu0 %v507_v45  ;;  %v508_v11 = vpack.c.bf16 %v490_v13, %v489_v10  ;;  %v460_v31 = vmul.f32 %v428_v37, %v2474_v26  ;;  %v491_v54 = vsel %vm395_vm12, %v2472_v57, %v459_v8  ;;  %v430_v42 = vmul.f32 %v1901_v52, %v302_v28  ;;  %v1767_v57 = vld [vmem:[#allocation8 + $0x30] sm:$0xff]  }
  0x9a   :  { %v461_v21 = vmul.f32 %v429_v16, %v2480_v44  ;;  %1704 = vmatprep.subr.bf16.mxu1 %v1767_v57 }
  0x9b   :  { %1695 = vmatmul.mubr.bf16.gmra.mxu0 %v508_v11  ;;  %v492_v46 = vsel %vm396_vm13, %v2474_v26, %v460_v31  ;;  %v462_v51 = vmul.f32 %v430_v42, %v2486_v2  ;;  %1705 = vmatpush3.bf16.msra.mxu1 %v1767_v57  ;;  %v1769_v26 = vld [vmem:[#allocation8 + $0x20] sm:$0xff]  }
  0x9c   :  { %v509_v34 = vpack.c.bf16 %v492_v46, %v491_v54  ;;  %v493_v20 = vsel %vm397_vm14, %v2480_v44, %v461_v21  ;;  %1706 = vmatprep.subr.bf16.mxu1 %v1768_v32  ;;  %v1771_v44 = vld [vmem:[#allocation8 + $0x10] sm:$0xff]  }
  0x9d   :  { %v494_v14 = vsel %vm398_vm15, %v2486_v2, %v462_v51  ;;  %v1772_v2 = vld [vmem:[#allocation8 + $0x8] sm:$0xff]  }
  0x9e   :  { %1698 = vmatprep.mubr.bf16.mxu0 %v509_v34  ;;  %v510_v61 = vpack.c.bf16 %v494_v14, %v493_v20 }
  0x9f   :  { %1707 = vmatpush3.bf16.msra.mxu1 %v1768_v32 }
  0xa0   :  { %1708 = vmatprep.subr.bf16.mxu1 %v1769_v26 }
  0xa3   :  { %1699 = vmatmul.mubr.bf16.gmra.mxu0 %v510_v61  ;;  %1709 = vmatpush3.bf16.msra.mxu1 %v1769_v26 }
  0xa4   :  { %1710 = vmatprep.subr.bf16.mxu1 %v1770_v3 }
  0xa7   :  { %1711 = vmatpush3.bf16.msra.mxu1 %v1770_v3 }
  0xa8   :  { %1712 = vmatprep.subr.bf16.mxu1 %v1771_v44 }
  0xab   :  { %1713 = vmatpush3.bf16.msra.mxu1 %v1771_v44 }
  0xac   :  { %1714 = vmatprep.subr.bf16.mxu1 %v1772_v2 }
  0xaf   :  { %1715 = vmatpush3.bf16.msra.mxu1 %v1772_v2 }
  0xb0   :  { %1716 = vmatprep.subr.bf16.mxu1 %v1773_v49 }
  0xb3   :  { %1717 = vmatpush3.bf16.msra.mxu1 %v1773_v49 }
 0x11b   :  { %v1672_v62 = vpop.f32.mrf.mxu0 }
 0x11c   :  { %v2542_v35 = vadd.f32 %v1672_v62, %v2539_v27 }
 0x11d   :  { %v616_v7 = vpop.f32.mrf.mxu0 }
 0x11e   :  { %v745_v12 = vmin.f32 %v2542_v35, 20.0  ;;  %v2546_v50 = vadd.f32 %v2539_v27, %v616_v7  ;;  %vm969_vm0 = vcmp.gt.f32.partialorder %v2542_v35, 20.0 }
 0x11f   :  { %v1673_v1 = vpop.f32.mrf.mxu0 }
 0x120   :  { %v779_v28 = vmul.f32 1.442695, %v745_v12  ;;  %v743_v41 = vmin.f32 %v2546_v50, 20.0  ;;  %v2550_v15 = vadd.f32 %v1673_v1, %v2539_v27  ;;  %vm967_vm1 = vcmp.gt.f32.partialorder %v2546_v50, 20.0 }
 0x121   :  { %v619_v17 = vpop.f32.mrf.mxu0 }
 0x122   :  { %1902 = vpow2.f32 %v779_v28  ;;  %v775_v48 = vmul.f32 1.442695, %v743_v41  ;;  %v746_v19 = vmin.f32 %v2550_v15, 20.0  ;;  %v2554_v4 = vadd.f32 %v2539_v27, %v619_v17 }
 0x123   :  { %v1676_v22 = vpop.f32.mrf.mxu0  ;;  %vm970_vm2 = vcmp.gt.f32.partialorder %v2550_v15, 20.0 }
 0x124   :  { %1904 = vpow2.f32 %v775_v48  ;;  %v781_v47 = vmul.f32 1.442695, %v746_v19  ;;  %v744_v56 = vmin.f32 %v2554_v4, 20.0  ;;  %v2558_v25 = vadd.f32 %v1676_v22, %v2539_v27 }
 0x125   :  { %v632_v5 = vpop.f32.mrf.mxu0  ;;  %vm968_vm3 = vcmp.gt.f32.partialorder %v2554_v4, 20.0 }
 0x126   :  { %1906 = vpow2.f32 %v781_v47  ;;  %v777_v30 = vmul.f32 1.442695, %v744_v56  ;;  %v749_v38 = vmin.f32 %v2558_v25, 20.0  ;;  %v2562_v39 = vadd.f32 %v2539_v27, %v632_v5 }
 0x127   :  { %v1677_v63 = vpop.f32.mrf.mxu0  ;;  %vm973_vm4 = vcmp.gt.f32.partialorder %v2558_v25, 20.0 }
 0x128   :  { %1908 = vpow2.f32 %v777_v30  ;;  %v787_v53 = vmul.f32 1.442695, %v749_v38  ;;  %v747_v29 = vmin.f32 %v2562_v39, 20.0  ;;  %v2566_v33 = vadd.f32 %v1677_v63, %v2539_v27 }
 0x129   :  { %v635_v36 = vpop.f32.mrf.mxu0  ;;  %vm971_vm5 = vcmp.gt.f32.partialorder %v2562_v39, 20.0 }
 0x12a   :  { %1910 = vpow2.f32 %v787_v53  ;;  %v783_v18 = vmul.f32 1.442695, %v747_v29  ;;  %v750_v55 = vmin.f32 %v2566_v33, 20.0  ;;  %v2570_v60 = vadd.f32 %v2539_v27, %v635_v36 }
 0x12b   :  { %v1680_v40 = vpop.f32.mrf.mxu0  ;;  %vm974_vm7 = vcmp.gt.f32.partialorder %v2566_v33, 20.0 }
 0x12c   :  { %1912 = vpow2.f32 %v783_v18  ;;  %v789_v59 = vmul.f32 1.442695, %v750_v55  ;;  %v748_v6 = vmin.f32 %v2570_v60, 20.0  ;;  %v2574_v58 = vadd.f32 %v1680_v40, %v2539_v27 }
 0x12d   :  { %v648_v43 = vpop.f32.mrf.mxu0  ;;  %vm972_vm6 = vcmp.gt.f32.partialorder %v2570_v60, 20.0 }
 0x12e   :  { %1914 = vpow2.f32 %v789_v59  ;;  %v785_v9 = vmul.f32 1.442695, %v748_v6  ;;  %v753_v0 = vmin.f32 %v2574_v58, 20.0  ;;  %v2578_v24 = vadd.f32 %v2539_v27, %v648_v43 }
 0x12f   :  { %v1903_v45 = vpop.eup %1902  ;;  %v1681_v10 = vpop.f32.mrf.mxu0  ;;  %vm977_vm10 = vcmp.gt.f32.partialorder %v2574_v58, 20.0 }
 0x130   :  { %v841_v37 = vadd.f32 2.0, %v1903_v45  ;;  %1916 = vpow2.f32 %v785_v9  ;;  %v795_v8 = vmul.f32 1.442695, %v753_v0  ;;  %v751_v52 = vmin.f32 %v2578_v24, 20.0 }
 0x131   :  { %v1905_v13 = vpop.eup %1904  ;;  %v2582_v16 = vadd.f32 %v1681_v10, %v2539_v27  ;;  %v651_v11 = vpop.f32.mrf.mxu0  ;;  %vm975_vm9 = vcmp.gt.f32.partialorder %v2578_v24, 20.0 }
 0x132   :  { %v2584_v31 = vmul.f32 %v1903_v45, %v841_v37  ;;  %1918 = vpow2.f32 %v795_v8  ;;  %v791_v54 = vmul.f32 1.442695, %v751_v52  ;;  %v2587_v42 = vadd.f32 %v2539_v27, %v651_v11 }
 0x133   :  { %v1907_v21 = vpop.eup %1906  ;;  %v754_v46 = vmin.f32 %v2582_v16, 20.0  ;;  %v1684_v51 = vpop.f32.mrf.mxu0  ;;  %v839_v34 = vadd.f32 2.0, %v1905_v13  ;;  %vm978_vm11 = vcmp.gt.f32.partialorder %v2582_v16, 20.0 }
 0x134   :  { %v905_v20 = vadd.f32 2.0, %v2584_v31  ;;  %v842_v14 = vadd.f32 2.0, %v1907_v21  ;;  %1920 = vpow2.f32 %v791_v54  ;;  %v752_v61 = vmin.f32 %v2587_v42, 20.0 }
 0x135   :  { %v1909_v23 = vpop.eup %1908  ;;  %v797_v57 = vmul.f32 1.442695, %v754_v46  ;;  %v2593_v32 = vadd.f32 %v1684_v51, %v2539_v27  ;;  %v664_v26 = vpop.f32.mrf.mxu0  ;;  %v2595_v3 = vmul.f32 %v1905_v13, %v839_v34  ;;  %vm976_vm8 = vcmp.gt.f32.partialorder %v2587_v42, 20.0 }
 0x136   :  { %1922 = vrcp.f32 %v905_v20  ;;  %v2597_v44 = vmul.f32 %v1907_v21, %v842_v14  ;;  %v793_v2 = vmul.f32 1.442695, %v752_v61  ;;  %v2600_v49 = vadd.f32 %v2539_v27, %v664_v26 }
 0x137   :  { %v1911_v62 = vpop.eup %1910  ;;  %1924 = vpow2.f32 %v797_v57  ;;  %v757_v7 = vmin.f32 %v2593_v32, 20.0  ;;  %v1685_v12 = vpop.f32.mrf.mxu0  ;;  %v840_v1 = vadd.f32 2.0, %v1909_v23  ;;  %v903_v28 = vadd.f32 2.0, %v2595_v3 }
 0x138   :  { %v906_v41 = vadd.f32 2.0, %v2597_v44  ;;  %v845_v17 = vadd.f32 2.0, %v1911_v62  ;;  %1926 = vpow2.f32 %v793_v2  ;;  %v755_v48 = vmin.f32 %v2600_v49, 20.0 }
 0x139   :  { %v1913_v19 = vpop.eup %1912  ;;  %v803_v22 = vmul.f32 1.442695, %v757_v7  ;;  %v2607_v47 = vadd.f32 %v1685_v12, %v2539_v27  ;;  %v667_v56 = vpop.f32.mrf.mxu0  ;;  %v2609_v5 = vmul.f32 %v1909_v23, %v840_v1  ;;  %1928 = vrcp.f32 %v903_v28 }
 0x13a   :  { %1930 = vrcp.f32 %v906_v41  ;;  %v2611_v30 = vmul.f32 %v1911_v62, %v845_v17  ;;  %v843_v38 = vadd.f32 2.0, %v1913_v19  ;;  %v799_v63 = vmul.f32 1.442695, %v755_v48 }
 0x13b   :  { %v1915_v53 = vpop.eup %1914  ;;  %1932 = vpow2.f32 %v803_v22  ;;  %v758_v29 = vmin.f32 %v2607_v47, 20.0  ;;  %v2615_v36 = vadd.f32 %v2539_v27, %v667_v56  ;;  %v1688_v18 = vpop.f32.mrf.mxu0  ;;  %v904_v55 = vadd.f32 2.0, %v2609_v5 }
 0x13c   :  { %v909_v40 = vadd.f32 2.0, %v2611_v30  ;;  %v2619_v59 = vmul.f32 %v1913_v19, %v843_v38  ;;  %v846_v6 = vadd.f32 2.0, %v1915_v53  ;;  %1934 = vpow2.f32 %v799_v63 }
 0x13d   :  { %v1917_v43 = vpop.eup %1916  ;;  %v805_v9 = vmul.f32 1.442695, %v758_v29  ;;  %v756_v0 = vmin.f32 %v2615_v36, 20.0  ;;  %v2623_v45 = vadd.f32 %v1688_v18, %v2539_v27  ;;  %v680_v10 = vpop.f32.mrf.mxu0  ;;  %1936 = vrcp.f32 %v904_v55 }
 0x13e   :  { %1938 = vrcp.f32 %v909_v40  ;;  %v907_v37 = vadd.f32 2.0, %v2619_v59  ;;  %v2626_v8 = vmul.f32 %v1915_v53, %v846_v6  ;;  %v844_v52 = vadd.f32 2.0, %v1917_v43 }
 0x13f   :  { %v1919_v13 = vpop.eup %1918  ;;  %1940 = vpow2.f32 %v805_v9  ;;  %v801_v11 = vmul.f32 1.442695, %v756_v0  ;;  %v761_v54 = vmin.f32 %v2623_v45, 20.0  ;;  %v2630_v21 = vadd.f32 %v2539_v27, %v680_v10  ;;  %v1689_v46 = vpop.f32.mrf.mxu0 }
 0x140   :  { %1942 = vrcp.f32 %v907_v37  ;;  %v910_v51 = vadd.f32 2.0, %v2626_v8  ;;  %v2633_v34 = vmul.f32 %v1917_v43, %v844_v52  ;;  %v849_v20 = vadd.f32 2.0, %v1919_v13 }
 0x141   :  { %v1921_v14 = vpop.eup %1920  ;;  %1944 = vpow2.f32 %v801_v11  ;;  %v811_v61 = vmul.f32 1.442695, %v761_v54  ;;  %v759_v23 = vmin.f32 %v2630_v21, 20.0  ;;  %v2637_v57 = vadd.f32 %v1689_v46, %v2539_v27  ;;  %v683_v26 = vpop.f32.mrf.mxu0 }
 0x142   :  { %1946 = vrcp.f32 %v910_v51  ;;  %v908_v2 = vadd.f32 2.0, %v2633_v34  ;;  %v2640_v62 = vmul.f32 %v1919_v13, %v849_v20  ;;  %v847_v7 = vadd.f32 2.0, %v1921_v14 }
 0x143   :  { %v1923_v12 = vpop.eup %1922  ;;  %1948 = vpow2.f32 %v811_v61  ;;  %v807_v1 = vmul.f32 1.442695, %v759_v23  ;;  %v762_v28 = vmin.f32 %v2637_v57, 20.0  ;;  %v2644_v41 = vadd.f32 %v2539_v27, %v683_v26 }
 0x144   :  { %v1925_v17 = vpop.eup %1924  ;;  %v1001_v48 = vmul.f32 %v1923_v12, %v2584_v31  ;;  %1950 = vrcp.f32 %v908_v2  ;;  %v913_v19 = vadd.f32 2.0, %v2640_v62  ;;  %v2649_v22 = vmul.f32 %v1921_v14, %v847_v7 }
 0x145   :  { %v1927_v56 = vpop.eup %1926  ;;  %v850_v38 = vadd.f32 2.0, %v1925_v17  ;;  %1952 = vpow2.f32 %v807_v1  ;;  %v813_v63 = vmul.f32 1.442695, %v762_v28  ;;  %v760_v53 = vmin.f32 %v2644_v41, 20.0 }
 0x146   :  { %v1929_v29 = vpop.eup %1928  ;;  %1954 = vrcp.f32 %v913_v19  ;;  %v911_v18 = vadd.f32 2.0, %v2649_v22  ;;  %v848_v55 = vadd.f32 2.0, %v1927_v56  ;;  %v1033_v0 = vmul.f32 %v1001_v48, %v2542_v35 }
 0x147   :  { %v1931_v40 = vpop.eup %1930  ;;  %v2654_v31 = vmul.f32 %v1925_v17, %v850_v38  ;;  %1956 = vpow2.f32 %v813_v63  ;;  %v809_v6 = vmul.f32 1.442695, %v760_v53  ;;  %v999_v43 = vmul.f32 %v1929_v29, %v2595_v3 }
 0x148   :  { %v1933_v9 = vpop.eup %1932  ;;  %v1002_v10 = vmul.f32 %v1931_v40, %v2597_v44  ;;  %1958 = vrcp.f32 %v911_v18  ;;  %v2659_v37 = vmul.f32 %v1927_v56, %v848_v55  ;;  %v1065_v2 = vsel %vm969_vm0, %v2542_v35, %v1033_v0 }
 0x149   :  { %v1935_v52 = vpop.eup %1934  ;;  %v914_v13 = vadd.f32 2.0, %v2654_v31  ;;  %v853_v11 = vadd.f32 2.0, %v1933_v9  ;;  %1960 = vpow2.f32 %v809_v6  ;;  %v1031_v54 = vmul.f32 %v999_v43, %v2546_v50 }
 0x14a   :  { %v1937_v46 = vpop.eup %1936  ;;  %v1034_v51 = vmul.f32 %v1002_v10, %v2550_v15  ;;  %v912_v3 = vadd.f32 2.0, %v2659_v37  ;;  %v851_v20 = vadd.f32 2.0, %v1935_v52  ;;  %vm979_vm12 = vcmp.gt.f32.partialorder %v2600_v49, 20.0 }
 0x14b   :  { %v1939_v14 = vpop.eup %1938  ;;  %1962 = vrcp.f32 %v914_v13  ;;  %v2666_v44 = vmul.f32 %v1933_v9, %v853_v11  ;;  %v1000_v61 = vmul.f32 %v1937_v46, %v2609_v5  ;;  %v1063_v5 = vsel %vm967_vm1, %v2546_v50, %v1031_v54 }
 0x14c   :  { %v1941_v23 = vpop.eup %1940  ;;  %1964 = vrcp.f32 %v912_v3  ;;  %v2670_v26 = vmul.f32 %v1935_v52, %v851_v20  ;;  %v1066_v7 = vsel %vm970_vm2, %v2550_v15, %v1034_v51  ;;  %v1005_v19 = vmul.f32 %v1939_v14, %v2611_v30 }
 0x14d   :  { %v1943_v12 = vpop.eup %1942  ;;  %v917_v1 = vadd.f32 2.0, %v2666_v44  ;;  %v854_v28 = vadd.f32 2.0, %v1941_v23  ;;  %v1032_v17 = vmul.f32 %v1000_v61, %v2554_v4  ;;  %v1128_v15 = vpack.c.bf16 %v1066_v7, %v1065_v2  ;;  %v1692_v30 = vpop.f32.mrf.mxu0 }
 0x14e   :  { %v1945_v48 = vpop.eup %1944  ;;  %v1003_v56 = vmul.f32 %v1943_v12, %v2619_v59  ;;  %v915_v35 = vadd.f32 2.0, %v2670_v26  ;;  %v2696_v0 = vadd.f32 %v1692_v30, %v2539_v27  ;;  %vm980_vm13 = vcmp.gt.f32.partialorder %v2615_v36, 20.0 }
 0x14f   :  { %v1947_v38 = vpop.eup %1946  ;;  %1966 = vrcp.f32 %v917_v1  ;;  %v2685_v63 = vmul.f32 %v1941_v23, %v854_v28  ;;  %v852_v53 = vadd.f32 2.0, %v1945_v48  ;;  %v1064_v29 = vsel %vm968_vm3, %v2554_v4, %v1032_v17  ;;  %v696_v13 = vpop.f32.mrf.mxu0 }
 0x150   :  { %v1949_v50 = vpop.eup %1948  ;;  %v1035_v18 = vmul.f32 %v1003_v56, %v2562_v39  ;;  %v1006_v55 = vmul.f32 %v1947_v38, %v2626_v8  ;;  %1968 = vrcp.f32 %v915_v35  ;;  %v1127_v59 = vpack.c.bf16 %v1064_v29, %v1063_v5 }
 0x151   :  { %v1951_v40 = vpop.eup %1950  ;;  %v918_v6 = vadd.f32 2.0, %v2685_v63  ;;  %v2693_v43 = vmul.f32 %v1945_v48, %v852_v53  ;;  %v857_v9 = vadd.f32 2.0, %v1949_v50  ;;  %v1037_v4 = vmul.f32 %v1005_v19, %v2558_v25  ;;  %v1693_v61 = vpop.f32.mrf.mxu0 }
 0x152   :  { %v1953_v10 = vpop.eup %1952  ;;  %v2700_v52 = vmul.f32 %v1006_v55, %v2566_v33  ;;  %v1004_v8 = vmul.f32 %v1951_v40, %v2633_v34  ;;  %1718 = vmatprep.mubr.bf16.mxu1 %v1127_v59  ;;  %v765_v14 = vmin.f32 %v2696_v0, 20.0  ;;  %v2711_v34 = vadd.f32 %v2539_v27, %v696_v13 }
 0x153   :  { %v1955_v11 = vpop.eup %1954  ;;  %1970 = vrcp.f32 %v918_v6  ;;  %v916_v54 = vadd.f32 2.0, %v2693_v43  ;;  %v2705_v46 = vmul.f32 %v1949_v50, %v857_v9  ;;  %v855_v51 = vadd.f32 2.0, %v1953_v10  ;;  %1719 = vmatmul.mubr.bf16.vlgmr.msra.gmra.mxu1 %v1128_v15  ;;  %v699_v48 = vpop.f32.mrf.mxu0 }
 0x154   :  { %v1957_v3 = vpop.eup %1956  ;;  %v1009_v20 = vmul.f32 %v1955_v11, %v2640_v62  ;;  %v2714_v23 = vsel %vm971_vm5, %v2562_v39, %v1035_v18  ;;  %v1036_v17 = vmul.f32 %v1004_v8, %v2570_v60  ;;  %v819_v62 = vmul.f32 1.442695, %v765_v14 }
 0x155   :  { %v1959_v2 = vpop.eup %1958  ;;  %1972 = vrcp.f32 %v916_v54  ;;  %v921_v7 = vadd.f32 2.0, %v2705_v46  ;;  %v2717_v12 = vmul.f32 %v1953_v10, %v855_v51  ;;  %v858_v1 = vadd.f32 2.0, %v1957_v3 }
 0x156   :  { %v1961_v28 = vpop.eup %1960  ;;  %v763_v5 = vmin.f32 %v2711_v34, 20.0  ;;  %v2724_v19 = vsel %vm973_vm4, %v2558_v25, %v1037_v4  ;;  %v2731_v38 = vmul.f32 %v1009_v20, %v2574_v58  ;;  %v2734_v29 = vadd.f32 %v1693_v61, %v2539_v27 }
 0x157   :  { %1974 = vrcp.f32 %v921_v7  ;;  %v919_v39 = vadd.f32 2.0, %v2717_v12  ;;  %v2727_v56 = vmul.f32 %v1957_v3, %v858_v1  ;;  %v856_v35 = vadd.f32 2.0, %v1961_v28 }
 0x158   :  { %v1963_v15 = vpop.eup %1962  ;;  %1976 = vpow2.f32 %v819_v62  ;;  %v815_v53 = vmul.f32 1.442695, %v763_v5  ;;  %v1007_v25 = vmul.f32 %v1959_v2, %v2649_v22  ;;  %v766_v59 = vmin.f32 %v2734_v29, 20.0 }
 0x159   :  { %v1965_v50 = vpop.eup %1964  ;;  %1978 = vrcp.f32 %v919_v39  ;;  %v922_v18 = vadd.f32 2.0, %v2727_v56  ;;  %v2738_v55 = vmul.f32 %v1961_v28, %v856_v35  ;;  %v2744_v40 = vadd.f32 %v2539_v27, %v699_v48 }
 0x15a   :  { %v1008_v30 = vmul.f32 %v1965_v50, %v2659_v37  ;;  %1980 = vpow2.f32 %v815_v53  ;;  %v1010_v22 = vmul.f32 %v1963_v15, %v2654_v31  ;;  %v821_v8 = vmul.f32 1.442695, %v766_v59 }
 0x15b   :  { %v1696_v6 = vpop.f32.mrf.mxu0  ;;  %1982 = vrcp.f32 %v922_v18  ;;  %v920_v9 = vadd.f32 2.0, %v2738_v55  ;;  %v764_v13 = vmin.f32 %v2744_v40, 20.0  ;;  %v1068_v54 = vsel %vm972_vm6, %v2570_v60, %v1036_v17 }
 0x15c   :  { %v2750_v10 = vadd.f32 %v1696_v6, %v2539_v27  ;;  %v1967_v37 = vpop.eup %1966  ;;  %v1040_v4 = vmul.f32 %v1008_v30, %v2587_v42  ;;  %v1129_v7 = vpack.c.bf16 %v1068_v54, %v2714_v23  ;;  %v1039_v60 = vmul.f32 %v1007_v25, %v2578_v24 }
 0x15d   :  { %v712_v11 = vpop.f32.mrf.mxu0  ;;  %v1969_v31 = vpop.eup %1968  ;;  %v1013_v51 = vmul.f32 %v1967_v37, %v2666_v44  ;;  %1984 = vrcp.f32 %v920_v9  ;;  %v817_v61 = vmul.f32 1.442695, %v764_v13  ;;  %v1042_v62 = vmul.f32 %v1010_v22, %v2582_v16 }
 0x15e   :  { %v769_v3 = vmin.f32 %v2750_v10, 20.0  ;;  %v2762_v20 = vadd.f32 %v2539_v27, %v712_v11  ;;  %v1011_v14 = vmul.f32 %v1969_v31, %v2670_v26  ;;  %1986 = vpow2.f32 %v821_v8  ;;  %1722 = vmatprep.mubr.bf16.mxu1 %v1129_v7 }
 0x15f   :  { %v1697_v2 = vpop.f32.mrf.mxu0  ;;  %v2773_v5 = vmul.f32 %v1013_v51, %v2593_v32  ;;  %1988 = vpow2.f32 %v817_v61  ;;  %v1070_v23 = vsel %vm974_vm7, %v2566_v33, %v2700_v52  ;;  %v1072_v33 = vsel %vm976_vm8, %v2587_v42, %v1040_v4 }
 0x160   :  { %v827_v1 = vmul.f32 1.442695, %v769_v3  ;;  %v767_v28 = vmin.f32 %v2762_v20, 20.0  ;;  %v2769_v44 = vadd.f32 %v1697_v2, %v2539_v27  ;;  %v1971_v17 = vpop.eup %1970  ;;  %v2782_v53 = vmul.f32 %v1011_v14, %v2600_v49 }
 0x161   :  { %v715_v26 = vpop.f32.mrf.mxu0  ;;  %v1014_v48 = vmul.f32 %v1971_v17, %v2685_v63  ;;  %v1130_v18 = vpack.c.bf16 %v1070_v23, %v2724_v19  ;;  %v1071_v30 = vsel %vm975_vm9, %v2578_v24, %v1039_v60  ;;  %v1073_v42 = vsel %vm977_vm10, %v2574_v58, %v2731_v38 }
 0x162   :  { %1990 = vpow2.f32 %v827_v1  ;;  %v823_v39 = vmul.f32 1.442695, %v767_v28  ;;  %v770_v35 = vmin.f32 %v2769_v44, 20.0  ;;  %v1973_v15 = vpop.eup %1972  ;;  %v2785_v50 = vadd.f32 %v2539_v27, %v715_v26 }
 0x163   :  { %v1700_v25 = vpop.f32.mrf.mxu0  ;;  %v1012_v63 = vmul.f32 %v1973_v15, %v2693_v43  ;;  %1723 = vmatmul.mubr.bf16.gmra.mxu1 %v1130_v18  ;;  %v1131_v19 = vpack.c.bf16 %v1072_v33, %v1071_v30  ;;  %v2806_v24 = vmul.f32 %v1014_v48, %v2607_v47  ;;  %v1074_v4 = vsel %vm978_vm11, %v2582_v16, %v1042_v62 }
 0x164   :  { %1992 = vpow2.f32 %v823_v39  ;;  %v829_v52 = vmul.f32 1.442695, %v770_v35  ;;  %v1975_v59 = vpop.eup %1974  ;;  %v768_v6 = vmin.f32 %v2785_v50, 20.0  ;;  %v2797_v22 = vadd.f32 %v1700_v25, %v2539_v27 }
 0x165   :  { %v728_v9 = vpop.f32.mrf.mxu0  ;;  %v1977_v43 = vpop.eup %1976  ;;  %v1044_v13 = vmul.f32 %v1012_v63, %v2615_v36  ;;  %1726 = vmatprep.mubr.bf16.mxu1 %v1131_v19  ;;  %v2817_v51 = vmul.f32 %v1975_v59, %v2705_v46  ;;  %v1132_v62 = vpack.c.bf16 %v1074_v4, %v1073_v42  ;;  %vm981_vm14 = vcmp.gt.f32.partialorder %v2593_v32, 20.0 }
 0x166   :  { %1994 = vpow2.f32 %v829_v52  ;;  %v2809_v37 = vadd.f32 %v2539_v27, %v728_v9  ;;  %v1979_v8 = vpop.eup %1978  ;;  %v861_v58 = vadd.f32 2.0, %v1977_v43  ;;  %v825_v38 = vmul.f32 1.442695, %v768_v6 }
 0x167   :  { %v773_v11 = vmin.f32 %v2797_v22, 20.0  ;;  %v1701_v54 = vpop.f32.mrf.mxu0  ;;  %v1981_v31 = vpop.eup %1980  ;;  %v1015_v3 = vmul.f32 %v1979_v8, %v2717_v12  ;;  %vm982_vm15 = vcmp.gt.f32.partialorder %v2607_v47, 20.0  ;;  %vm983_vm0 = vcmp.gt.f32.partialorder %v2630_v21, 20.0 }
 0x168   :  { %v771_v14 = vmin.f32 %v2809_v37, 20.0  ;;  %v2822_v61 = vadd.f32 %v1701_v54, %v2539_v27  ;;  %v1983_v16 = vpop.eup %1982  ;;  %v2824_v2 = vmul.f32 %v1977_v43, %v861_v58  ;;  %v859_v7 = vadd.f32 2.0, %v1981_v31 }
 0x169   :  { %1996 = vpow2.f32 %v825_v38  ;;  %v835_v60 = vmul.f32 1.442695, %v773_v11  ;;  %v731_v1 = vpop.f32.mrf.mxu0  ;;  %v1018_v28 = vmul.f32 %v1983_v16, %v2727_v56  ;;  %v1047_v35 = vmul.f32 %v1015_v3, %v2630_v21 }
 0x16a   :  { %v831_v17 = vmul.f32 1.442695, %v771_v14  ;;  %v774_v46 = vmin.f32 %v2822_v61, 20.0  ;;  %v1985_v26 = vpop.eup %1984  ;;  %v925_v12 = vadd.f32 2.0, %v2824_v2  ;;  %v2829_v23 = vmul.f32 %v1981_v31, %v859_v7 }
 0x16b   :  { %1998 = vpow2.f32 %v835_v60  ;;  %v2832_v48 = vadd.f32 %v2539_v27, %v731_v1  ;;  %v1987_v39 = vpop.eup %1986  ;;  %v1016_v15 = vmul.f32 %v1985_v26, %v2738_v55  ;;  %1727 = vmatmul.mubr.bf16.gmra.mxu1 %v1132_v62  ;;  %v1050_v52 = vmul.f32 %v1018_v28, %v2637_v57 }
 0x16c   :  { %2000 = vpow2.f32 %v831_v17  ;;  %v837_v56 = vmul.f32 1.442695, %v774_v46  ;;  %v923_v25 = vadd.f32 2.0, %v2829_v23  ;;  %v862_v18 = vadd.f32 2.0, %v1987_v39  ;;  %v1989_v63 = vpop.eup %1988 }
 0x16d   :  { %2002 = vrcp.f32 %v925_v12  ;;  %v772_v33 = vmin.f32 %v2832_v48, 20.0  ;;  %v1075_v27 = vsel %vm979_vm12, %v2600_v49, %v2782_v53  ;;  %v1076_v55 = vsel %vm980_vm13, %v2615_v36, %v1044_v13 }
 0x16e   :  { %2004 = vpow2.f32 %v837_v56  ;;  %v2846_v59 = vmul.f32 %v1987_v39, %v862_v18  ;;  %v860_v6 = vadd.f32 2.0, %v1989_v63  ;;  %v1048_v19 = vmul.f32 %v1016_v15, %v2644_v41 }
 0x16f   :  { %v1991_v30 = vpop.eup %1990  ;;  %2006 = vrcp.f32 %v923_v25  ;;  %v833_v9 = vmul.f32 1.442695, %v772_v33  ;;  %v1133_v43 = vpack.c.bf16 %v1076_v55, %v1075_v27  ;;  %v1077_v13 = vsel %vm981_vm14, %v2593_v32, %v2773_v5 }
 0x170   :  { %v865_v42 = vadd.f32 2.0, %v1991_v30  ;;  %v926_v8 = vadd.f32 2.0, %v2846_v59  ;;  %v2851_v49 = vmul.f32 %v1989_v63, %v860_v6  ;;  %v1078_v58 = vsel %vm982_vm15, %v2607_v47, %v2806_v24 }
 0x171   :  { %v1993_v4 = vpop.eup %1992  ;;  %2008 = vpow2.f32 %v833_v9  ;;  %1730 = vmatprep.mubr.bf16.mxu1 %v1133_v43  ;;  %v1134_v54 = vpack.c.bf16 %v1078_v58, %v1077_v13  ;;  %vm984_vm1 = vcmp.gt.f32.partialorder %v2644_v41, 20.0  ;;  %v1079_v32 = vsel %vm983_vm0, %v2630_v21, %v1047_v35 }
 0x172   :  { %v2854_v36 = vmul.f32 %v1991_v30, %v865_v42  ;;  %v863_v53 = vadd.f32 2.0, %v1993_v4  ;;  %2010 = vrcp.f32 %v926_v8  ;;  %v924_v11 = vadd.f32 2.0, %v2851_v49 }
 0x173   :  { %v1995_v38 = vpop.eup %1994  ;;  %1731 = vmatmul.mubr.bf16.gmra.mxu1 %v1134_v54  ;;  %v1080_v47 = vsel %vm984_vm1, %v2644_v41, %v1048_v19  ;;  %v1049_v24 = vmul.f32 %v2817_v51, %v2623_v45  ;;  %vm986_vm2 = vcmp.gt.f32.partialorder %v2637_v57, 20.0  ;;  %vm985_vm3 = vcmp.gt.f32.partialorder %v2623_v45, 20.0 }
 0x174   :  { %v929_v31 = vadd.f32 2.0, %v2854_v36  ;;  %v2863_v3 = vmul.f32 %v1993_v4, %v863_v53  ;;  %v866_v14 = vadd.f32 2.0, %v1995_v38  ;;  %2012 = vrcp.f32 %v924_v11 }
 0x175   :  { %v1135_v60 = vpack.c.bf16 %v1080_v47, %v1079_v32  ;;  %v1082_v21 = vsel %vm986_vm2, %v2637_v57, %v1050_v52  ;;  %v1081_v12 = vsel %vm985_vm3, %v2623_v45, %v1049_v24  ;;  %vm990_vm4 = vcmp.gt.f32.partialorder %v2734_v29, 20.0 }
 0x176   :  { %v1997_v5 = vpop.eup %1996  ;;  %v927_v16 = vadd.f32 2.0, %v2863_v3  ;;  %v898_v7 = vmul.f32 %v1995_v38, %v866_v14  ;;  %2014 = vrcp.f32 %v929_v31  ;;  %v1136_v56 = vpack.c.bf16 %v1082_v21, %v1081_v12 }
 0x177   :  { %v864_v1 = vadd.f32 2.0, %v1997_v5  ;;  %1734 = vmatprep.mubr.bf16.mxu1 %v1135_v60  ;;  %vm987_vm5 = vcmp.gt.f32.partialorder %v2711_v34, 20.0  ;;  %vm988_vm6 = vcmp.gt.f32.partialorder %v2744_v40, 20.0  ;;  %vm989_vm7 = vcmp.gt.f32.partialorder %v2696_v0, 20.0 }
 0x178   :  { %v1999_v28 = vpop.eup %1998  ;;  %2016 = vrcp.f32 %v927_v16  ;;  %v930_v17 = vadd.f32 2.0, %v898_v7  ;;  %vm994_vm8 = vcmp.gt.f32.partialorder %v2769_v44, 20.0  ;;  %vm991_vm9 = vcmp.gt.f32.partialorder %v2762_v20, 20.0 }
 0x179   :  { %v2001_v46 = vpop.eup %2000  ;;  %v896_v41 = vmul.f32 %v1997_v5, %v864_v1  ;;  %v869_v62 = vadd.f32 2.0, %v1999_v28  ;;  %vm992_vm10 = vcmp.gt.f32.partialorder %v2785_v50, 20.0  ;;  %vm993_vm11 = vcmp.gt.f32.partialorder %v2750_v10, 20.0 }
 0x17a   :  { %v2003_v51 = vpop.eup %2002  ;;  %2018 = vrcp.f32 %v930_v17  ;;  %v867_v26 = vadd.f32 2.0, %v2001_v46  ;;  %vm998_vm12 = vcmp.gt.f32.partialorder %v2822_v61, 20.0  ;;  %vm995_vm13 = vcmp.gt.f32.partialorder %v2809_v37, 20.0 }
 0x17b   :  { %v2005_v39 = vpop.eup %2004  ;;  %v928_v35 = vadd.f32 2.0, %v896_v41  ;;  %v2875_v15 = vmul.f32 %v1999_v28, %v869_v62  ;;  %1735 = vmatmul.mubr.bf16.gmra.mxu1 %v1136_v56  ;;  %v1021_v6 = vmul.f32 %v2003_v51, %v2824_v2  ;;  %vm996_vm14 = vcmp.gt.f32.partialorder %v2832_v48, 20.0 }
 0x17c   :  { %v2007_v25 = vpop.eup %2006  ;;  %v899_v18 = vmul.f32 %v2001_v46, %v867_v26  ;;  %v870_v33 = vadd.f32 2.0, %v2005_v39  ;;  %vm997_vm15 = vcmp.gt.f32.partialorder %v2797_v22, 20.0 }
 0x17d   :  { %2020 = vrcp.f32 %v928_v35  ;;  %v933_v57 = vadd.f32 2.0, %v2875_v15  ;;  %v1019_v55 = vmul.f32 %v2007_v25, %v2829_v23  ;;  %v1053_v58 = vmul.f32 %v1021_v6, %v2696_v0 }
 0x17e   :  { %v2009_v63 = vpop.eup %2008  ;;  %v931_v52 = vadd.f32 2.0, %v899_v18  ;;  %v902_v27 = vmul.f32 %v2005_v39, %v870_v33 }
 0x17f   :  { %2022 = vrcp.f32 %v933_v57  ;;  %v868_v30 = vadd.f32 2.0, %v2009_v63  ;;  %v2011_v45 = vpop.eup %2010  ;;  %v1051_v4 = vmul.f32 %v1019_v55, %v2711_v34  ;;  %v1085_v5 = vsel %vm989_vm7, %v2696_v0, %v1053_v58  ;;  %v2924_v57 = vld [vmem:[%s2968_s4] ss:$0 sm:$0xff]  ;;  %s2155_s4 = smov [#allocation9]  }
 0x180   :  { %2024 = vrcp.f32 %v931_v52  ;;  %v934_v9 = vadd.f32 2.0, %v902_v27  ;;  %v1022_v19 = vmul.f32 %v2011_v45, %v2846_v59  ;;  %s1575_s24 = sshll.u32 %s2155_s4, 4  ;;  %s1576_s24 = int_to_ptr.vmem [resolvable:$true] %s1575_s24 }
 0x181   :  { %v900_v42 = vmul.f32 %v2009_v63, %v868_v30  ;;  %v2013_v43 = vpop.eup %2012  ;;  %v2031_v30 = vld [vmem:[#allocation3] sm:$0xff]  ;;  %s2122_s25 = scalar_lea.vmem %s1576_s24, 4096  ;;  %p2127_p2 = scmp.lt.s32.totalorder %s1576_s24, %s1576_s24 }
 0x182   :  { %2026 = vrcp.f32 %v934_v9  ;;  %v1054_v8 = vmul.f32 %v1022_v19, %v2734_v29  ;;  %v1020_v53 = vmul.f32 %v2013_v43, %v2851_v49  ;;  %v1083_v49 = vsel %vm987_vm5, %v2711_v34, %v1051_v4  ;;  %v2032_v9 = vld [vmem:[#allocation3 + $0x18] sm:$0xff]  ;;  %v2033_v43 = vld [vmem:[#allocation3 + $0x8] sm:$0xff]  ;;  %p2123_p1 = scmp.ne.s32.totalorder %s1576_s24, %s2122_s25  ;;  %p2128_p3 = scmp.lt.s32.totalorder %s2122_s25, %s2122_s25 }
 0x183   :  { %v932_v13 = vadd.f32 2.0, %v900_v42  ;;  %v2015_v23 = vpop.eup %2014 }
 0x184   :  { %v1052_v2 = vmul.f32 %v1020_v53, %v2744_v40  ;;  %v1086_v59 = vsel %vm990_vm4, %v2734_v29, %v1054_v8  ;;  %v1025_v14 = vmul.f32 %v2015_v23, %v2854_v36  ;;  %v2034_v23 = vld [vmem:[#allocation3 + $0x30] sm:$0xff]  ;;  %p2129_p4 = por %p2128_p3, %p2127_p2 }
 0x185   :  { %v2017_v38 = vpop.eup %2016  ;;  %2028 = vrcp.f32 %v932_v13  ;;  %v1138_v24 = vpack.c.bf16 %v1086_v59, %v1085_v5  ;;  %v2035_v59 = vld [vmem:[#allocation3 + $0x20] sm:$0xff]  ;;  %v2037_v5 = vld [vmem:[#allocation3 + $0x28] sm:$0xff] }
 0x186   :  { %v1023_v54 = vmul.f32 %v2017_v38, %v2863_v3  ;;  %v1084_v31 = vsel %vm988_vm6, %v2744_v40, %v1052_v2  ;;  %v1057_v40 = vmul.f32 %v1025_v14, %v2750_v10  ;;  %p2130_p5 = pnand %p2129_p4, %p2123_p1 }
 0x187   :  { %v2019_v11 = vpop.eup %2018  ;;  %v1137_v47 = vpack.c.bf16 %v1084_v31, %v1083_v49  ;;  %v2036_v31 = vld [vmem:[#allocation3 + $0x38] sm:$0xff] }
 0x188   :  { %v1026_v32 = vmul.f32 %v2019_v11, %v898_v7  ;;  %v1055_v29 = vmul.f32 %v1023_v54, %v2762_v20  ;;  %v1089_v51 = vsel %vm993_vm11, %v2750_v10, %v1057_v40 }
 0x189   :  { %1738 = vmatprep.mubr.bf16.mxu1 %v1137_v47 }
 0x18a   :  { %v2021_v16 = vpop.eup %2020  ;;  %v1058_v60 = vmul.f32 %v1026_v32, %v2769_v44  ;;  %1739 = vmatmul.mubr.bf16.gmra.mxu1 %v1138_v24  ;;  %v1087_v17 = vsel %vm991_vm9, %v2762_v20, %v1055_v29  ;;  %v2038_v29 = vld [vmem:[#allocation3 + $0x50] sm:$0xff] }
 0x18b   :  { %v1024_v3 = vmul.f32 %v2021_v16, %v896_v41 }
 0x18c   :  { %v2023_v34 = vpop.eup %2022  ;;  %v1090_v0 = vsel %vm994_vm8, %v2769_v44, %v1058_v60 }
 0x18d   :  { %v2025_v1 = vpop.eup %2024  ;;  %v1056_v28 = vmul.f32 %v1024_v3, %v2785_v50  ;;  %v1029_v46 = vmul.f32 %v2023_v34, %v2875_v15  ;;  %v1140_v26 = vpack.c.bf16 %v1090_v0, %v1089_v51 }
 0x18e   :  { %v1027_v7 = vmul.f32 %v2025_v1, %v899_v18  ;;  %v2039_v1 = vld [vmem:[#allocation3 + $0x40] sm:$0xff] }
 0x18f   :  { %v2027_v36 = vpop.eup %2026  ;;  %v1088_v21 = vsel %vm992_vm10, %v2785_v50, %v1056_v28  ;;  %v1061_v20 = vmul.f32 %v1029_v46, %v2797_v22 }
 0x190   :  { %v1030_v41 = vmul.f32 %v2027_v36, %v902_v27  ;;  %v1139_v62 = vpack.c.bf16 %v1088_v21, %v1087_v17  ;;  %v1059_v44 = vmul.f32 %v1027_v7, %v2809_v37  ;;  %v2040_v7 = vld [vmem:[#allocation3 + $0x58] sm:$0xff] }
 0x191   :  { %v1093_v18 = vsel %vm997_vm15, %v2797_v22, %v1061_v20  ;;  %v2043_v20 = vld [vmem:[#allocation3 + $0x60] sm:$0xff] }
 0x192   :  { %v2029_v12 = vpop.eup %2028  ;;  %v1062_v39 = vmul.f32 %v1030_v41, %v2822_v61  ;;  %1742 = vmatprep.mubr.bf16.mxu1 %v1139_v62  ;;  %v1091_v15 = vsel %vm995_vm13, %v2809_v37, %v1059_v44  ;;  %v2030_v37 = vld [vmem:[#allocation3 + $0x10] sm:$0xff]  ;;  %v2041_v41 = vld [vmem:[#allocation3 + $0x48] sm:$0xff] }
 0x193   :  { %v1028_v35 = vmul.f32 %v2029_v12, %v900_v42  ;;  %1743 = vmatmul.mubr.bf16.gmra.mxu1 %v1140_v26  ;;  %v2042_v12 = vld [vmem:[#allocation3 + $0x70] sm:$0xff] }
 0x194   :  { %v1094_v10 = vsel %vm998_vm12, %v2822_v61, %v1062_v39 }
 0x195   :  { %v1060_v50 = vmul.f32 %v1028_v35, %v2832_v48  ;;  %v1142_v33 = vpack.c.bf16 %v1094_v10, %v1093_v18 }
 0x197   :  { %v1092_v56 = vsel %vm996_vm14, %v2832_v48, %v1060_v50 }
 0x198   :  { %v1141_v25 = vpack.c.bf16 %v1092_v56, %v1091_v15  ;;  %v2044_v56 = vld [vmem:[#allocation3 + $0x78] sm:$0xff] }
 0x19a   :  { %1746 = vmatprep.mubr.bf16.mxu1 %v1141_v25 }
 0x19b   :  { %1747 = vmatmul.mubr.bf16.gmra.mxu1 %v1142_v33 }
 0x213   :  { %v1720_v63 = vpop.f32.mrf.mxu1 }
 0x214   :  { %v1476_v61 = vadd.f32 %v1720_v63, %v2924_v57  ;;  %v2045_v63 = vld [vmem:[#allocation3 + $0x68] sm:$0xff] }
 0x215   :  { %v1241_v52 = vpop.f32.mrf.mxu1 }
 0x216   :  { %v1508_v27 = vadd.f32 %v2030_v37, %v1476_v61  ;;  %v1474_v48 = vadd.f32 %v2924_v57, %v1241_v52 }
 0x217   :  { %v1721_v55 = vpop.f32.mrf.mxu1 }
 0x218   :  { %1540 = vst [vmem:[#allocation9 + $0x10] sm:$0xff] %v1508_v27  ;;  %v1506_v22 = vadd.f32 %v2031_v30, %v1474_v48  ;;  %v1477_v45 = vadd.f32 %v1721_v55, %v2924_v57  ;;  %v2046_v27 = vld [vmem:[#allocation3 + $0x90] sm:$0xff] }
 0x219   :  { %v1244_v6 = vpop.f32.mrf.mxu1 }
 0x21a   :  { %1538 = vst [vmem:[#allocation9] sm:$0xff] %v1506_v22  ;;  %v1509_v19 = vadd.f32 %v2032_v9, %v1477_v45  ;;  %v1475_v42 = vadd.f32 %v2924_v57, %v1244_v6  ;;  %v2047_v22 = vld [vmem:[#allocation3 + $0x80] sm:$0xff] }
 0x21c   :  { %1541 = vst [vmem:[#allocation9 + $0x18] sm:$0xff] %v1509_v19  ;;  %v1507_v4 = vadd.f32 %v2033_v43, %v1475_v42  ;;  %v2048_v19 = vld [vmem:[#allocation3 + $0x98] sm:$0xff] }
 0x21e   :  { %1539 = vst [vmem:[#allocation9 + $0x8] sm:$0xff] %v1507_v4  ;;  %v2049_v4 = vld [vmem:[#allocation3 + $0x88] sm:$0xff] }
 0x223   :  { %v1724_v8 = vpop.f32.mrf.mxu1 }
 0x224   :  { %v1480_v53 = vadd.f32 %v1724_v8, %v2924_v57 }
 0x225   :  { %v1257_v13 = vpop.f32.mrf.mxu1 }
 0x226   :  { %v1512_v58 = vadd.f32 %v2034_v23, %v1480_v53  ;;  %v1478_v38 = vadd.f32 %v2924_v57, %v1257_v13 }
 0x227   :  { %v1725_v2 = vpop.f32.mrf.mxu1 }
 0x228   :  { %1544 = vst [vmem:[#allocation9 + $0x30] sm:$0xff] %v1512_v58  ;;  %v1510_v11 = vadd.f32 %v2035_v59, %v1478_v38  ;;  %v1481_v54 = vadd.f32 %v1725_v2, %v2924_v57  ;;  %v2050_v58 = vld [vmem:[#allocation3 + $0xb0] sm:$0xff] }
 0x229   :  { %v1260_v49 = vpop.f32.mrf.mxu1 }
 0x22a   :  { %1542 = vst [vmem:[#allocation9 + $0x20] sm:$0xff] %v1510_v11  ;;  %v1513_v14 = vadd.f32 %v2036_v31, %v1481_v54  ;;  %v1479_v32 = vadd.f32 %v2924_v57, %v1260_v49  ;;  %v2051_v11 = vld [vmem:[#allocation3 + $0xa0] sm:$0xff] }
 0x22b   :  { %v1728_v47 = vpop.f32.mrf.mxu1 }
 0x22c   :  { %1545 = vst [vmem:[#allocation9 + $0x38] sm:$0xff] %v1513_v14  ;;  %v1511_v24 = vadd.f32 %v2037_v5, %v1479_v32  ;;  %v1484_v16 = vadd.f32 %v1728_v47, %v2924_v57  ;;  %v2052_v14 = vld [vmem:[#allocation3 + $0xb8] sm:$0xff] }
 0x22d   :  { %v1273_v60 = vpop.f32.mrf.mxu1 }
 0x22e   :  { %1543 = vst [vmem:[#allocation9 + $0x28] sm:$0xff] %v1511_v24  ;;  %v1516_v3 = vadd.f32 %v2038_v29, %v1484_v16  ;;  %v1482_v34 = vadd.f32 %v2924_v57, %v1273_v60  ;;  %v2053_v24 = vld [vmem:[#allocation3 + $0xa8] sm:$0xff] }
 0x22f   :  { %v1729_v40 = vpop.f32.mrf.mxu1 }
 0x230   :  { %1548 = vst [vmem:[#allocation9 + $0x50] sm:$0xff] %v1516_v3  ;;  %v1514_v28 = vadd.f32 %v2039_v1, %v1482_v34  ;;  %v1485_v0 = vadd.f32 %v1729_v40, %v2924_v57  ;;  %v2054_v3 = vld [vmem:[#allocation3 + $0xd0] sm:$0xff] }
 0x231   :  { %v1276_v36 = vpop.f32.mrf.mxu1 }
 0x232   :  { %1546 = vst [vmem:[#allocation9 + $0x40] sm:$0xff] %v1514_v28  ;;  %v1517_v17 = vadd.f32 %v2040_v7, %v1485_v0  ;;  %v1483_v21 = vadd.f32 %v2924_v57, %v1276_v36  ;;  %v2055_v28 = vld [vmem:[#allocation3 + $0xc0] sm:$0xff] }
 0x233   :  { %v1732_v46 = vpop.f32.mrf.mxu1 }
 0x234   :  { %1549 = vst [vmem:[#allocation9 + $0x58] sm:$0xff] %v1517_v17  ;;  %v1515_v62 = vadd.f32 %v2041_v41, %v1483_v21  ;;  %v1488_v51 = vadd.f32 %v1732_v46, %v2924_v57  ;;  %v2056_v17 = vld [vmem:[#allocation3 + $0xd8] sm:$0xff] }
 0x235   :  { %v1289_v26 = vpop.f32.mrf.mxu1 }
 0x236   :  { %1547 = vst [vmem:[#allocation9 + $0x48] sm:$0xff] %v1515_v62  ;;  %v1520_v39 = vadd.f32 %v2042_v12, %v1488_v51  ;;  %v1486_v44 = vadd.f32 %v2924_v57, %v1289_v26  ;;  %v2057_v62 = vld [vmem:[#allocation3 + $0xc8] sm:$0xff] }
 0x237   :  { %v1733_v35 = vpop.f32.mrf.mxu1 }
 0x238   :  { %1552 = vst [vmem:[#allocation9 + $0x70] sm:$0xff] %v1520_v39  ;;  %v1518_v50 = vadd.f32 %v2043_v20, %v1486_v44  ;;  %v1489_v10 = vadd.f32 %v1733_v35, %v2924_v57  ;;  %v2058_v39 = vld [vmem:[#allocation3 + $0xf0] sm:$0xff] }
 0x239   :  { %v1292_v15 = vpop.f32.mrf.mxu1 }
 0x23a   :  { %1550 = vst [vmem:[#allocation9 + $0x60] sm:$0xff] %v1518_v50  ;;  %v1521_v25 = vadd.f32 %v2044_v56, %v1489_v10  ;;  %v1487_v18 = vadd.f32 %v2924_v57, %v1292_v15  ;;  %v2059_v50 = vld [vmem:[#allocation3 + $0xe0] sm:$0xff] }
 0x23b   :  { %v1736_v33 = vpop.f32.mrf.mxu1 }
 0x23c   :  { %1553 = vst [vmem:[#allocation9 + $0x78] sm:$0xff] %v1521_v25  ;;  %v1519_v61 = vadd.f32 %v2045_v63, %v1487_v18  ;;  %v1492_v52 = vadd.f32 %v1736_v33, %v2924_v57  ;;  %v2060_v25 = vld [vmem:[#allocation3 + $0xf8] sm:$0xff]  ;;  %v2061_v63 = vld [vmem:[#allocation3 + $0xe8] sm:$0xff] }
 0x23d   :  { %v1305_v37 = vpop.f32.mrf.mxu1 }
 0x23e   :  { %1551 = vst [vmem:[#allocation9 + $0x68] sm:$0xff] %v1519_v61  ;;  %v1524_v48 = vadd.f32 %v2046_v27, %v1492_v52  ;;  %v1490_v55 = vadd.f32 %v2924_v57, %v1305_v37 }
 0x23f   :  { %v1737_v30 = vpop.f32.mrf.mxu1 }
 0x240   :  { %1556 = vst [vmem:[#allocation9 + $0x90] sm:$0xff] %v1524_v48  ;;  %v1522_v45 = vadd.f32 %v2047_v22, %v1490_v55  ;;  %v1493_v6 = vadd.f32 %v1737_v30, %v2924_v57 }
 0x241   :  { %v1308_v9 = vpop.f32.mrf.mxu1 }
 0x242   :  { %1554 = vst [vmem:[#allocation9 + $0x80] sm:$0xff] %v1522_v45  ;;  %v1525_v42 = vadd.f32 %v2048_v19, %v1493_v6  ;;  %v1491_v43 = vadd.f32 %v2924_v57, %v1308_v9 }
 0x244   :  { %1557 = vst [vmem:[#allocation9 + $0x98] sm:$0xff] %v1525_v42  ;;  %v1523_v8 = vadd.f32 %v2049_v4, %v1491_v43 }
 0x246   :  { %1555 = vst [vmem:[#allocation9 + $0x88] sm:$0xff] %v1523_v8 }
 0x24a   :  { %v1740_v53 = vpop.f32.mrf.mxu1 }
 0x24b   :  { %v1496_v13 = vadd.f32 %v1740_v53, %v2924_v57 }
 0x24c   :  { %v1321_v23 = vpop.f32.mrf.mxu1 }
 0x24d   :  { %v1528_v38 = vadd.f32 %v2050_v58, %v1496_v13  ;;  %v1494_v2 = vadd.f32 %v2924_v57, %v1321_v23 }
 0x24e   :  { %v1741_v59 = vpop.f32.mrf.mxu1 }
 0x24f   :  { %1560 = vst [vmem:[#allocation9 + $0xb0] sm:$0xff] %v1528_v38  ;;  %v1526_v54 = vadd.f32 %v2051_v11, %v1494_v2  ;;  %v1497_v49 = vadd.f32 %v1741_v59, %v2924_v57 }
 0x250   :  { %v1324_v31 = vpop.f32.mrf.mxu1 }
 0x251   :  { %1558 = vst [vmem:[#allocation9 + $0xa0] sm:$0xff] %v1526_v54  ;;  %v1529_v32 = vadd.f32 %v2052_v14, %v1497_v49  ;;  %v1495_v47 = vadd.f32 %v2924_v57, %v1324_v31 }
 0x253   :  { %v1744_v5 = vpop.f32.mrf.mxu1  ;;  %1561 = vst [vmem:[#allocation9 + $0xb8] sm:$0xff] %v1529_v32  ;;  %v1527_v16 = vadd.f32 %v2053_v24, %v1495_v47 }
 0x254   :  { %v1500_v60 = vadd.f32 %v1744_v5, %v2924_v57 }
 0x255   :  { %v1337_v29 = vpop.f32.mrf.mxu1  ;;  %1559 = vst [vmem:[#allocation9 + $0xa8] sm:$0xff] %v1527_v16 }
 0x256   :  { %v1532_v34 = vadd.f32 %v2054_v3, %v1500_v60  ;;  %v1498_v40 = vadd.f32 %v2924_v57, %v1337_v29 }
 0x257   :  { %v1745_v1 = vpop.f32.mrf.mxu1 }
 0x258   :  { %1564 = vst [vmem:[#allocation9 + $0xd0] sm:$0xff] %v1532_v34  ;;  %v1530_v0 = vadd.f32 %v2055_v28, %v1498_v40  ;;  %v1501_v36 = vadd.f32 %v1745_v1, %v2924_v57 }
 0x259   :  { %v1340_v7 = vpop.f32.mrf.mxu1 }
 0x25a   :  { %1562 = vst [vmem:[#allocation9 + $0xc0] sm:$0xff] %v1530_v0  ;;  %v1533_v21 = vadd.f32 %v2056_v17, %v1501_v36  ;;  %v1499_v46 = vadd.f32 %v2924_v57, %v1340_v7 }
 0x25b   :  { %v1748_v41 = vpop.f32.mrf.mxu1 }
 0x25c   :  { %1565 = vst [vmem:[#allocation9 + $0xd8] sm:$0xff] %v1533_v21  ;;  %v1531_v51 = vadd.f32 %v2057_v62, %v1499_v46  ;;  %v1504_v26 = vadd.f32 %v1748_v41, %v2924_v57 }
 0x25d   :  { %v1353_v12 = vpop.f32.mrf.mxu1 }
 0x25e   :  { %1563 = vst [vmem:[#allocation9 + $0xc8] sm:$0xff] %v1531_v51  ;;  %v1536_v44 = vadd.f32 %v2058_v39, %v1504_v26  ;;  %v1502_v35 = vadd.f32 %v2924_v57, %v1353_v12 }
 0x25f   :  { %v1749_v20 = vpop.f32.mrf.mxu1 }
 0x260   :  { %1568 = vst [vmem:[#allocation9 + $0xf0] sm:$0xff] %v1536_v44  ;;  %v1534_v10 = vadd.f32 %v2059_v50, %v1502_v35  ;;  %v1505_v15 = vadd.f32 %v1749_v20, %v2924_v57 }
 0x261   :  { %v1356_v56 = vpop.f32.mrf.mxu1 }
 0x262   :  { %1566 = vst [vmem:[#allocation9 + $0xe0] sm:$0xff] %v1534_v10  ;;  %v1537_v18 = vadd.f32 %v2060_v25, %v1505_v15  ;;  %v1503_v33 = vadd.f32 %v2924_v57, %v1356_v56 }
 0x264   :  { %1569 = vst [vmem:[#allocation9 + $0xf8] sm:$0xff] %v1537_v18  ;;  %v1535_v61 = vadd.f32 %v2061_v63, %v1503_v33 }
 0x266   :  { %1567 = vst [vmem:[#allocation9 + $0xe8] sm:$0xff] %v1535_v61 }
 0x267   :  { %2133 = shalt.err (!%p2130_p5)
}
 0x268   :  { %1581 = dma.vmem_to_hbm [thread:$0]  %s1576_s24, 4096, %s2973_s9, [#allocation5], %s2152_s15, %s2152_s15, %s2153_s16  }
 0x269   :  { %2146 = dma.done.wait [#allocation5], 4096  }
 0x26a   :  { %2147 = vsyncadd [#allocation5], 4294963200 }
 0x26b   :  { %1585 = vsyncpa [#allocation4], 1 }
 0x26c   :  { %1586 = vsyncpa [#allocation7], 1 }
 0x26d   :  { %1587 = vsyncpa [#allocation5], 1 }

</bundles_post_ra>
